<compile_context>
chip_gen: v6e
topology: v6e:2x2x1
jax: 0.10.0
libtpu: 0.0.40
codegen_flags: <defaults>
</compile_context>

<pallas_src>
import functools
import math

import jax
import jax.numpy as jnp
from jax.experimental import pallas as pl
from jax.experimental.pallas import tpu as pltpu


# ----------------------------------------------------------------------------
# In-kernel helpers (all f32 elementwise math -- v5e-safe)
# ----------------------------------------------------------------------------

def _erf(x):
    # Abramowitz & Stegun 7.1.26 (|error| <= 1.5e-7): exact-GELU semantics
    # without relying on an erf primitive lowering.
    a1, a2, a3, a4, a5 = (0.254829592, -0.284496736, 1.421413741,
                          -1.453152027, 1.061405429)
    p = 0.3275911
    z = jnp.where(x >= 0.0, x, -x)
    t = 1.0 / (1.0 + p * z)
    poly = ((((a5 * t + a4) * t + a3) * t + a2) * t + a1) * t
    y = 1.0 - poly * jnp.exp(-z * z)
    return jnp.where(x >= 0.0, y, -y)


def _gelu_exact(x):
    # torch.nn.GELU default (erf form).
    return 0.5 * x * (1.0 + _erf(x * (1.0 / math.sqrt(2.0))))


def _layer_norm(x, gamma, beta, eps=1e-5):
    # torch.nn.LayerNorm over the last dim (biased variance, eps inside sqrt).
    mu = jnp.mean(x, axis=-1, keepdims=True)
    xc = x - mu
    var = jnp.mean(xc * xc, axis=-1, keepdims=True)
    return xc * jax.lax.rsqrt(var + eps) * gamma + beta


# ----------------------------------------------------------------------------
# One transformer layer (PreNorm-Attention + PreNorm-FeedForward), operating on
# the flat (M, D) residual stream.  `l` is a STATIC layer index into the refs
# (0 for the streaming path whose blocks have a leading 1; the real layer index
# for the fully-resident path).  Weights are loaded from refs right at each
# matmul so nothing large is held live in vregs.
# ----------------------------------------------------------------------------

def _layer_step(x2, l, qkvw_ref, wout_ref, pos_ref, vecs_ref,
                w1_ref, b1_ref, w2_ref, *, B, N, heads, dim_head, scale):
    M, D = x2.shape
    dh = dim_head

    vecs = vecs_ref[l]                                   # (8, D) f32 -- one vreg
    ln1_g, ln1_b, b_out = vecs[0:1], vecs[1:2], vecs[2:3]
    ln2_g, ln2_b, b2 = vecs[3:4], vecs[4:5], vecs[5:6]

    # ---------------- PreNorm + Attention + residual ----------------------
    h = _layer_norm(x2, ln1_g, ln1_b)                    # (M, D) f32
    h_bf = h.astype(jnp.bfloat16)

    # Head-fused, lane-dense projections: [M, D] x [D, heads*dh] each.
    q = jnp.dot(h_bf, qkvw_ref[l, 0], preferred_element_type=jnp.float32)
    k = jnp.dot(h_bf, qkvw_ref[l, 1], preferred_element_type=jnp.float32)
    v = jnp.dot(h_bf, qkvw_ref[l, 2], preferred_element_type=jnp.float32)

    head_outs = []
    for hh in range(heads):                              # static unroll (tiny)
        sl = slice(hh * dh, (hh + 1) * dh)               # lane slice, aligned
        q_h = q[:, sl].reshape(B, N, dh).astype(jnp.bfloat16)
        k_h = k[:, sl].reshape(B, N, dh).astype(jnp.bfloat16)
        v_h = v[:, sl].reshape(B, N, dh).astype(jnp.bfloat16)

        # q @ k^T without a materialized transpose; f32 accumulation.
        dots = jnp.einsum('bnd,bmd->bnm', q_h, k_h,
                          preferred_element_type=jnp.float32) * scale
        dots = dots + pos_ref[l, hh]                     # (N, N) bias, bcast B

        m = jnp.max(dots, axis=-1, keepdims=True)
        e = jnp.exp(dots - m)
        attn = e * pl.reciprocal(jnp.sum(e, axis=-1, keepdims=True), approx=True)

        out_h = jnp.einsum('bnm,bmd->bnd', attn.astype(jnp.bfloat16), v_h,
                           preferred_element_type=jnp.float32)
        head_outs.append(out_h.reshape(M, dh))

    # Concat heads -> ONE [M, heads*dh] x [heads*dh, D] output projection.
    concat = jnp.concatenate(head_outs, axis=-1).astype(jnp.bfloat16)
    proj = jnp.dot(concat, wout_ref[l], preferred_element_type=jnp.float32)
    x2 = x2 + proj + b_out                               # attention residual
    # TODO(synk): nn.Dropout(p=0.0) is an identity -> intentionally skipped.

    # ---------------- PreNorm + FeedForward (GELU) + residual --------------
    h2 = _layer_norm(x2, ln2_g, ln2_b).astype(jnp.bfloat16)
    y = jnp.dot(h2, w1_ref[l], preferred_element_type=jnp.float32) + b1_ref[l]
    y = _gelu_exact(y).astype(jnp.bfloat16)
    y = jnp.dot(y, w2_ref[l], preferred_element_type=jnp.float32) + b2
    return x2 + y                                        # feed-forward residual


# ----------------------------------------------------------------------------
# Kernel A: all layers unrolled in one grid step, weights fully resident in
# VMEM (used when everything fits the VMEM budget -- the case here).
# ----------------------------------------------------------------------------

def _resident_kernel(x_ref, qkvw_ref, wout_ref, pos_ref, vecs_ref,
                     w1_ref, b1_ref, w2_ref, o_ref,
                     *, depth, heads, dim_head, scale):
    B, N, D = x_ref.shape
    x2 = x_ref[...].astype(jnp.float32).reshape(B * N, D)
    for l in range(depth):                               # static unroll
        x2 = _layer_step(x2, l, qkvw_ref, wout_ref, pos_ref, vecs_ref,
                         w1_ref, b1_ref, w2_ref,
                         B=B, N=N, heads=heads, dim_head=dim_head, scale=scale)
    o_ref[...] = x2.reshape(B, N, D).astype(o_ref.dtype)


# ----------------------------------------------------------------------------
# Kernel B: depth-streaming fallback.  grid=(depth,); per-layer weight slabs
# are DMA'd (auto double-buffered); the residual stream stays resident in the
# output block (constant output block index across the grid).
# ----------------------------------------------------------------------------

def _streaming_kernel(x_ref, qkvw_ref, wout_ref, pos_ref, vecs_ref,
                      w1_ref, b1_ref, w2_ref, o_ref,
                      *, heads, dim_head, scale):
    layer = pl.program_id(0)

    @pl.when(layer == 0)
    def _():
        o_ref[...] = x_ref[...]                          # seed residual stream

    B, N, D = o_ref.shape
    x2 = o_ref[...].astype(jnp.float32).reshape(B * N, D)
    x2 = _layer_step(x2, 0, qkvw_ref, wout_ref, pos_ref, vecs_ref,
                     w1_ref, b1_ref, w2_ref,
                     B=B, N=N, heads=heads, dim_head=dim_head, scale=scale)
    o_ref[...] = x2.reshape(B, N, D).astype(o_ref.dtype)


# ----------------------------------------------------------------------------
# Wrapper: one pallas_call for the whole depth-layer stack
# ----------------------------------------------------------------------------

_PARAM_ORDER = ("qkvw", "wout", "pos", "vecs", "w1", "b1", "w2")


def transformer_forward(x, params, *, depth, heads, dim_head,
                        force_streaming=False):
    B, N, D = x.shape
    scale = dim_head ** -0.5

    # Rough resident footprint (all weights + in/out activations, bytes).
    wbytes = sum(int(p.size) * p.dtype.itemsize for p in params.values())
    fits = wbytes + 3 * B * N * D * 4 < 24 * 1024 * 1024   # conservative (v7x)
    resident = fits and not force_streaming

    if resident:
        # Everything resident; single grid step; layers unrolled in-kernel.
        def full(a):
            nd = a.ndim
            return pl.BlockSpec(a.shape, lambda l, nd=nd: (0,) * nd)

        kernel = functools.partial(_resident_kernel, depth=depth, heads=heads,
                                   dim_head=dim_head, scale=scale)
        grid = (1,)
        in_specs = [full(x)] + [full(params[k]) for k in _PARAM_ORDER]
    else:
        # Stream one layer's weights per grid step (auto double-buffered DMA).
        # For real ViT sizes also raise vmem_limit_bytes via CompilerParams.
        def per_layer(a):
            nd = a.ndim - 1
            return pl.BlockSpec((1,) + tuple(a.shape[1:]),
                                lambda l, nd=nd: (l,) + (0,) * nd)

        kernel = functools.partial(_streaming_kernel, heads=heads,
                                   dim_head=dim_head, scale=scale)
        grid = (depth,)
        in_specs = [pl.BlockSpec((B, N, D), lambda l: (0, 0, 0))] + \
                   [per_layer(params[k]) for k in _PARAM_ORDER]

    return pl.pallas_call(
        kernel,
        out_shape=jax.ShapeDtypeStruct((B, N, D), jnp.float32),
        grid=grid,
        in_specs=in_specs,
        out_specs=pl.BlockSpec((B, N, D), lambda l: (0, 0, 0)),
        compiler_params=pltpu.CompilerParams(
            dimension_semantics=("arbitrary",)),   # layers are sequential
    )(x, *[params[k] for k in _PARAM_ORDER])


# ----------------------------------------------------------------------------
# Main
# ----------------------------------------------------------------------------

if __name__ == "__main__":
    B, SEQ, DIM = 2, 8, 128                 # batch, num_patches (= seq), model dim
    DEPTH, HEADS, DIM_HEAD, MLP_DIM = 2, 4, 32, 256
    INNER = HEADS * DIM_HEAD                # 128
    DROPOUT = 0.0                           # p=0 -> identity

    key = jax.random.PRNGKey(0)
    ks = jax.random.split(key, 8)
    x = jax.random.normal(ks[0], (B, SEQ, DIM), dtype=jnp.float32)

    def w(k, shape, s=0.05):
        return s * jax.random.normal(k, shape, dtype=jnp.float32)

    # Full-precision "master" weights (PyTorch layout, linears pre-transposed
    # to [in, out] == W.T; LayerNorm gamma=1, beta=0; biases 0).
    fw = {
        "wq": w(ks[1], (DEPTH, DIM, INNER)),
        "wk": w(ks[2], (DEPTH, DIM, INNER)),
        "wv": w(ks[3], (DEPTH, DIM, INNER)),
        "pos": jax.random.normal(ks[4], (DEPTH, HEADS, SEQ, SEQ), jnp.float32),
        "wout": w(ks[5], (DEPTH, INNER, DIM)),
        "w1": w(ks[6], (DEPTH, DIM, MLP_DIM)),
        "w2": w(ks[7], (DEPTH, MLP_DIM, DIM)),
        "ln1_g": jnp.ones((DEPTH, DIM), jnp.float32),
        "ln1_b": jnp.zeros((DEPTH, DIM), jnp.float32),
        "ln2_g": jnp.ones((DEPTH, DIM), jnp.float32),
        "ln2_b": jnp.zeros((DEPTH, DIM), jnp.float32),
        "b_out": jnp.zeros((DEPTH, DIM), jnp.float32),
        "b1": jnp.zeros((DEPTH, MLP_DIM), jnp.float32),
        "b2": jnp.zeros((DEPTH, DIM), jnp.float32),
    }

    # Packed kernel params: matmul weights in bf16 (f32 accumulation in-kernel),
    # all elementwise-path vectors packed into one f32 [depth, 8, D] slab.
    zeros_row = jnp.zeros((DEPTH, DIM), jnp.float32)
    vecs = jnp.stack([fw["ln1_g"], fw["ln1_b"], fw["b_out"],
                      fw["ln2_g"], fw["ln2_b"], fw["b2"],
                      zeros_row, zeros_row], axis=1)          # (DEPTH, 8, DIM)
    params = {
        "qkvw": jnp.stack([fw["wq"], fw["wk"], fw["wv"]],
                          axis=1).astype(jnp.bfloat16),       # (DEPTH,3,D,INNER)
        "wout": fw["wout"].astype(jnp.bfloat16),              # (DEPTH,INNER,D)
        "pos":  fw["pos"],                                    # (DEPTH,H,N,N) f32
        "vecs": vecs,                                         # (DEPTH,8,D) f32
        "w1":   fw["w1"].astype(jnp.bfloat16),                # (DEPTH,D,MLP)
        "b1":   fw["b1"].reshape(DEPTH, 1, MLP_DIM),          # (DEPTH,1,MLP) f32
        "w2":   fw["w2"].astype(jnp.bfloat16),                # (DEPTH,MLP,D)
    }

    # Pure-JAX f32 reference mirroring the PyTorch module exactly.
    def reference(x, fw):
        def ln(t, g, b, eps=1e-5):
            mu = t.mean(-1, keepdims=True)
            var = ((t - mu) ** 2).mean(-1, keepdims=True)
            return (t - mu) * jax.lax.rsqrt(var + eps) * g + b

        for l in range(DEPTH):
            h = ln(x, fw["ln1_g"][l], fw["ln1_b"][l])
            q = (h @ fw["wq"][l]).reshape(B, SEQ, HEADS, DIM_HEAD).transpose(0, 2, 1, 3)
            k = (h @ fw["wk"][l]).reshape(B, SEQ, HEADS, DIM_HEAD).transpose(0, 2, 1, 3)
            v = (h @ fw["wv"][l]).reshape(B, SEQ, HEADS, DIM_HEAD).transpose(0, 2, 1, 3)
            dots = jnp.einsum('bhnd,bhmd->bhnm', q, k) * (DIM_HEAD ** -0.5)
            dots = dots + fw["pos"][l][None]
            attn = jax.nn.softmax(dots, axis=-1)
            o = jnp.einsum('bhnm,bhmd->bhnd', attn, v)
            o = o.transpose(0, 2, 1, 3).reshape(B, SEQ, INNER)
            x = x + o @ fw["wout"][l] + fw["b_out"][l]
            h2 = ln(x, fw["ln2_g"][l], fw["ln2_b"][l])
            y = jax.nn.gelu(h2 @ fw["w1"][l] + fw["b1"][l], approximate=False)
            x = x + y @ fw["w2"][l] + fw["b2"][l]
        return x

    y_ref = reference(x, fw)

    # Primary path: auto-selected (fully-resident, single grid step here).
    fwd = jax.jit(functools.partial(transformer_forward, depth=DEPTH,
                                    heads=HEADS, dim_head=DIM_HEAD))
    y = jax.block_until_ready(fwd(x, params))
    assert y.shape == (B, SEQ, DIM)
    assert bool(jnp.all(jnp.isfinite(y)))
    err = float(jnp.max(jnp.abs(y - y_ref)))
    assert bool(jnp.allclose(y, y_ref, atol=5e-2, rtol=5e-2)), err

    # Also validate the depth-streaming fallback (used when depth x per-layer
    # weights exceeds the VMEM budget, e.g. ViT-Base on v7x's 64 MiB).
    fwd_s = jax.jit(functools.partial(transformer_forward, depth=DEPTH,
                                      heads=HEADS, dim_head=DIM_HEAD,
                                      force_streaming=True))
    y_s = jax.block_until_ready(fwd_s(x, params))
    err_s = float(jnp.max(jnp.abs(y_s - y_ref)))
    assert bool(jnp.allclose(y_s, y_ref, atol=5e-2, rtol=5e-2)), err_s

    print("KERNEL_OK")
</pallas_src>

<mosaic_0001>
module attributes {stable_mosaic.version = 11 : i64} {
  func.func @_resident_kernel(%arg0: i32, %arg1: memref<2x8x128xf32, #tpu.memory_space<vmem>>, %arg2: memref<2x3x128x128xbf16, #tpu.memory_space<vmem>>, %arg3: memref<2x128x128xbf16, #tpu.memory_space<vmem>>, %arg4: memref<2x4x8x8xf32, #tpu.memory_space<vmem>>, %arg5: memref<2x8x128xf32, #tpu.memory_space<vmem>>, %arg6: memref<2x128x256xbf16, #tpu.memory_space<vmem>>, %arg7: memref<2x1x256xf32, #tpu.memory_space<vmem>>, %arg8: memref<2x256x128xbf16, #tpu.memory_space<vmem>>, %arg9: memref<2x8x128xf32, #tpu.memory_space<vmem>>) attributes {dimension_semantics = [#tpu.dimension_semantics<arbitrary>], iteration_bounds = array<i64: 1>, scalar_prefetch = 0 : i64, scratch_operands = 0 : i64, tpu.core_type = #tpu.core_type<tc>, window_params = [{pipeline_mode = #tpu.pipeline_mode<synchronous>, transform_indices = @transform_0, window_bounds = array<i64: 2, 8, 128>}, {pipeline_mode = #tpu.pipeline_mode<synchronous>, transform_indices = @transform_1, window_bounds = array<i64: 2, 3, 128, 128>}, {pipeline_mode = #tpu.pipeline_mode<synchronous>, transform_indices = @transform_2, window_bounds = array<i64: 2, 128, 128>}, {pipeline_mode = #tpu.pipeline_mode<synchronous>, transform_indices = @transform_3, window_bounds = array<i64: 2, 4, 8, 8>}, {pipeline_mode = #tpu.pipeline_mode<synchronous>, transform_indices = @transform_4, window_bounds = array<i64: 2, 8, 128>}, {pipeline_mode = #tpu.pipeline_mode<synchronous>, transform_indices = @transform_5, window_bounds = array<i64: 2, 128, 256>}, {pipeline_mode = #tpu.pipeline_mode<synchronous>, transform_indices = @transform_6, window_bounds = array<i64: 2, 1, 256>}, {pipeline_mode = #tpu.pipeline_mode<synchronous>, transform_indices = @transform_7, window_bounds = array<i64: 2, 256, 128>}, {pipeline_mode = #tpu.pipeline_mode<synchronous>, transform_indices = @transform_8, window_bounds = array<i64: 2, 8, 128>}]} {
    %c0 = arith.constant 0 : index
    %c0_0 = arith.constant 0 : index
    %c0_1 = arith.constant 0 : index
    %0 = vector.load %arg1[%c0, %c0_0, %c0_1] : memref<2x8x128xf32, #tpu.memory_space<vmem>>, vector<2x8x128xf32>
    %1 = vector.shape_cast %0 : vector<2x8x128xf32> to vector<16x128xf32>
    %c0_2 = arith.constant 0 : index
    %c0_3 = arith.constant 0 : index
    %c0_4 = arith.constant 0 : index
    %2 = vector.load %arg5[%c0_2, %c0_3, %c0_4] : memref<2x8x128xf32, #tpu.memory_space<vmem>>, vector<1x8x128xf32>
    %3 = vector.shape_cast %2 : vector<1x8x128xf32> to vector<8x128xf32>
    %4 = vector.extract_strided_slice %3 {offsets = [0, 0], sizes = [1, 128], strides = [1, 1]} : vector<8x128xf32> to vector<1x128xf32>
    %5 = vector.extract_strided_slice %3 {offsets = [1, 0], sizes = [1, 128], strides = [1, 1]} : vector<8x128xf32> to vector<1x128xf32>
    %6 = vector.extract_strided_slice %3 {offsets = [2, 0], sizes = [1, 128], strides = [1, 1]} : vector<8x128xf32> to vector<1x128xf32>
    %7 = vector.extract_strided_slice %3 {offsets = [3, 0], sizes = [1, 128], strides = [1, 1]} : vector<8x128xf32> to vector<1x128xf32>
    %8 = vector.extract_strided_slice %3 {offsets = [4, 0], sizes = [1, 128], strides = [1, 1]} : vector<8x128xf32> to vector<1x128xf32>
    %9 = vector.extract_strided_slice %3 {offsets = [5, 0], sizes = [1, 128], strides = [1, 1]} : vector<8x128xf32> to vector<1x128xf32>
    %cst = arith.constant dense<0.000000e+00> : vector<16xf32>
    %10 = vector.multi_reduction <add>, %1, %cst [1] : vector<16x128xf32> to vector<16xf32>
    %11 = vector.shape_cast %10 : vector<16xf32> to vector<16x1xf32>
    %cst_5 = arith.constant 1.280000e+02 : f32
    %12 = vector.broadcast %cst_5 : f32 to vector<16x1xf32>
    %13 = arith.divf %11, %12 : vector<16x1xf32>
    %14 = vector.broadcast %13 : vector<16x1xf32> to vector<16x128xf32>
    %15 = arith.subf %1, %14 : vector<16x128xf32>
    %16 = arith.mulf %15, %15 : vector<16x128xf32>
    %cst_6 = arith.constant dense<0.000000e+00> : vector<16xf32>
    %17 = vector.multi_reduction <add>, %16, %cst_6 [1] : vector<16x128xf32> to vector<16xf32>
    %18 = vector.shape_cast %17 : vector<16xf32> to vector<16x1xf32>
    %cst_7 = arith.constant 1.280000e+02 : f32
    %19 = vector.broadcast %cst_7 : f32 to vector<16x1xf32>
    %20 = arith.divf %18, %19 : vector<16x1xf32>
    %cst_8 = arith.constant 9.99999974E-6 : f32
    %21 = vector.broadcast %cst_8 : f32 to vector<16x1xf32>
    %22 = arith.addf %20, %21 : vector<16x1xf32>
    %23 = math.rsqrt %22 : vector<16x1xf32>
    %24 = vector.broadcast %23 : vector<16x1xf32> to vector<16x128xf32>
    %25 = arith.mulf %15, %24 : vector<16x128xf32>
    %26 = vector.broadcast %4 : vector<1x128xf32> to vector<16x128xf32>
    %27 = arith.mulf %25, %26 : vector<16x128xf32>
    %28 = vector.broadcast %5 : vector<1x128xf32> to vector<16x128xf32>
    %29 = arith.addf %27, %28 : vector<16x128xf32>
    %30 = arith.truncf %29 : vector<16x128xf32> to vector<16x128xbf16>
    %c0_9 = arith.constant 0 : index
    %c0_10 = arith.constant 0 : index
    %c0_11 = arith.constant 0 : index
    %c0_12 = arith.constant 0 : index
    %31 = vector.load %arg2[%c0_9, %c0_10, %c0_11, %c0_12] : memref<2x3x128x128xbf16, #tpu.memory_space<vmem>>, vector<1x1x128x128xbf16>
    %32 = vector.shape_cast %31 : vector<1x1x128x128xbf16> to vector<128x128xbf16>
    %cst_13 = arith.constant dense<0.000000e+00> : vector<16x128xf32>
    %33 = tpu.matmul %30, %32, %cst_13 {dimension_numbers = #tpu.dot_dimension_numbers<[1], [0], [0], [1], [0, 0, 1, 1], [], []>} : vector<16x128xbf16>, vector<128x128xbf16>, vector<16x128xf32> -> vector<16x128xf32>
    %c0_14 = arith.constant 0 : index
    %c1 = arith.constant 1 : index
    %c0_15 = arith.constant 0 : index
    %c0_16 = arith.constant 0 : index
    %34 = vector.load %arg2[%c0_14, %c1, %c0_15, %c0_16] : memref<2x3x128x128xbf16, #tpu.memory_space<vmem>>, vector<1x1x128x128xbf16>
    %35 = vector.shape_cast %34 : vector<1x1x128x128xbf16> to vector<128x128xbf16>
    %cst_17 = arith.constant dense<0.000000e+00> : vector<16x128xf32>
    %36 = tpu.matmul %30, %35, %cst_17 {dimension_numbers = #tpu.dot_dimension_numbers<[1], [0], [0], [1], [0, 0, 1, 1], [], []>} : vector<16x128xbf16>, vector<128x128xbf16>, vector<16x128xf32> -> vector<16x128xf32>
    %c0_18 = arith.constant 0 : index
    %c2 = arith.constant 2 : index
    %c0_19 = arith.constant 0 : index
    %c0_20 = arith.constant 0 : index
    %37 = vector.load %arg2[%c0_18, %c2, %c0_19, %c0_20] : memref<2x3x128x128xbf16, #tpu.memory_space<vmem>>, vector<1x1x128x128xbf16>
    %38 = vector.shape_cast %37 : vector<1x1x128x128xbf16> to vector<128x128xbf16>
    %cst_21 = arith.constant dense<0.000000e+00> : vector<16x128xf32>
    %39 = tpu.matmul %30, %38, %cst_21 {dimension_numbers = #tpu.dot_dimension_numbers<[1], [0], [0], [1], [0, 0, 1, 1], [], []>} : vector<16x128xbf16>, vector<128x128xbf16>, vector<16x128xf32> -> vector<16x128xf32>
    %40 = vector.extract_strided_slice %33 {offsets = [0, 0], sizes = [16, 32], strides = [1, 1]} : vector<16x128xf32> to vector<16x32xf32>
    %41 = vector.shape_cast %40 : vector<16x32xf32> to vector<2x8x32xf32>
    %42 = arith.truncf %41 : vector<2x8x32xf32> to vector<2x8x32xbf16>
    %43 = vector.extract_strided_slice %36 {offsets = [0, 0], sizes = [16, 32], strides = [1, 1]} : vector<16x128xf32> to vector<16x32xf32>
    %44 = vector.shape_cast %43 : vector<16x32xf32> to vector<2x8x32xf32>
    %45 = arith.truncf %44 : vector<2x8x32xf32> to vector<2x8x32xbf16>
    %46 = vector.extract_strided_slice %39 {offsets = [0, 0], sizes = [16, 32], strides = [1, 1]} : vector<16x128xf32> to vector<16x32xf32>
    %47 = vector.shape_cast %46 : vector<16x32xf32> to vector<2x8x32xf32>
    %48 = arith.truncf %47 : vector<2x8x32xf32> to vector<2x8x32xbf16>
    "tpu.trace_start"() <{level = 10 : i32, message = "bnd,bmd->bnm"}> : () -> ()
    %cst_22 = arith.constant dense<0.000000e+00> : vector<2x8x8xf32>
    %49 = tpu.matmul %42, %45, %cst_22 {dimension_numbers = #tpu.dot_dimension_numbers<[2], [2], [1], [1], [0, 0, 0, 1, 1, 1], [0], [0]>} : vector<2x8x32xbf16>, vector<2x8x32xbf16>, vector<2x8x8xf32> -> vector<2x8x8xf32>
    "tpu.trace_stop"() : () -> ()
    %cst_23 = arith.constant 0.176776692 : f32
    %50 = vector.broadcast %cst_23 : f32 to vector<2x8x8xf32>
    %51 = arith.mulf %49, %50 : vector<2x8x8xf32>
    %c0_24 = arith.constant 0 : index
    %c0_25 = arith.constant 0 : index
    %c0_26 = arith.constant 0 : index
    %c0_27 = arith.constant 0 : index
    %52 = vector.load %arg4[%c0_24, %c0_25, %c0_26, %c0_27] : memref<2x4x8x8xf32, #tpu.memory_space<vmem>>, vector<1x1x8x8xf32>
    %53 = vector.shape_cast %52 : vector<1x1x8x8xf32> to vector<8x8xf32>
    %54 = vector.shape_cast %53 : vector<8x8xf32> to vector<1x8x8xf32>
    %55 = vector.broadcast %54 : vector<1x8x8xf32> to vector<2x8x8xf32>
    %56 = arith.addf %51, %55 : vector<2x8x8xf32>
    %cst_28 = arith.constant dense<0xFF800000> : vector<2x8xf32>
    %57 = vector.multi_reduction <maximumf>, %56, %cst_28 [2] : vector<2x8x8xf32> to vector<2x8xf32>
    %58 = vector.shape_cast %57 : vector<2x8xf32> to vector<2x8x1xf32>
    %59 = vector.broadcast %58 : vector<2x8x1xf32> to vector<2x8x8xf32>
    %60 = arith.subf %56, %59 : vector<2x8x8xf32>
    %61 = math.exp %60 : vector<2x8x8xf32>
    %cst_29 = arith.constant dense<0.000000e+00> : vector<2x8xf32>
    %62 = vector.multi_reduction <add>, %61, %cst_29 [2] : vector<2x8x8xf32> to vector<2x8xf32>
    %63 = vector.shape_cast %62 : vector<2x8xf32> to vector<2x8x1xf32>
    %64 = tpu.reciprocal %63 {approx = true} : vector<2x8x1xf32> -> vector<2x8x1xf32>
    %65 = vector.broadcast %64 : vector<2x8x1xf32> to vector<2x8x8xf32>
    %66 = arith.mulf %61, %65 : vector<2x8x8xf32>
    %67 = arith.truncf %66 : vector<2x8x8xf32> to vector<2x8x8xbf16>
    "tpu.trace_start"() <{level = 10 : i32, message = "bnm,bmd->bnd"}> : () -> ()
    %cst_30 = arith.constant dense<0.000000e+00> : vector<2x8x32xf32>
    %68 = tpu.matmul %67, %48, %cst_30 {dimension_numbers = #tpu.dot_dimension_numbers<[2], [1], [1], [2], [0, 0, 0, 1, 1, 2], [0], [0]>} : vector<2x8x8xbf16>, vector<2x8x32xbf16>, vector<2x8x32xf32> -> vector<2x8x32xf32>
    "tpu.trace_stop"() : () -> ()
    %69 = vector.shape_cast %68 : vector<2x8x32xf32> to vector<16x32xf32>
    %70 = vector.extract_strided_slice %33 {offsets = [0, 32], sizes = [16, 32], strides = [1, 1]} : vector<16x128xf32> to vector<16x32xf32>
    %71 = vector.shape_cast %70 : vector<16x32xf32> to vector<2x8x32xf32>
    %72 = arith.truncf %71 : vector<2x8x32xf32> to vector<2x8x32xbf16>
    %73 = vector.extract_strided_slice %36 {offsets = [0, 32], sizes = [16, 32], strides = [1, 1]} : vector<16x128xf32> to vector<16x32xf32>
    %74 = vector.shape_cast %73 : vector<16x32xf32> to vector<2x8x32xf32>
    %75 = arith.truncf %74 : vector<2x8x32xf32> to vector<2x8x32xbf16>
    %76 = vector.extract_strided_slice %39 {offsets = [0, 32], sizes = [16, 32], strides = [1, 1]} : vector<16x128xf32> to vector<16x32xf32>
    %77 = vector.shape_cast %76 : vector<16x32xf32> to vector<2x8x32xf32>
    %78 = arith.truncf %77 : vector<2x8x32xf32> to vector<2x8x32xbf16>
    "tpu.trace_start"() <{level = 10 : i32, message = "bnd,bmd->bnm"}> : () -> ()
    %cst_31 = arith.constant dense<0.000000e+00> : vector<2x8x8xf32>
    %79 = tpu.matmul %72, %75, %cst_31 {dimension_numbers = #tpu.dot_dimension_numbers<[2], [2], [1], [1], [0, 0, 0, 1, 1, 1], [0], [0]>} : vector<2x8x32xbf16>, vector<2x8x32xbf16>, vector<2x8x8xf32> -> vector<2x8x8xf32>
    "tpu.trace_stop"() : () -> ()
    %cst_32 = arith.constant 0.176776692 : f32
    %80 = vector.broadcast %cst_32 : f32 to vector<2x8x8xf32>
    %81 = arith.mulf %79, %80 : vector<2x8x8xf32>
    %c0_33 = arith.constant 0 : index
    %c1_34 = arith.constant 1 : index
    %c0_35 = arith.constant 0 : index
    %c0_36 = arith.constant 0 : index
    %82 = vector.load %arg4[%c0_33, %c1_34, %c0_35, %c0_36] : memref<2x4x8x8xf32, #tpu.memory_space<vmem>>, vector<1x1x8x8xf32>
    %83 = vector.shape_cast %82 : vector<1x1x8x8xf32> to vector<8x8xf32>
    %84 = vector.shape_cast %83 : vector<8x8xf32> to vector<1x8x8xf32>
    %85 = vector.broadcast %84 : vector<1x8x8xf32> to vector<2x8x8xf32>
    %86 = arith.addf %81, %85 : vector<2x8x8xf32>
    %cst_37 = arith.constant dense<0xFF800000> : vector<2x8xf32>
    %87 = vector.multi_reduction <maximumf>, %86, %cst_37 [2] : vector<2x8x8xf32> to vector<2x8xf32>
    %88 = vector.shape_cast %87 : vector<2x8xf32> to vector<2x8x1xf32>
    %89 = vector.broadcast %88 : vector<2x8x1xf32> to vector<2x8x8xf32>
    %90 = arith.subf %86, %89 : vector<2x8x8xf32>
    %91 = math.exp %90 : vector<2x8x8xf32>
    %cst_38 = arith.constant dense<0.000000e+00> : vector<2x8xf32>
    %92 = vector.multi_reduction <add>, %91, %cst_38 [2] : vector<2x8x8xf32> to vector<2x8xf32>
    %93 = vector.shape_cast %92 : vector<2x8xf32> to vector<2x8x1xf32>
    %94 = tpu.reciprocal %93 {approx = true} : vector<2x8x1xf32> -> vector<2x8x1xf32>
    %95 = vector.broadcast %94 : vector<2x8x1xf32> to vector<2x8x8xf32>
    %96 = arith.mulf %91, %95 : vector<2x8x8xf32>
    %97 = arith.truncf %96 : vector<2x8x8xf32> to vector<2x8x8xbf16>
    "tpu.trace_start"() <{level = 10 : i32, message = "bnm,bmd->bnd"}> : () -> ()
    %cst_39 = arith.constant dense<0.000000e+00> : vector<2x8x32xf32>
    %98 = tpu.matmul %97, %78, %cst_39 {dimension_numbers = #tpu.dot_dimension_numbers<[2], [1], [1], [2], [0, 0, 0, 1, 1, 2], [0], [0]>} : vector<2x8x8xbf16>, vector<2x8x32xbf16>, vector<2x8x32xf32> -> vector<2x8x32xf32>
    "tpu.trace_stop"() : () -> ()
    %99 = vector.shape_cast %98 : vector<2x8x32xf32> to vector<16x32xf32>
    %100 = vector.extract_strided_slice %33 {offsets = [0, 64], sizes = [16, 32], strides = [1, 1]} : vector<16x128xf32> to vector<16x32xf32>
    %101 = vector.shape_cast %100 : vector<16x32xf32> to vector<2x8x32xf32>
    %102 = arith.truncf %101 : vector<2x8x32xf32> to vector<2x8x32xbf16>
    %103 = vector.extract_strided_slice %36 {offsets = [0, 64], sizes = [16, 32], strides = [1, 1]} : vector<16x128xf32> to vector<16x32xf32>
    %104 = vector.shape_cast %103 : vector<16x32xf32> to vector<2x8x32xf32>
    %105 = arith.truncf %104 : vector<2x8x32xf32> to vector<2x8x32xbf16>
    %106 = vector.extract_strided_slice %39 {offsets = [0, 64], sizes = [16, 32], strides = [1, 1]} : vector<16x128xf32> to vector<16x32xf32>
    %107 = vector.shape_cast %106 : vector<16x32xf32> to vector<2x8x32xf32>
    %108 = arith.truncf %107 : vector<2x8x32xf32> to vector<2x8x32xbf16>
    "tpu.trace_start"() <{level = 10 : i32, message = "bnd,bmd->bnm"}> : () -> ()
    %cst_40 = arith.constant dense<0.000000e+00> : vector<2x8x8xf32>
    %109 = tpu.matmul %102, %105, %cst_40 {dimension_numbers = #tpu.dot_dimension_numbers<[2], [2], [1], [1], [0, 0, 0, 1, 1, 1], [0], [0]>} : vector<2x8x32xbf16>, vector<2x8x32xbf16>, vector<2x8x8xf32> -> vector<2x8x8xf32>
    "tpu.trace_stop"() : () -> ()
    %cst_41 = arith.constant 0.176776692 : f32
    %110 = vector.broadcast %cst_41 : f32 to vector<2x8x8xf32>
    %111 = arith.mulf %109, %110 : vector<2x8x8xf32>
    %c0_42 = arith.constant 0 : index
    %c2_43 = arith.constant 2 : index
    %c0_44 = arith.constant 0 : index
    %c0_45 = arith.constant 0 : index
    %112 = vector.load %arg4[%c0_42, %c2_43, %c0_44, %c0_45] : memref<2x4x8x8xf32, #tpu.memory_space<vmem>>, vector<1x1x8x8xf32>
    %113 = vector.shape_cast %112 : vector<1x1x8x8xf32> to vector<8x8xf32>
    %114 = vector.shape_cast %113 : vector<8x8xf32> to vector<1x8x8xf32>
    %115 = vector.broadcast %114 : vector<1x8x8xf32> to vector<2x8x8xf32>
    %116 = arith.addf %111, %115 : vector<2x8x8xf32>
    %cst_46 = arith.constant dense<0xFF800000> : vector<2x8xf32>
    %117 = vector.multi_reduction <maximumf>, %116, %cst_46 [2] : vector<2x8x8xf32> to vector<2x8xf32>
    %118 = vector.shape_cast %117 : vector<2x8xf32> to vector<2x8x1xf32>
    %119 = vector.broadcast %118 : vector<2x8x1xf32> to vector<2x8x8xf32>
    %120 = arith.subf %116, %119 : vector<2x8x8xf32>
    %121 = math.exp %120 : vector<2x8x8xf32>
    %cst_47 = arith.constant dense<0.000000e+00> : vector<2x8xf32>
    %122 = vector.multi_reduction <add>, %121, %cst_47 [2] : vector<2x8x8xf32> to vector<2x8xf32>
    %123 = vector.shape_cast %122 : vector<2x8xf32> to vector<2x8x1xf32>
    %124 = tpu.reciprocal %123 {approx = true} : vector<2x8x1xf32> -> vector<2x8x1xf32>
    %125 = vector.broadcast %124 : vector<2x8x1xf32> to vector<2x8x8xf32>
    %126 = arith.mulf %121, %125 : vector<2x8x8xf32>
    %127 = arith.truncf %126 : vector<2x8x8xf32> to vector<2x8x8xbf16>
    "tpu.trace_start"() <{level = 10 : i32, message = "bnm,bmd->bnd"}> : () -> ()
    %cst_48 = arith.constant dense<0.000000e+00> : vector<2x8x32xf32>
    %128 = tpu.matmul %127, %108, %cst_48 {dimension_numbers = #tpu.dot_dimension_numbers<[2], [1], [1], [2], [0, 0, 0, 1, 1, 2], [0], [0]>} : vector<2x8x8xbf16>, vector<2x8x32xbf16>, vector<2x8x32xf32> -> vector<2x8x32xf32>
    "tpu.trace_stop"() : () -> ()
    %129 = vector.shape_cast %128 : vector<2x8x32xf32> to vector<16x32xf32>
    %130 = vector.extract_strided_slice %33 {offsets = [0, 96], sizes = [16, 32], strides = [1, 1]} : vector<16x128xf32> to vector<16x32xf32>
    %131 = vector.shape_cast %130 : vector<16x32xf32> to vector<2x8x32xf32>
    %132 = arith.truncf %131 : vector<2x8x32xf32> to vector<2x8x32xbf16>
    %133 = vector.extract_strided_slice %36 {offsets = [0, 96], sizes = [16, 32], strides = [1, 1]} : vector<16x128xf32> to vector<16x32xf32>
    %134 = vector.shape_cast %133 : vector<16x32xf32> to vector<2x8x32xf32>
    %135 = arith.truncf %134 : vector<2x8x32xf32> to vector<2x8x32xbf16>
    %136 = vector.extract_strided_slice %39 {offsets = [0, 96], sizes = [16, 32], strides = [1, 1]} : vector<16x128xf32> to vector<16x32xf32>
    %137 = vector.shape_cast %136 : vector<16x32xf32> to vector<2x8x32xf32>
    %138 = arith.truncf %137 : vector<2x8x32xf32> to vector<2x8x32xbf16>
    "tpu.trace_start"() <{level = 10 : i32, message = "bnd,bmd->bnm"}> : () -> ()
    %cst_49 = arith.constant dense<0.000000e+00> : vector<2x8x8xf32>
    %139 = tpu.matmul %132, %135, %cst_49 {dimension_numbers = #tpu.dot_dimension_numbers<[2], [2], [1], [1], [0, 0, 0, 1, 1, 1], [0], [0]>} : vector<2x8x32xbf16>, vector<2x8x32xbf16>, vector<2x8x8xf32> -> vector<2x8x8xf32>
    "tpu.trace_stop"() : () -> ()
    %cst_50 = arith.constant 0.176776692 : f32
    %140 = vector.broadcast %cst_50 : f32 to vector<2x8x8xf32>
    %141 = arith.mulf %139, %140 : vector<2x8x8xf32>
    %c0_51 = arith.constant 0 : index
    %c3 = arith.constant 3 : index
    %c0_52 = arith.constant 0 : index
    %c0_53 = arith.constant 0 : index
    %142 = vector.load %arg4[%c0_51, %c3, %c0_52, %c0_53] : memref<2x4x8x8xf32, #tpu.memory_space<vmem>>, vector<1x1x8x8xf32>
    %143 = vector.shape_cast %142 : vector<1x1x8x8xf32> to vector<8x8xf32>
    %144 = vector.shape_cast %143 : vector<8x8xf32> to vector<1x8x8xf32>
    %145 = vector.broadcast %144 : vector<1x8x8xf32> to vector<2x8x8xf32>
    %146 = arith.addf %141, %145 : vector<2x8x8xf32>
    %cst_54 = arith.constant dense<0xFF800000> : vector<2x8xf32>
    %147 = vector.multi_reduction <maximumf>, %146, %cst_54 [2] : vector<2x8x8xf32> to vector<2x8xf32>
    %148 = vector.shape_cast %147 : vector<2x8xf32> to vector<2x8x1xf32>
    %149 = vector.broadcast %148 : vector<2x8x1xf32> to vector<2x8x8xf32>
    %150 = arith.subf %146, %149 : vector<2x8x8xf32>
    %151 = math.exp %150 : vector<2x8x8xf32>
    %cst_55 = arith.constant dense<0.000000e+00> : vector<2x8xf32>
    %152 = vector.multi_reduction <add>, %151, %cst_55 [2] : vector<2x8x8xf32> to vector<2x8xf32>
    %153 = vector.shape_cast %152 : vector<2x8xf32> to vector<2x8x1xf32>
    %154 = tpu.reciprocal %153 {approx = true} : vector<2x8x1xf32> -> vector<2x8x1xf32>
    %155 = vector.broadcast %154 : vector<2x8x1xf32> to vector<2x8x8xf32>
    %156 = arith.mulf %151, %155 : vector<2x8x8xf32>
    %157 = arith.truncf %156 : vector<2x8x8xf32> to vector<2x8x8xbf16>
    "tpu.trace_start"() <{level = 10 : i32, message = "bnm,bmd->bnd"}> : () -> ()
    %cst_56 = arith.constant dense<0.000000e+00> : vector<2x8x32xf32>
    %158 = tpu.matmul %157, %138, %cst_56 {dimension_numbers = #tpu.dot_dimension_numbers<[2], [1], [1], [2], [0, 0, 0, 1, 1, 2], [0], [0]>} : vector<2x8x8xbf16>, vector<2x8x32xbf16>, vector<2x8x32xf32> -> vector<2x8x32xf32>
    "tpu.trace_stop"() : () -> ()
    %159 = vector.shape_cast %158 : vector<2x8x32xf32> to vector<16x32xf32>
    %160 = tpu.concatenate %69, %99, %129, %159 in 1 : vector<16x32xf32>, vector<16x32xf32>, vector<16x32xf32>, vector<16x32xf32> -> vector<16x128xf32>
    %161 = arith.truncf %160 : vector<16x128xf32> to vector<16x128xbf16>
    %c0_57 = arith.constant 0 : index
    %c0_58 = arith.constant 0 : index
    %c0_59 = arith.constant 0 : index
    %162 = vector.load %arg3[%c0_57, %c0_58, %c0_59] : memref<2x128x128xbf16, #tpu.memory_space<vmem>>, vector<1x128x128xbf16>
    %163 = vector.shape_cast %162 : vector<1x128x128xbf16> to vector<128x128xbf16>
    %cst_60 = arith.constant dense<0.000000e+00> : vector<16x128xf32>
    %164 = tpu.matmul %161, %163, %cst_60 {dimension_numbers = #tpu.dot_dimension_numbers<[1], [0], [0], [1], [0, 0, 1, 1], [], []>} : vector<16x128xbf16>, vector<128x128xbf16>, vector<16x128xf32> -> vector<16x128xf32>
    %165 = arith.addf %1, %164 : vector<16x128xf32>
    %166 = vector.broadcast %6 : vector<1x128xf32> to vector<16x128xf32>
    %167 = arith.addf %165, %166 : vector<16x128xf32>
    %cst_61 = arith.constant dense<0.000000e+00> : vector<16xf32>
    %168 = vector.multi_reduction <add>, %167, %cst_61 [1] : vector<16x128xf32> to vector<16xf32>
    %169 = vector.shape_cast %168 : vector<16xf32> to vector<16x1xf32>
    %cst_62 = arith.constant 1.280000e+02 : f32
    %170 = vector.broadcast %cst_62 : f32 to vector<16x1xf32>
    %171 = arith.divf %169, %170 : vector<16x1xf32>
    %172 = vector.broadcast %171 : vector<16x1xf32> to vector<16x128xf32>
    %173 = arith.subf %167, %172 : vector<16x128xf32>
    %174 = arith.mulf %173, %173 : vector<16x128xf32>
    %cst_63 = arith.constant dense<0.000000e+00> : vector<16xf32>
    %175 = vector.multi_reduction <add>, %174, %cst_63 [1] : vector<16x128xf32> to vector<16xf32>
    %176 = vector.shape_cast %175 : vector<16xf32> to vector<16x1xf32>
    %cst_64 = arith.constant 1.280000e+02 : f32
    %177 = vector.broadcast %cst_64 : f32 to vector<16x1xf32>
    %178 = arith.divf %176, %177 : vector<16x1xf32>
    %cst_65 = arith.constant 9.99999974E-6 : f32
    %179 = vector.broadcast %cst_65 : f32 to vector<16x1xf32>
    %180 = arith.addf %178, %179 : vector<16x1xf32>
    %181 = math.rsqrt %180 : vector<16x1xf32>
    %182 = vector.broadcast %181 : vector<16x1xf32> to vector<16x128xf32>
    %183 = arith.mulf %173, %182 : vector<16x128xf32>
    %184 = vector.broadcast %7 : vector<1x128xf32> to vector<16x128xf32>
    %185 = arith.mulf %183, %184 : vector<16x128xf32>
    %186 = vector.broadcast %8 : vector<1x128xf32> to vector<16x128xf32>
    %187 = arith.addf %185, %186 : vector<16x128xf32>
    %188 = arith.truncf %187 : vector<16x128xf32> to vector<16x128xbf16>
    %c0_66 = arith.constant 0 : index
    %c0_67 = arith.constant 0 : index
    %c0_68 = arith.constant 0 : index
    %189 = vector.load %arg6[%c0_66, %c0_67, %c0_68] : memref<2x128x256xbf16, #tpu.memory_space<vmem>>, vector<1x128x256xbf16>
    %190 = vector.shape_cast %189 : vector<1x128x256xbf16> to vector<128x256xbf16>
    %cst_69 = arith.constant dense<0.000000e+00> : vector<16x256xf32>
    %191 = tpu.matmul %188, %190, %cst_69 {dimension_numbers = #tpu.dot_dimension_numbers<[1], [0], [0], [1], [0, 0, 1, 1], [], []>} : vector<16x128xbf16>, vector<128x256xbf16>, vector<16x256xf32> -> vector<16x256xf32>
    %c0_70 = arith.constant 0 : index
    %c0_71 = arith.constant 0 : index
    %c0_72 = arith.constant 0 : index
    %192 = vector.load %arg7[%c0_70, %c0_71, %c0_72] : memref<2x1x256xf32, #tpu.memory_space<vmem>>, vector<1x1x256xf32>
    %193 = vector.shape_cast %192 : vector<1x1x256xf32> to vector<1x256xf32>
    %194 = vector.broadcast %193 : vector<1x256xf32> to vector<16x256xf32>
    %195 = arith.addf %191, %194 : vector<16x256xf32>
    %cst_73 = arith.constant 5.000000e-01 : f32
    %196 = vector.broadcast %cst_73 : f32 to vector<16x256xf32>
    %197 = arith.mulf %196, %195 : vector<16x256xf32>
    %cst_74 = arith.constant 0.707106769 : f32
    %198 = vector.broadcast %cst_74 : f32 to vector<16x256xf32>
    %199 = arith.mulf %195, %198 : vector<16x256xf32>
    %cst_75 = arith.constant 0.000000e+00 : f32
    %200 = vector.broadcast %cst_75 : f32 to vector<16x256xf32>
    %201 = arith.cmpf oge, %199, %200 : vector<16x256xf32>
    %cst_76 = arith.constant 0.000000e+00 : f32
    %202 = vector.broadcast %cst_76 : f32 to vector<16x256xf32>
    %203 = arith.subf %202, %199 : vector<16x256xf32>
    %204 = arith.select %201, %199, %203 : vector<16x256xi1>, vector<16x256xf32>
    %cst_77 = arith.constant 0.327591091 : f32
    %205 = vector.broadcast %cst_77 : f32 to vector<16x256xf32>
    %206 = arith.mulf %205, %204 : vector<16x256xf32>
    %cst_78 = arith.constant 1.000000e+00 : f32
    %207 = vector.broadcast %cst_78 : f32 to vector<16x256xf32>
    %208 = arith.addf %207, %206 : vector<16x256xf32>
    %cst_79 = arith.constant 1.000000e+00 : f32
    %209 = vector.broadcast %cst_79 : f32 to vector<16x256xf32>
    %210 = arith.divf %209, %208 : vector<16x256xf32>
    %cst_80 = arith.constant 1.06140542 : f32
    %211 = vector.broadcast %cst_80 : f32 to vector<16x256xf32>
    %212 = arith.mulf %211, %210 : vector<16x256xf32>
    %cst_81 = arith.constant -1.45315206 : f32
    %213 = vector.broadcast %cst_81 : f32 to vector<16x256xf32>
    %214 = arith.addf %212, %213 : vector<16x256xf32>
    %215 = arith.mulf %214, %210 : vector<16x256xf32>
    %cst_82 = arith.constant 1.42141378 : f32
    %216 = vector.broadcast %cst_82 : f32 to vector<16x256xf32>
    %217 = arith.addf %215, %216 : vector<16x256xf32>
    %218 = arith.mulf %217, %210 : vector<16x256xf32>
    %cst_83 = arith.constant -0.284496725 : f32
    %219 = vector.broadcast %cst_83 : f32 to vector<16x256xf32>
    %220 = arith.addf %218, %219 : vector<16x256xf32>
    %221 = arith.mulf %220, %210 : vector<16x256xf32>
    %cst_84 = arith.constant 0.254829586 : f32
    %222 = vector.broadcast %cst_84 : f32 to vector<16x256xf32>
    %223 = arith.addf %221, %222 : vector<16x256xf32>
    %224 = arith.mulf %223, %210 : vector<16x256xf32>
    %cst_85 = arith.constant 0.000000e+00 : f32
    %225 = vector.broadcast %cst_85 : f32 to vector<16x256xf32>
    %226 = arith.subf %225, %204 : vector<16x256xf32>
    %227 = arith.mulf %226, %204 : vector<16x256xf32>
    %228 = math.exp %227 : vector<16x256xf32>
    %229 = arith.mulf %224, %228 : vector<16x256xf32>
    %cst_86 = arith.constant 1.000000e+00 : f32
    %230 = vector.broadcast %cst_86 : f32 to vector<16x256xf32>
    %231 = arith.subf %230, %229 : vector<16x256xf32>
    %cst_87 = arith.constant 0.000000e+00 : f32
    %232 = vector.broadcast %cst_87 : f32 to vector<16x256xf32>
    %233 = arith.cmpf oge, %199, %232 : vector<16x256xf32>
    %cst_88 = arith.constant 0.000000e+00 : f32
    %234 = vector.broadcast %cst_88 : f32 to vector<16x256xf32>
    %235 = arith.subf %234, %231 : vector<16x256xf32>
    %236 = arith.select %233, %231, %235 : vector<16x256xi1>, vector<16x256xf32>
    %cst_89 = arith.constant 1.000000e+00 : f32
    %237 = vector.broadcast %cst_89 : f32 to vector<16x256xf32>
    %238 = arith.addf %237, %236 : vector<16x256xf32>
    %239 = arith.mulf %197, %238 : vector<16x256xf32>
    %240 = arith.truncf %239 : vector<16x256xf32> to vector<16x256xbf16>
    %c0_90 = arith.constant 0 : index
    %c0_91 = arith.constant 0 : index
    %c0_92 = arith.constant 0 : index
    %241 = vector.load %arg8[%c0_90, %c0_91, %c0_92] : memref<2x256x128xbf16, #tpu.memory_space<vmem>>, vector<1x256x128xbf16>
    %242 = vector.shape_cast %241 : vector<1x256x128xbf16> to vector<256x128xbf16>
    %cst_93 = arith.constant dense<0.000000e+00> : vector<16x128xf32>
    %243 = tpu.matmul %240, %242, %cst_93 {dimension_numbers = #tpu.dot_dimension_numbers<[1], [0], [0], [1], [0, 0, 1, 1], [], []>} : vector<16x256xbf16>, vector<256x128xbf16>, vector<16x128xf32> -> vector<16x128xf32>
    %244 = vector.broadcast %9 : vector<1x128xf32> to vector<16x128xf32>
    %245 = arith.addf %243, %244 : vector<16x128xf32>
    %246 = arith.addf %167, %245 : vector<16x128xf32>
    %c1_94 = arith.constant 1 : index
    %c0_95 = arith.constant 0 : index
    %c0_96 = arith.constant 0 : index
    %247 = vector.load %arg5[%c1_94, %c0_95, %c0_96] : memref<2x8x128xf32, #tpu.memory_space<vmem>>, vector<1x8x128xf32>
    %248 = vector.shape_cast %247 : vector<1x8x128xf32> to vector<8x128xf32>
    %249 = vector.extract_strided_slice %248 {offsets = [0, 0], sizes = [1, 128], strides = [1, 1]} : vector<8x128xf32> to vector<1x128xf32>
    %250 = vector.extract_strided_slice %248 {offsets = [1, 0], sizes = [1, 128], strides = [1, 1]} : vector<8x128xf32> to vector<1x128xf32>
    %251 = vector.extract_strided_slice %248 {offsets = [2, 0], sizes = [1, 128], strides = [1, 1]} : vector<8x128xf32> to vector<1x128xf32>
    %252 = vector.extract_strided_slice %248 {offsets = [3, 0], sizes = [1, 128], strides = [1, 1]} : vector<8x128xf32> to vector<1x128xf32>
    %253 = vector.extract_strided_slice %248 {offsets = [4, 0], sizes = [1, 128], strides = [1, 1]} : vector<8x128xf32> to vector<1x128xf32>
    %254 = vector.extract_strided_slice %248 {offsets = [5, 0], sizes = [1, 128], strides = [1, 1]} : vector<8x128xf32> to vector<1x128xf32>
    %cst_97 = arith.constant dense<0.000000e+00> : vector<16xf32>
    %255 = vector.multi_reduction <add>, %246, %cst_97 [1] : vector<16x128xf32> to vector<16xf32>
    %256 = vector.shape_cast %255 : vector<16xf32> to vector<16x1xf32>
    %cst_98 = arith.constant 1.280000e+02 : f32
    %257 = vector.broadcast %cst_98 : f32 to vector<16x1xf32>
    %258 = arith.divf %256, %257 : vector<16x1xf32>
    %259 = vector.broadcast %258 : vector<16x1xf32> to vector<16x128xf32>
    %260 = arith.subf %246, %259 : vector<16x128xf32>
    %261 = arith.mulf %260, %260 : vector<16x128xf32>
    %cst_99 = arith.constant dense<0.000000e+00> : vector<16xf32>
    %262 = vector.multi_reduction <add>, %261, %cst_99 [1] : vector<16x128xf32> to vector<16xf32>
    %263 = vector.shape_cast %262 : vector<16xf32> to vector<16x1xf32>
    %cst_100 = arith.constant 1.280000e+02 : f32
    %264 = vector.broadcast %cst_100 : f32 to vector<16x1xf32>
    %265 = arith.divf %263, %264 : vector<16x1xf32>
    %cst_101 = arith.constant 9.99999974E-6 : f32
    %266 = vector.broadcast %cst_101 : f32 to vector<16x1xf32>
    %267 = arith.addf %265, %266 : vector<16x1xf32>
    %268 = math.rsqrt %267 : vector<16x1xf32>
    %269 = vector.broadcast %268 : vector<16x1xf32> to vector<16x128xf32>
    %270 = arith.mulf %260, %269 : vector<16x128xf32>
    %271 = vector.broadcast %249 : vector<1x128xf32> to vector<16x128xf32>
    %272 = arith.mulf %270, %271 : vector<16x128xf32>
    %273 = vector.broadcast %250 : vector<1x128xf32> to vector<16x128xf32>
    %274 = arith.addf %272, %273 : vector<16x128xf32>
    %275 = arith.truncf %274 : vector<16x128xf32> to vector<16x128xbf16>
    %c1_102 = arith.constant 1 : index
    %c0_103 = arith.constant 0 : index
    %c0_104 = arith.constant 0 : index
    %c0_105 = arith.constant 0 : index
    %276 = vector.load %arg2[%c1_102, %c0_103, %c0_104, %c0_105] : memref<2x3x128x128xbf16, #tpu.memory_space<vmem>>, vector<1x1x128x128xbf16>
    %277 = vector.shape_cast %276 : vector<1x1x128x128xbf16> to vector<128x128xbf16>
    %cst_106 = arith.constant dense<0.000000e+00> : vector<16x128xf32>
    %278 = tpu.matmul %275, %277, %cst_106 {dimension_numbers = #tpu.dot_dimension_numbers<[1], [0], [0], [1], [0, 0, 1, 1], [], []>} : vector<16x128xbf16>, vector<128x128xbf16>, vector<16x128xf32> -> vector<16x128xf32>
    %c1_107 = arith.constant 1 : index
    %c1_108 = arith.constant 1 : index
    %c0_109 = arith.constant 0 : index
    %c0_110 = arith.constant 0 : index
    %279 = vector.load %arg2[%c1_107, %c1_108, %c0_109, %c0_110] : memref<2x3x128x128xbf16, #tpu.memory_space<vmem>>, vector<1x1x128x128xbf16>
    %280 = vector.shape_cast %279 : vector<1x1x128x128xbf16> to vector<128x128xbf16>
    %cst_111 = arith.constant dense<0.000000e+00> : vector<16x128xf32>
    %281 = tpu.matmul %275, %280, %cst_111 {dimension_numbers = #tpu.dot_dimension_numbers<[1], [0], [0], [1], [0, 0, 1, 1], [], []>} : vector<16x128xbf16>, vector<128x128xbf16>, vector<16x128xf32> -> vector<16x128xf32>
    %c1_112 = arith.constant 1 : index
    %c2_113 = arith.constant 2 : index
    %c0_114 = arith.constant 0 : index
    %c0_115 = arith.constant 0 : index
    %282 = vector.load %arg2[%c1_112, %c2_113, %c0_114, %c0_115] : memref<2x3x128x128xbf16, #tpu.memory_space<vmem>>, vector<1x1x128x128xbf16>
    %283 = vector.shape_cast %282 : vector<1x1x128x128xbf16> to vector<128x128xbf16>
    %cst_116 = arith.constant dense<0.000000e+00> : vector<16x128xf32>
    %284 = tpu.matmul %275, %283, %cst_116 {dimension_numbers = #tpu.dot_dimension_numbers<[1], [0], [0], [1], [0, 0, 1, 1], [], []>} : vector<16x128xbf16>, vector<128x128xbf16>, vector<16x128xf32> -> vector<16x128xf32>
    %285 = vector.extract_strided_slice %278 {offsets = [0, 0], sizes = [16, 32], strides = [1, 1]} : vector<16x128xf32> to vector<16x32xf32>
    %286 = vector.shape_cast %285 : vector<16x32xf32> to vector<2x8x32xf32>
    %287 = arith.truncf %286 : vector<2x8x32xf32> to vector<2x8x32xbf16>
    %288 = vector.extract_strided_slice %281 {offsets = [0, 0], sizes = [16, 32], strides = [1, 1]} : vector<16x128xf32> to vector<16x32xf32>
    %289 = vector.shape_cast %288 : vector<16x32xf32> to vector<2x8x32xf32>
    %290 = arith.truncf %289 : vector<2x8x32xf32> to vector<2x8x32xbf16>
    %291 = vector.extract_strided_slice %284 {offsets = [0, 0], sizes = [16, 32], strides = [1, 1]} : vector<16x128xf32> to vector<16x32xf32>
    %292 = vector.shape_cast %291 : vector<16x32xf32> to vector<2x8x32xf32>
    %293 = arith.truncf %292 : vector<2x8x32xf32> to vector<2x8x32xbf16>
    "tpu.trace_start"() <{level = 10 : i32, message = "bnd,bmd->bnm"}> : () -> ()
    %cst_117 = arith.constant dense<0.000000e+00> : vector<2x8x8xf32>
    %294 = tpu.matmul %287, %290, %cst_117 {dimension_numbers = #tpu.dot_dimension_numbers<[2], [2], [1], [1], [0, 0, 0, 1, 1, 1], [0], [0]>} : vector<2x8x32xbf16>, vector<2x8x32xbf16>, vector<2x8x8xf32> -> vector<2x8x8xf32>
    "tpu.trace_stop"() : () -> ()
    %cst_118 = arith.constant 0.176776692 : f32
    %295 = vector.broadcast %cst_118 : f32 to vector<2x8x8xf32>
    %296 = arith.mulf %294, %295 : vector<2x8x8xf32>
    %c1_119 = arith.constant 1 : index
    %c0_120 = arith.constant 0 : index
    %c0_121 = arith.constant 0 : index
    %c0_122 = arith.constant 0 : index
    %297 = vector.load %arg4[%c1_119, %c0_120, %c0_121, %c0_122] : memref<2x4x8x8xf32, #tpu.memory_space<vmem>>, vector<1x1x8x8xf32>
    %298 = vector.shape_cast %297 : vector<1x1x8x8xf32> to vector<8x8xf32>
    %299 = vector.shape_cast %298 : vector<8x8xf32> to vector<1x8x8xf32>
    %300 = vector.broadcast %299 : vector<1x8x8xf32> to vector<2x8x8xf32>
    %301 = arith.addf %296, %300 : vector<2x8x8xf32>
    %cst_123 = arith.constant dense<0xFF800000> : vector<2x8xf32>
    %302 = vector.multi_reduction <maximumf>, %301, %cst_123 [2] : vector<2x8x8xf32> to vector<2x8xf32>
    %303 = vector.shape_cast %302 : vector<2x8xf32> to vector<2x8x1xf32>
    %304 = vector.broadcast %303 : vector<2x8x1xf32> to vector<2x8x8xf32>
    %305 = arith.subf %301, %304 : vector<2x8x8xf32>
    %306 = math.exp %305 : vector<2x8x8xf32>
    %cst_124 = arith.constant dense<0.000000e+00> : vector<2x8xf32>
    %307 = vector.multi_reduction <add>, %306, %cst_124 [2] : vector<2x8x8xf32> to vector<2x8xf32>
    %308 = vector.shape_cast %307 : vector<2x8xf32> to vector<2x8x1xf32>
    %309 = tpu.reciprocal %308 {approx = true} : vector<2x8x1xf32> -> vector<2x8x1xf32>
    %310 = vector.broadcast %309 : vector<2x8x1xf32> to vector<2x8x8xf32>
    %311 = arith.mulf %306, %310 : vector<2x8x8xf32>
    %312 = arith.truncf %311 : vector<2x8x8xf32> to vector<2x8x8xbf16>
    "tpu.trace_start"() <{level = 10 : i32, message = "bnm,bmd->bnd"}> : () -> ()
    %cst_125 = arith.constant dense<0.000000e+00> : vector<2x8x32xf32>
    %313 = tpu.matmul %312, %293, %cst_125 {dimension_numbers = #tpu.dot_dimension_numbers<[2], [1], [1], [2], [0, 0, 0, 1, 1, 2], [0], [0]>} : vector<2x8x8xbf16>, vector<2x8x32xbf16>, vector<2x8x32xf32> -> vector<2x8x32xf32>
    "tpu.trace_stop"() : () -> ()
    %314 = vector.shape_cast %313 : vector<2x8x32xf32> to vector<16x32xf32>
    %315 = vector.extract_strided_slice %278 {offsets = [0, 32], sizes = [16, 32], strides = [1, 1]} : vector<16x128xf32> to vector<16x32xf32>
    %316 = vector.shape_cast %315 : vector<16x32xf32> to vector<2x8x32xf32>
    %317 = arith.truncf %316 : vector<2x8x32xf32> to vector<2x8x32xbf16>
    %318 = vector.extract_strided_slice %281 {offsets = [0, 32], sizes = [16, 32], strides = [1, 1]} : vector<16x128xf32> to vector<16x32xf32>
    %319 = vector.shape_cast %318 : vector<16x32xf32> to vector<2x8x32xf32>
    %320 = arith.truncf %319 : vector<2x8x32xf32> to vector<2x8x32xbf16>
    %321 = vector.extract_strided_slice %284 {offsets = [0, 32], sizes = [16, 32], strides = [1, 1]} : vector<16x128xf32> to vector<16x32xf32>
    %322 = vector.shape_cast %321 : vector<16x32xf32> to vector<2x8x32xf32>
    %323 = arith.truncf %322 : vector<2x8x32xf32> to vector<2x8x32xbf16>
    "tpu.trace_start"() <{level = 10 : i32, message = "bnd,bmd->bnm"}> : () -> ()
    %cst_126 = arith.constant dense<0.000000e+00> : vector<2x8x8xf32>
    %324 = tpu.matmul %317, %320, %cst_126 {dimension_numbers = #tpu.dot_dimension_numbers<[2], [2], [1], [1], [0, 0, 0, 1, 1, 1], [0], [0]>} : vector<2x8x32xbf16>, vector<2x8x32xbf16>, vector<2x8x8xf32> -> vector<2x8x8xf32>
    "tpu.trace_stop"() : () -> ()
    %cst_127 = arith.constant 0.176776692 : f32
    %325 = vector.broadcast %cst_127 : f32 to vector<2x8x8xf32>
    %326 = arith.mulf %324, %325 : vector<2x8x8xf32>
    %c1_128 = arith.constant 1 : index
    %c1_129 = arith.constant 1 : index
    %c0_130 = arith.constant 0 : index
    %c0_131 = arith.constant 0 : index
    %327 = vector.load %arg4[%c1_128, %c1_129, %c0_130, %c0_131] : memref<2x4x8x8xf32, #tpu.memory_space<vmem>>, vector<1x1x8x8xf32>
    %328 = vector.shape_cast %327 : vector<1x1x8x8xf32> to vector<8x8xf32>
    %329 = vector.shape_cast %328 : vector<8x8xf32> to vector<1x8x8xf32>
    %330 = vector.broadcast %329 : vector<1x8x8xf32> to vector<2x8x8xf32>
    %331 = arith.addf %326, %330 : vector<2x8x8xf32>
    %cst_132 = arith.constant dense<0xFF800000> : vector<2x8xf32>
    %332 = vector.multi_reduction <maximumf>, %331, %cst_132 [2] : vector<2x8x8xf32> to vector<2x8xf32>
    %333 = vector.shape_cast %332 : vector<2x8xf32> to vector<2x8x1xf32>
    %334 = vector.broadcast %333 : vector<2x8x1xf32> to vector<2x8x8xf32>
    %335 = arith.subf %331, %334 : vector<2x8x8xf32>
    %336 = math.exp %335 : vector<2x8x8xf32>
    %cst_133 = arith.constant dense<0.000000e+00> : vector<2x8xf32>
    %337 = vector.multi_reduction <add>, %336, %cst_133 [2] : vector<2x8x8xf32> to vector<2x8xf32>
    %338 = vector.shape_cast %337 : vector<2x8xf32> to vector<2x8x1xf32>
    %339 = tpu.reciprocal %338 {approx = true} : vector<2x8x1xf32> -> vector<2x8x1xf32>
    %340 = vector.broadcast %339 : vector<2x8x1xf32> to vector<2x8x8xf32>
    %341 = arith.mulf %336, %340 : vector<2x8x8xf32>
    %342 = arith.truncf %341 : vector<2x8x8xf32> to vector<2x8x8xbf16>
    "tpu.trace_start"() <{level = 10 : i32, message = "bnm,bmd->bnd"}> : () -> ()
    %cst_134 = arith.constant dense<0.000000e+00> : vector<2x8x32xf32>
    %343 = tpu.matmul %342, %323, %cst_134 {dimension_numbers = #tpu.dot_dimension_numbers<[2], [1], [1], [2], [0, 0, 0, 1, 1, 2], [0], [0]>} : vector<2x8x8xbf16>, vector<2x8x32xbf16>, vector<2x8x32xf32> -> vector<2x8x32xf32>
    "tpu.trace_stop"() : () -> ()
    %344 = vector.shape_cast %343 : vector<2x8x32xf32> to vector<16x32xf32>
    %345 = vector.extract_strided_slice %278 {offsets = [0, 64], sizes = [16, 32], strides = [1, 1]} : vector<16x128xf32> to vector<16x32xf32>
    %346 = vector.shape_cast %345 : vector<16x32xf32> to vector<2x8x32xf32>
    %347 = arith.truncf %346 : vector<2x8x32xf32> to vector<2x8x32xbf16>
    %348 = vector.extract_strided_slice %281 {offsets = [0, 64], sizes = [16, 32], strides = [1, 1]} : vector<16x128xf32> to vector<16x32xf32>
    %349 = vector.shape_cast %348 : vector<16x32xf32> to vector<2x8x32xf32>
    %350 = arith.truncf %349 : vector<2x8x32xf32> to vector<2x8x32xbf16>
    %351 = vector.extract_strided_slice %284 {offsets = [0, 64], sizes = [16, 32], strides = [1, 1]} : vector<16x128xf32> to vector<16x32xf32>
    %352 = vector.shape_cast %351 : vector<16x32xf32> to vector<2x8x32xf32>
    %353 = arith.truncf %352 : vector<2x8x32xf32> to vector<2x8x32xbf16>
    "tpu.trace_start"() <{level = 10 : i32, message = "bnd,bmd->bnm"}> : () -> ()
    %cst_135 = arith.constant dense<0.000000e+00> : vector<2x8x8xf32>
    %354 = tpu.matmul %347, %350, %cst_135 {dimension_numbers = #tpu.dot_dimension_numbers<[2], [2], [1], [1], [0, 0, 0, 1, 1, 1], [0], [0]>} : vector<2x8x32xbf16>, vector<2x8x32xbf16>, vector<2x8x8xf32> -> vector<2x8x8xf32>
    "tpu.trace_stop"() : () -> ()
    %cst_136 = arith.constant 0.176776692 : f32
    %355 = vector.broadcast %cst_136 : f32 to vector<2x8x8xf32>
    %356 = arith.mulf %354, %355 : vector<2x8x8xf32>
    %c1_137 = arith.constant 1 : index
    %c2_138 = arith.constant 2 : index
    %c0_139 = arith.constant 0 : index
    %c0_140 = arith.constant 0 : index
    %357 = vector.load %arg4[%c1_137, %c2_138, %c0_139, %c0_140] : memref<2x4x8x8xf32, #tpu.memory_space<vmem>>, vector<1x1x8x8xf32>
    %358 = vector.shape_cast %357 : vector<1x1x8x8xf32> to vector<8x8xf32>
    %359 = vector.shape_cast %358 : vector<8x8xf32> to vector<1x8x8xf32>
    %360 = vector.broadcast %359 : vector<1x8x8xf32> to vector<2x8x8xf32>
    %361 = arith.addf %356, %360 : vector<2x8x8xf32>
    %cst_141 = arith.constant dense<0xFF800000> : vector<2x8xf32>
    %362 = vector.multi_reduction <maximumf>, %361, %cst_141 [2] : vector<2x8x8xf32> to vector<2x8xf32>
    %363 = vector.shape_cast %362 : vector<2x8xf32> to vector<2x8x1xf32>
    %364 = vector.broadcast %363 : vector<2x8x1xf32> to vector<2x8x8xf32>
    %365 = arith.subf %361, %364 : vector<2x8x8xf32>
    %366 = math.exp %365 : vector<2x8x8xf32>
    %cst_142 = arith.constant dense<0.000000e+00> : vector<2x8xf32>
    %367 = vector.multi_reduction <add>, %366, %cst_142 [2] : vector<2x8x8xf32> to vector<2x8xf32>
    %368 = vector.shape_cast %367 : vector<2x8xf32> to vector<2x8x1xf32>
    %369 = tpu.reciprocal %368 {approx = true} : vector<2x8x1xf32> -> vector<2x8x1xf32>
    %370 = vector.broadcast %369 : vector<2x8x1xf32> to vector<2x8x8xf32>
    %371 = arith.mulf %366, %370 : vector<2x8x8xf32>
    %372 = arith.truncf %371 : vector<2x8x8xf32> to vector<2x8x8xbf16>
    "tpu.trace_start"() <{level = 10 : i32, message = "bnm,bmd->bnd"}> : () -> ()
    %cst_143 = arith.constant dense<0.000000e+00> : vector<2x8x32xf32>
    %373 = tpu.matmul %372, %353, %cst_143 {dimension_numbers = #tpu.dot_dimension_numbers<[2], [1], [1], [2], [0, 0, 0, 1, 1, 2], [0], [0]>} : vector<2x8x8xbf16>, vector<2x8x32xbf16>, vector<2x8x32xf32> -> vector<2x8x32xf32>
    "tpu.trace_stop"() : () -> ()
    %374 = vector.shape_cast %373 : vector<2x8x32xf32> to vector<16x32xf32>
    %375 = vector.extract_strided_slice %278 {offsets = [0, 96], sizes = [16, 32], strides = [1, 1]} : vector<16x128xf32> to vector<16x32xf32>
    %376 = vector.shape_cast %375 : vector<16x32xf32> to vector<2x8x32xf32>
    %377 = arith.truncf %376 : vector<2x8x32xf32> to vector<2x8x32xbf16>
    %378 = vector.extract_strided_slice %281 {offsets = [0, 96], sizes = [16, 32], strides = [1, 1]} : vector<16x128xf32> to vector<16x32xf32>
    %379 = vector.shape_cast %378 : vector<16x32xf32> to vector<2x8x32xf32>
    %380 = arith.truncf %379 : vector<2x8x32xf32> to vector<2x8x32xbf16>
    %381 = vector.extract_strided_slice %284 {offsets = [0, 96], sizes = [16, 32], strides = [1, 1]} : vector<16x128xf32> to vector<16x32xf32>
    %382 = vector.shape_cast %381 : vector<16x32xf32> to vector<2x8x32xf32>
    %383 = arith.truncf %382 : vector<2x8x32xf32> to vector<2x8x32xbf16>
    "tpu.trace_start"() <{level = 10 : i32, message = "bnd,bmd->bnm"}> : () -> ()
    %cst_144 = arith.constant dense<0.000000e+00> : vector<2x8x8xf32>
    %384 = tpu.matmul %377, %380, %cst_144 {dimension_numbers = #tpu.dot_dimension_numbers<[2], [2], [1], [1], [0, 0, 0, 1, 1, 1], [0], [0]>} : vector<2x8x32xbf16>, vector<2x8x32xbf16>, vector<2x8x8xf32> -> vector<2x8x8xf32>
    "tpu.trace_stop"() : () -> ()
    %cst_145 = arith.constant 0.176776692 : f32
    %385 = vector.broadcast %cst_145 : f32 to vector<2x8x8xf32>
    %386 = arith.mulf %384, %385 : vector<2x8x8xf32>
    %c1_146 = arith.constant 1 : index
    %c3_147 = arith.constant 3 : index
    %c0_148 = arith.constant 0 : index
    %c0_149 = arith.constant 0 : index
    %387 = vector.load %arg4[%c1_146, %c3_147, %c0_148, %c0_149] : memref<2x4x8x8xf32, #tpu.memory_space<vmem>>, vector<1x1x8x8xf32>
    %388 = vector.shape_cast %387 : vector<1x1x8x8xf32> to vector<8x8xf32>
    %389 = vector.shape_cast %388 : vector<8x8xf32> to vector<1x8x8xf32>
    %390 = vector.broadcast %389 : vector<1x8x8xf32> to vector<2x8x8xf32>
    %391 = arith.addf %386, %390 : vector<2x8x8xf32>
    %cst_150 = arith.constant dense<0xFF800000> : vector<2x8xf32>
    %392 = vector.multi_reduction <maximumf>, %391, %cst_150 [2] : vector<2x8x8xf32> to vector<2x8xf32>
    %393 = vector.shape_cast %392 : vector<2x8xf32> to vector<2x8x1xf32>
    %394 = vector.broadcast %393 : vector<2x8x1xf32> to vector<2x8x8xf32>
    %395 = arith.subf %391, %394 : vector<2x8x8xf32>
    %396 = math.exp %395 : vector<2x8x8xf32>
    %cst_151 = arith.constant dense<0.000000e+00> : vector<2x8xf32>
    %397 = vector.multi_reduction <add>, %396, %cst_151 [2] : vector<2x8x8xf32> to vector<2x8xf32>
    %398 = vector.shape_cast %397 : vector<2x8xf32> to vector<2x8x1xf32>
    %399 = tpu.reciprocal %398 {approx = true} : vector<2x8x1xf32> -> vector<2x8x1xf32>
    %400 = vector.broadcast %399 : vector<2x8x1xf32> to vector<2x8x8xf32>
    %401 = arith.mulf %396, %400 : vector<2x8x8xf32>
    %402 = arith.truncf %401 : vector<2x8x8xf32> to vector<2x8x8xbf16>
    "tpu.trace_start"() <{level = 10 : i32, message = "bnm,bmd->bnd"}> : () -> ()
    %cst_152 = arith.constant dense<0.000000e+00> : vector<2x8x32xf32>
    %403 = tpu.matmul %402, %383, %cst_152 {dimension_numbers = #tpu.dot_dimension_numbers<[2], [1], [1], [2], [0, 0, 0, 1, 1, 2], [0], [0]>} : vector<2x8x8xbf16>, vector<2x8x32xbf16>, vector<2x8x32xf32> -> vector<2x8x32xf32>
    "tpu.trace_stop"() : () -> ()
    %404 = vector.shape_cast %403 : vector<2x8x32xf32> to vector<16x32xf32>
    %405 = tpu.concatenate %314, %344, %374, %404 in 1 : vector<16x32xf32>, vector<16x32xf32>, vector<16x32xf32>, vector<16x32xf32> -> vector<16x128xf32>
    %406 = arith.truncf %405 : vector<16x128xf32> to vector<16x128xbf16>
    %c1_153 = arith.constant 1 : index
    %c0_154 = arith.constant 0 : index
    %c0_155 = arith.constant 0 : index
    %407 = vector.load %arg3[%c1_153, %c0_154, %c0_155] : memref<2x128x128xbf16, #tpu.memory_space<vmem>>, vector<1x128x128xbf16>
    %408 = vector.shape_cast %407 : vector<1x128x128xbf16> to vector<128x128xbf16>
    %cst_156 = arith.constant dense<0.000000e+00> : vector<16x128xf32>
    %409 = tpu.matmul %406, %408, %cst_156 {dimension_numbers = #tpu.dot_dimension_numbers<[1], [0], [0], [1], [0, 0, 1, 1], [], []>} : vector<16x128xbf16>, vector<128x128xbf16>, vector<16x128xf32> -> vector<16x128xf32>
    %410 = arith.addf %246, %409 : vector<16x128xf32>
    %411 = vector.broadcast %251 : vector<1x128xf32> to vector<16x128xf32>
    %412 = arith.addf %410, %411 : vector<16x128xf32>
    %cst_157 = arith.constant dense<0.000000e+00> : vector<16xf32>
    %413 = vector.multi_reduction <add>, %412, %cst_157 [1] : vector<16x128xf32> to vector<16xf32>
    %414 = vector.shape_cast %413 : vector<16xf32> to vector<16x1xf32>
    %cst_158 = arith.constant 1.280000e+02 : f32
    %415 = vector.broadcast %cst_158 : f32 to vector<16x1xf32>
    %416 = arith.divf %414, %415 : vector<16x1xf32>
    %417 = vector.broadcast %416 : vector<16x1xf32> to vector<16x128xf32>
    %418 = arith.subf %412, %417 : vector<16x128xf32>
    %419 = arith.mulf %418, %418 : vector<16x128xf32>
    %cst_159 = arith.constant dense<0.000000e+00> : vector<16xf32>
    %420 = vector.multi_reduction <add>, %419, %cst_159 [1] : vector<16x128xf32> to vector<16xf32>
    %421 = vector.shape_cast %420 : vector<16xf32> to vector<16x1xf32>
    %cst_160 = arith.constant 1.280000e+02 : f32
    %422 = vector.broadcast %cst_160 : f32 to vector<16x1xf32>
    %423 = arith.divf %421, %422 : vector<16x1xf32>
    %cst_161 = arith.constant 9.99999974E-6 : f32
    %424 = vector.broadcast %cst_161 : f32 to vector<16x1xf32>
    %425 = arith.addf %423, %424 : vector<16x1xf32>
    %426 = math.rsqrt %425 : vector<16x1xf32>
    %427 = vector.broadcast %426 : vector<16x1xf32> to vector<16x128xf32>
    %428 = arith.mulf %418, %427 : vector<16x128xf32>
    %429 = vector.broadcast %252 : vector<1x128xf32> to vector<16x128xf32>
    %430 = arith.mulf %428, %429 : vector<16x128xf32>
    %431 = vector.broadcast %253 : vector<1x128xf32> to vector<16x128xf32>
    %432 = arith.addf %430, %431 : vector<16x128xf32>
    %433 = arith.truncf %432 : vector<16x128xf32> to vector<16x128xbf16>
    %c1_162 = arith.constant 1 : index
    %c0_163 = arith.constant 0 : index
    %c0_164 = arith.constant 0 : index
    %434 = vector.load %arg6[%c1_162, %c0_163, %c0_164] : memref<2x128x256xbf16, #tpu.memory_space<vmem>>, vector<1x128x256xbf16>
    %435 = vector.shape_cast %434 : vector<1x128x256xbf16> to vector<128x256xbf16>
    %cst_165 = arith.constant dense<0.000000e+00> : vector<16x256xf32>
    %436 = tpu.matmul %433, %435, %cst_165 {dimension_numbers = #tpu.dot_dimension_numbers<[1], [0], [0], [1], [0, 0, 1, 1], [], []>} : vector<16x128xbf16>, vector<128x256xbf16>, vector<16x256xf32> -> vector<16x256xf32>
    %c1_166 = arith.constant 1 : index
    %c0_167 = arith.constant 0 : index
    %c0_168 = arith.constant 0 : index
    %437 = vector.load %arg7[%c1_166, %c0_167, %c0_168] : memref<2x1x256xf32, #tpu.memory_space<vmem>>, vector<1x1x256xf32>
    %438 = vector.shape_cast %437 : vector<1x1x256xf32> to vector<1x256xf32>
    %439 = vector.broadcast %438 : vector<1x256xf32> to vector<16x256xf32>
    %440 = arith.addf %436, %439 : vector<16x256xf32>
    %cst_169 = arith.constant 5.000000e-01 : f32
    %441 = vector.broadcast %cst_169 : f32 to vector<16x256xf32>
    %442 = arith.mulf %441, %440 : vector<16x256xf32>
    %cst_170 = arith.constant 0.707106769 : f32
    %443 = vector.broadcast %cst_170 : f32 to vector<16x256xf32>
    %444 = arith.mulf %440, %443 : vector<16x256xf32>
    %cst_171 = arith.constant 0.000000e+00 : f32
    %445 = vector.broadcast %cst_171 : f32 to vector<16x256xf32>
    %446 = arith.cmpf oge, %444, %445 : vector<16x256xf32>
    %cst_172 = arith.constant 0.000000e+00 : f32
    %447 = vector.broadcast %cst_172 : f32 to vector<16x256xf32>
    %448 = arith.subf %447, %444 : vector<16x256xf32>
    %449 = arith.select %446, %444, %448 : vector<16x256xi1>, vector<16x256xf32>
    %cst_173 = arith.constant 0.327591091 : f32
    %450 = vector.broadcast %cst_173 : f32 to vector<16x256xf32>
    %451 = arith.mulf %450, %449 : vector<16x256xf32>
    %cst_174 = arith.constant 1.000000e+00 : f32
    %452 = vector.broadcast %cst_174 : f32 to vector<16x256xf32>
    %453 = arith.addf %452, %451 : vector<16x256xf32>
    %cst_175 = arith.constant 1.000000e+00 : f32
    %454 = vector.broadcast %cst_175 : f32 to vector<16x256xf32>
    %455 = arith.divf %454, %453 : vector<16x256xf32>
    %cst_176 = arith.constant 1.06140542 : f32
    %456 = vector.broadcast %cst_176 : f32 to vector<16x256xf32>
    %457 = arith.mulf %456, %455 : vector<16x256xf32>
    %cst_177 = arith.constant -1.45315206 : f32
    %458 = vector.broadcast %cst_177 : f32 to vector<16x256xf32>
    %459 = arith.addf %457, %458 : vector<16x256xf32>
    %460 = arith.mulf %459, %455 : vector<16x256xf32>
    %cst_178 = arith.constant 1.42141378 : f32
    %461 = vector.broadcast %cst_178 : f32 to vector<16x256xf32>
    %462 = arith.addf %460, %461 : vector<16x256xf32>
    %463 = arith.mulf %462, %455 : vector<16x256xf32>
    %cst_179 = arith.constant -0.284496725 : f32
    %464 = vector.broadcast %cst_179 : f32 to vector<16x256xf32>
    %465 = arith.addf %463, %464 : vector<16x256xf32>
    %466 = arith.mulf %465, %455 : vector<16x256xf32>
    %cst_180 = arith.constant 0.254829586 : f32
    %467 = vector.broadcast %cst_180 : f32 to vector<16x256xf32>
    %468 = arith.addf %466, %467 : vector<16x256xf32>
    %469 = arith.mulf %468, %455 : vector<16x256xf32>
    %cst_181 = arith.constant 0.000000e+00 : f32
    %470 = vector.broadcast %cst_181 : f32 to vector<16x256xf32>
    %471 = arith.subf %470, %449 : vector<16x256xf32>
    %472 = arith.mulf %471, %449 : vector<16x256xf32>
    %473 = math.exp %472 : vector<16x256xf32>
    %474 = arith.mulf %469, %473 : vector<16x256xf32>
    %cst_182 = arith.constant 1.000000e+00 : f32
    %475 = vector.broadcast %cst_182 : f32 to vector<16x256xf32>
    %476 = arith.subf %475, %474 : vector<16x256xf32>
    %cst_183 = arith.constant 0.000000e+00 : f32
    %477 = vector.broadcast %cst_183 : f32 to vector<16x256xf32>
    %478 = arith.cmpf oge, %444, %477 : vector<16x256xf32>
    %cst_184 = arith.constant 0.000000e+00 : f32
    %479 = vector.broadcast %cst_184 : f32 to vector<16x256xf32>
    %480 = arith.subf %479, %476 : vector<16x256xf32>
    %481 = arith.select %478, %476, %480 : vector<16x256xi1>, vector<16x256xf32>
    %cst_185 = arith.constant 1.000000e+00 : f32
    %482 = vector.broadcast %cst_185 : f32 to vector<16x256xf32>
    %483 = arith.addf %482, %481 : vector<16x256xf32>
    %484 = arith.mulf %442, %483 : vector<16x256xf32>
    %485 = arith.truncf %484 : vector<16x256xf32> to vector<16x256xbf16>
    %c1_186 = arith.constant 1 : index
    %c0_187 = arith.constant 0 : index
    %c0_188 = arith.constant 0 : index
    %486 = vector.load %arg8[%c1_186, %c0_187, %c0_188] : memref<2x256x128xbf16, #tpu.memory_space<vmem>>, vector<1x256x128xbf16>
    %487 = vector.shape_cast %486 : vector<1x256x128xbf16> to vector<256x128xbf16>
    %cst_189 = arith.constant dense<0.000000e+00> : vector<16x128xf32>
    %488 = tpu.matmul %485, %487, %cst_189 {dimension_numbers = #tpu.dot_dimension_numbers<[1], [0], [0], [1], [0, 0, 1, 1], [], []>} : vector<16x256xbf16>, vector<256x128xbf16>, vector<16x128xf32> -> vector<16x128xf32>
    %489 = vector.broadcast %254 : vector<1x128xf32> to vector<16x128xf32>
    %490 = arith.addf %488, %489 : vector<16x128xf32>
    %491 = arith.addf %412, %490 : vector<16x128xf32>
    %492 = vector.shape_cast %491 : vector<16x128xf32> to vector<2x8x128xf32>
    %c0_190 = arith.constant 0 : index
    %c0_191 = arith.constant 0 : index
    %c0_192 = arith.constant 0 : index
    %493 = vector.load %arg9[%c0_190, %c0_191, %c0_192] : memref<2x8x128xf32, #tpu.memory_space<vmem>>, vector<2x8x128xf32>
    tpu.vector_store %arg9[%c0_190, %c0_191, %c0_192], %492 {strides = array<i32>} : memref<2x8x128xf32, #tpu.memory_space<vmem>>, vector<2x8x128xf32>,
    return
  }
  func.func @transform_0(%arg0: i32) -> (i32, i32, i32) {
    %c0_i32 = arith.constant 0 : i32
    %c0_i32_0 = arith.constant 0 : i32
    %c0_i32_1 = arith.constant 0 : i32
    %c0_i32_2 = arith.constant 0 : i32
    return %c0_i32, %c0_i32_0, %c0_i32_1 : i32, i32, i32
  }
  func.func @transform_1(%arg0: i32) -> (i32, i32, i32, i32) {
    %c0_i32 = arith.constant 0 : i32
    %c0_i32_0 = arith.constant 0 : i32
    %c0_i32_1 = arith.constant 0 : i32
    %c0_i32_2 = arith.constant 0 : i32
    %c0_i32_3 = arith.constant 0 : i32
    return %c0_i32, %c0_i32_0, %c0_i32_1, %c0_i32_2 : i32, i32, i32, i32
  }
  func.func @transform_2(%arg0: i32) -> (i32, i32, i32) {
    %c0_i32 = arith.constant 0 : i32
    %c0_i32_0 = arith.constant 0 : i32
    %c0_i32_1 = arith.constant 0 : i32
    %c0_i32_2 = arith.constant 0 : i32
    return %c0_i32, %c0_i32_0, %c0_i32_1 : i32, i32, i32
  }
  func.func @transform_3(%arg0: i32) -> (i32, i32, i32, i32) {
    %c0_i32 = arith.constant 0 : i32
    %c0_i32_0 = arith.constant 0 : i32
    %c0_i32_1 = arith.constant 0 : i32
    %c0_i32_2 = arith.constant 0 : i32
    %c0_i32_3 = arith.constant 0 : i32
    return %c0_i32, %c0_i32_0, %c0_i32_1, %c0_i32_2 : i32, i32, i32, i32
  }
  func.func @transform_4(%arg0: i32) -> (i32, i32, i32) {
    %c0_i32 = arith.constant 0 : i32
    %c0_i32_0 = arith.constant 0 : i32
    %c0_i32_1 = arith.constant 0 : i32
    %c0_i32_2 = arith.constant 0 : i32
    return %c0_i32, %c0_i32_0, %c0_i32_1 : i32, i32, i32
  }
  func.func @transform_5(%arg0: i32) -> (i32, i32, i32) {
    %c0_i32 = arith.constant 0 : i32
    %c0_i32_0 = arith.constant 0 : i32
    %c0_i32_1 = arith.constant 0 : i32
    %c0_i32_2 = arith.constant 0 : i32
    return %c0_i32, %c0_i32_0, %c0_i32_1 : i32, i32, i32
  }
  func.func @transform_6(%arg0: i32) -> (i32, i32, i32) {
    %c0_i32 = arith.constant 0 : i32
    %c0_i32_0 = arith.constant 0 : i32
    %c0_i32_1 = arith.constant 0 : i32
    %c0_i32_2 = arith.constant 0 : i32
    return %c0_i32, %c0_i32_0, %c0_i32_1 : i32, i32, i32
  }
  func.func @transform_7(%arg0: i32) -> (i32, i32, i32) {
    %c0_i32 = arith.constant 0 : i32
    %c0_i32_0 = arith.constant 0 : i32
    %c0_i32_1 = arith.constant 0 : i32
    %c0_i32_2 = arith.constant 0 : i32
    return %c0_i32, %c0_i32_0, %c0_i32_1 : i32, i32, i32
  }
  func.func @transform_8(%arg0: i32) -> (i32, i32, i32) {
    %c0_i32 = arith.constant 0 : i32
    %c0_i32_0 = arith.constant 0 : i32
    %c0_i32_1 = arith.constant 0 : i32
    %c0_i32_2 = arith.constant 0 : i32
    return %c0_i32, %c0_i32_0, %c0_i32_1 : i32, i32, i32
  }
}

</mosaic_0001>

<bundles_post_ra>
// kernel: transformer_forward.1
= control target key start
LH: loop header
LB: loop body
LE: loop exit
PB: predicated region body
PF: predicated region fallthrough
CT: control target
= control target key end

     0   :  { %13 = vsyncpa [#allocation3], 0  ;;  %s5862_s0 = inlined_call_operand.hbm [shape: f32[2,8,128], index: 0, kind: input, shape index: {}]   ;;  %s5863_s1 = inlined_call_operand.hbm [shape: bf16[2,3,128,128], index: 1, kind: input, shape index: {}]   ;;  %s5864_s2 = inlined_call_operand.hbm [shape: bf16[2,128,128], index: 2, kind: input, shape index: {}]   ;;  %s5865_s3 = inlined_call_operand.hbm [shape: f32[2,4,8,8], index: 3, kind: input, shape index: {}]   ;;  %s5866_s4 = inlined_call_operand.hbm [shape: f32[2,8,128], index: 4, kind: input, shape index: {}]   ;;  %s5867_s5 = inlined_call_operand.hbm [shape: bf16[2,128,256], index: 5, kind: input, shape index: {}]   ;;  %s5868_s6 = inlined_call_operand.hbm [shape: f32[2,1,256], index: 6, kind: input, shape index: {}]   ;;  %s5869_s7 = inlined_call_operand.hbm [shape: bf16[2,256,128], index: 7, kind: input, shape index: {}]   ;;  %s5870_s8 = inlined_call_operand.hbm [shape: f32[2,8,128], index: 8, kind: output, shape index: {}]  }
   0x1   :  { %14 = vsyncpa [#allocation6], 0 }
   0x2   :  { %15 = vsyncpa [#allocation9], 0 }
   0x3   :  { %16 = vsyncpa [#allocation12], 0 }
   0x4   :  { %17 = vsyncpa [#allocation15], 0 }
   0x5   :  { %18 = vsyncpa [#allocation4], 0  ;;  %s5121_s27 = smov [#allocation5]  }
   0x6   :  { %s36_s28 = sshll.u32 %s5121_s27, 4  ;;  %s37_s28 = int_to_ptr.vmem [resolvable:$true] %s36_s28 }
   0x7   :  { %s4937_s29 = scalar_lea.vmem %s37_s28, 6144  ;;  %p4942_p1 = scmp.lt.s32.totalorder %s37_s28, %s37_s28 }
   0x8   :  { %p4938_p0 = scmp.ne.s32.totalorder %s37_s28, %s4937_s29  ;;  %p4943_p2 = scmp.lt.s32.totalorder %s4937_s29, %s4937_s29 }
   0xa   :  { %p4944_p3 = por %p4943_p2, %p4942_p1 }
   0xc   :  { %p4945_p4 = pnand %p4944_p3, %p4938_p0 }
   0xe   :  { %4948 = shalt.err (!%p4945_p4)
}
   0xf   :  { %s5122_s30 = smov 64   ;;  %s5123_s9 = smov 4  }
  0x10   :  { %42 = dma.hbm_to_vmem [thread:$0]  %s5863_s1, 6144, %s37_s28, [#allocation6], %s5122_s30, %s5122_s30, %s5123_s9  }
  0x11   :  { %s5124_s12 = smov [#allocation8]   ;;  %s5125_s14 = smov [#allocation11]  }
  0x12   :  { %s60_s13 = sshll.u32 %s5124_s12, 4  ;;  %s84_s15 = sshll.u32 %s5125_s14, 4  ;;  %s61_s13 = int_to_ptr.vmem [resolvable:$true] %s60_s13  ;;  %s85_s15 = int_to_ptr.vmem [resolvable:$true] %s84_s15 }
  0x13   :  { %s4957_s16 = scalar_lea.vmem %s61_s13, 1024  ;;  %p4962_p6 = scmp.lt.s32.totalorder %s61_s13, %s61_s13 }
  0x14   :  { %p4958_p5 = scmp.ne.s32.totalorder %s61_s13, %s4957_s16  ;;  %p4963_p7 = scmp.lt.s32.totalorder %s4957_s16, %s4957_s16 }
  0x16   :  { %p4964_p8 = por %p4963_p7, %p4962_p6 }
  0x18   :  { %p4965_p9 = pnand %p4964_p8, %p4958_p5 }
  0x1a   :  { %4968 = shalt.err (!%p4965_p9)
}
  0x1b   :  { %s5126_s17 = smov 128   ;;  %s5127_s18 = smov 8  }
  0x1c   :  { %66 = dma.hbm_to_vmem [thread:$0]  %s5865_s3, 1024, %s61_s13, [#allocation9], %s5126_s17, %s5126_s17, %s5127_s18  }
  0x1d   :  { %s4977_s1 = scalar_lea.vmem %s85_s15, 4096  ;;  %p4982_p11 = scmp.lt.s32.totalorder %s85_s15, %s85_s15 }
  0x1e   :  { %p4978_p10 = scmp.ne.s32.totalorder %s85_s15, %s4977_s1  ;;  %p4983_p12 = scmp.lt.s32.totalorder %s4977_s1, %s4977_s1 }
  0x20   :  { %p4984_p13 = por %p4983_p12, %p4982_p11 }
  0x22   :  { %p4985_p0 = pnand %p4984_p13, %p4978_p10 }
  0x24   :  { %4988 = shalt.err (!%p4985_p0)
}
  0x25   :  { %90 = dma.hbm_to_vmem [thread:$0]  %s5867_s5, 4096, %s85_s15, [#allocation12], %s5126_s17, %s5126_s17, %s5127_s18  }
  0x26   :  { %s5128_s23 = smov [#allocation2]   ;;  %s5129_s25 = smov [#allocation7]  }
  0x27   :  { %s24_s24 = sshll.u32 %s5128_s23, 4  ;;  %s48_s3 = sshll.u32 %s5129_s25, 4  ;;  %s25_s24 = int_to_ptr.vmem [resolvable:$true] %s24_s24  ;;  %s49_s3 = int_to_ptr.vmem [resolvable:$true] %s48_s3 }
  0x28   :  { %s4997_s26 = scalar_lea.vmem %s25_s24, 256  ;;  %p5002_p2 = scmp.lt.s32.totalorder %s25_s24, %s25_s24 }
  0x29   :  { %p4998_p1 = scmp.ne.s32.totalorder %s25_s24, %s4997_s26  ;;  %p5003_p3 = scmp.lt.s32.totalorder %s4997_s26, %s4997_s26 }
  0x2b   :  { %p5004_p4 = por %p5003_p3, %p5002_p2 }
  0x2d   :  { %p5005_p5 = pnand %p5004_p4, %p4998_p1 }
  0x2f   :  { %5008 = shalt.err (!%p5005_p5)
}
  0x30   :  { %30 = dma.hbm_to_vmem [thread:$0]  %s5862_s0, 256, %s25_s24, [#allocation3], %s5126_s17, %s5126_s17, %s5127_s18  }
  0x31   :  { %s5017_s5 = scalar_lea.vmem %s49_s3, 2048  ;;  %p5022_p7 = scmp.lt.s32.totalorder %s49_s3, %s49_s3 }
  0x32   :  { %p5018_p6 = scmp.ne.s32.totalorder %s49_s3, %s5017_s5  ;;  %p5023_p8 = scmp.lt.s32.totalorder %s5017_s5, %s5017_s5 }
  0x34   :  { %p5024_p9 = por %p5023_p8, %p5022_p7 }
  0x36   :  { %p5025_p10 = pnand %p5024_p9, %p5018_p6 }
  0x38   :  { %5028 = shalt.err (!%p5025_p10)
}
  0x39   :  { %54 = dma.hbm_to_vmem [thread:$0]  %s5864_s2, 2048, %s49_s3, [#allocation6], %s5122_s30, %s5122_s30, %s5123_s9  }
  0x3a   :  { %s5130_s11 = smov [#allocation10]   ;;  %s5131_s13 = smov [#allocation13]  }
  0x3b   :  { %s72_s12 = sshll.u32 %s5130_s11, 4  ;;  %s96_s0 = sshll.u32 %s5131_s13, 4  ;;  %s73_s12 = int_to_ptr.vmem [resolvable:$true] %s72_s12  ;;  %s97_s0 = int_to_ptr.vmem [resolvable:$true] %s96_s0 }
  0x3c   :  { %s5037_s14 = scalar_lea.vmem %s73_s12, 256  ;;  %p5042_p12 = scmp.lt.s32.totalorder %s73_s12, %s73_s12 }
  0x3d   :  { %p5038_p11 = scmp.ne.s32.totalorder %s73_s12, %s5037_s14  ;;  %p5043_p13 = scmp.lt.s32.totalorder %s5037_s14, %s5037_s14 }
  0x3f   :  { %p5044_p0 = por %p5043_p13, %p5042_p12 }
  0x41   :  { %p5045_p1 = pnand %p5044_p0, %p5038_p11 }
  0x43   :  { %5048 = shalt.err (!%p5045_p1)
}
  0x44   :  { %78 = dma.hbm_to_vmem [thread:$0]  %s5866_s4, 256, %s73_s12, [#allocation9], %s5126_s17, %s5126_s17, %s5127_s18  }
  0x45   :  { %s5057_s2 = scalar_lea.vmem %s97_s0, 64  ;;  %p5062_p3 = scmp.lt.s32.totalorder %s97_s0, %s97_s0 }
  0x46   :  { %p5058_p2 = scmp.ne.s32.totalorder %s97_s0, %s5057_s2  ;;  %p5063_p4 = scmp.lt.s32.totalorder %s5057_s2, %s5057_s2 }
  0x48   :  { %p5064_p5 = por %p5063_p4, %p5062_p3 }
  0x4a   :  { %p5065_p6 = pnand %p5064_p5, %p5058_p2 }
  0x4c   :  { %5068 = shalt.err (!%p5065_p6)
}
  0x4d   :  { %s5132_s19 = smov 32   ;;  %s5133_s20 = smov 2  }
  0x4e   :  { %102 = dma.hbm_to_vmem [thread:$0]  %s5868_s6, 64, %s97_s0, [#allocation12], %s5132_s19, %s5132_s19, %s5133_s20  }
  0x4f   :  { %s5134_s22 = smov [#allocation14]  }
  0x50   :  { %s108_s23 = sshll.u32 %s5134_s22, 4  ;;  %s109_s23 = int_to_ptr.vmem [resolvable:$true] %s108_s23 }
  0x51   :  { %s5077_s4 = scalar_lea.vmem %s109_s23, 4096  ;;  %p5082_p8 = scmp.lt.s32.totalorder %s109_s23, %s109_s23 }
  0x52   :  { %p5078_p7 = scmp.ne.s32.totalorder %s109_s23, %s5077_s4  ;;  %p5083_p9 = scmp.lt.s32.totalorder %s5077_s4, %s5077_s4 }
  0x54   :  { %p5084_p10 = por %p5083_p9, %p5082_p8 }
  0x56   :  { %p5085_p11 = pnand %p5084_p10, %p5078_p7 }
  0x58   :  { %5088 = shalt.err (!%p5085_p11)
}
  0x59   :  { %114 = dma.hbm_to_vmem [thread:$0]  %s5869_s7, 4096, %s109_s23, [#allocation15], %s5122_s30, %s5122_s30, %s5123_s9  }
  0x5a   :  { %5109 = dma.done.wait [#allocation3], 256  }
  0x5b   :  { %5110 = vsyncadd [#allocation3], 4294967040 }
  0x5c   :  { %5111 = dma.done.wait [#allocation6], 8192  }
  0x5d   :  { %5112 = vsyncadd [#allocation6], 4294959104 }
  0x5e   :  { %5113 = dma.done.wait [#allocation9], 1280  }
  0x5f   :  { %5114 = vsyncadd [#allocation9], 4294966016 }
  0x60   :  { %5115 = dma.done.wait [#allocation12], 4160  }
  0x61   :  { %5116 = vsyncadd [#allocation12], 4294963136 }
  0x62   :  { %5117 = dma.done.wait [#allocation15], 4096  }
  0x63   :  { %5118 = vsyncadd [#allocation15], 4294963200  ;;  %v140_v0 = vld [vmem:[#allocation2] sm:$0xff]  ;;  %v141_v1 = vld [vmem:[#allocation2 + $0x8] sm:$0xff]  ;;  %v5135_v4 = vmov 0.0   ;;  %vm5136_vm0 = vmmov 0   ;;  %v166_v33 = vlaneseq }
  0x64   :  { %143 = vadd.xlane.f32.xlu0 %v140_v0  ;;  %v4669_v2 = vld [vmem:[#allocation5 + $0x38] sm:$0xff]   ;;  %4268 = vmatprep.subr.bf16.mxu0 %v5135_v4  ;;  %v4671_v13 = vld [vmem:[#allocation5 + $0x30] sm:$0xff]   ;;  %v4673_v15 = vld [vmem:[#allocation5 + $0x28] sm:$0xff]   ;;  %vm502_vm1 = vcmask 261120   ;;  %vm628_vm2 = vcmask 1043456   ;;  %vm600_vm3 = vcmask 64512  }
  0x65   :  { %v4670_v3 = vld [vmem:[#allocation5 + $0x78] sm:$0xff]   ;;  %4288 = vmatprep.subr.bf16.mxu1 %v5135_v4  ;;  %4269 = vmatpush3.bf16.msra.mxu0 %v4669_v2  ;;  %v4672_v14 = vld [vmem:[#allocation5 + $0x70] sm:$0xff]   ;;  %v4674_v16 = vld [vmem:[#allocation5 + $0x68] sm:$0xff]   ;;  %v5262_v34 = vshrl.u32 %v166_v33, 7  ;;  %s5137_s6 = smov 96   ;;  %vm1428_vm4 = vcmask 523264  }
  0x66   :  { %4289 = vmatpush3.bf16.msra.mxu1 %v4670_v3  ;;  %4270 = vmatprep.subr.bf16.mxu0 %v5135_v4  ;;  %v4675_v17 = vld [vmem:[#allocation5 + $0x20] sm:$0xff]   ;;  %v4677_v19 = vld [vmem:[#allocation5 + $0x18] sm:$0xff]   ;;  %v4679_v21 = vld [vmem:[#allocation5 + $0x10] sm:$0xff]   ;;  %vm1431_vm5 = vcmask 785408   ;;  %s5139_s7 = smov [#allocation16]  }
  0x67   :  { %4290 = vmatprep.subr.bf16.mxu1 %v5135_v4  ;;  %v4676_v18 = vld [vmem:[#allocation5 + $0x60] sm:$0xff]   ;;  %4284 = vmatprep.mubr.msk.bf16.mxu0 %vm5136_vm0, %v5135_v4  ;;  %v4678_v20 = vld [vmem:[#allocation5 + $0x58] sm:$0xff]   ;;  %v4680_v22 = vld [vmem:[#allocation5 + $0x50] sm:$0xff]   ;;  %v5265_v35 = vsub.s32 0, %v5262_v34  ;;  %v5273_v40 = vsub.s32 1, %v5262_v34 }
  0x68   :  { %145 = vadd.xlane.f32.xlu0 %v141_v1  ;;  %4304 = vmatprep.mubr.msk.bf16.mxu1 %vm5136_vm0, %v5135_v4  ;;  %v4681_v23 = vld [vmem:[#allocation5 + $0x8] sm:$0xff]   ;;  %v4683_v25 = vld [vmem:[#allocation5] sm:$0xff]   ;;  %v4685_v48 = vld [vmem:[#allocation5 + $0xb8] sm:$0xff]  }
  0x69   :  { %4271 = vmatpush3.bf16.msra.mxu0 %v4671_v13  ;;  %v4682_v24 = vld [vmem:[#allocation5 + $0x48] sm:$0xff]   ;;  %v4684_v26 = vld [vmem:[#allocation5 + $0x40] sm:$0xff]   ;;  %v4686_v50 = vld [vmem:[#allocation5 + $0xb0] sm:$0xff]  }
  0x6a   :  { %4291 = vmatpush3.bf16.msra.mxu1 %v4672_v14  ;;  %4272 = vmatprep.subr.bf16.mxu0 %v5135_v4  ;;  %v5267_v36 = vld [vmem:[#allocation10] sm:$0xff]  ;;  %v4687_v51 = vld [vmem:[#allocation5 + $0xa8] sm:$0xff]   ;;  %v4689_v53 = vld [vmem:[#allocation5 + $0x98] sm:$0xff]  }
  0x6b   :  { %4292 = vmatprep.subr.bf16.mxu1 %v5135_v4  ;;  %v169_v39 = vrot.slane %v5267_v36, %v5265_v35  ;;  %v175_v44 = vrot.slane %v5267_v36, %v5273_v40  ;;  %v4688_v52 = vld [vmem:[#allocation5 + $0xa0] sm:$0xff]   ;;  %v4690_v54 = vld [vmem:[#allocation5 + $0x90] sm:$0xff]   ;;  %v4691_v55 = vld [vmem:[#allocation5 + $0x88] sm:$0xff]  }
  0x6c   :  { %v4692_v56 = vld [vmem:[#allocation5 + $0x80] sm:$0xff]  }
  0x6d   :  { %4273 = vmatpush3.bf16.msra.mxu0 %v4673_v15  ;;  %v597_v15 = vld [vmem:[#allocation8] sm:$0xff] }
  0x6e   :  { %4293 = vmatpush3.bf16.msra.mxu1 %v4674_v16  ;;  %4274 = vmatprep.subr.bf16.mxu0 %v5135_v4 }
  0x6f   :  { %4294 = vmatprep.subr.bf16.mxu1 %v5135_v4 }
  0x71   :  { %4275 = vmatpush3.bf16.msra.mxu0 %v4675_v17 }
  0x72   :  { %4295 = vmatpush3.bf16.msra.mxu1 %v4676_v18  ;;  %4276 = vmatprep.subr.bf16.mxu0 %v5135_v4 }
  0x73   :  { %4296 = vmatprep.subr.bf16.mxu1 %v5135_v4 }
  0x75   :  { %4277 = vmatpush3.bf16.msra.mxu0 %v4677_v19 }
  0x76   :  { %4297 = vmatpush3.bf16.msra.mxu1 %v4678_v20  ;;  %4278 = vmatprep.subr.bf16.mxu0 %v5135_v4 }
  0x77   :  { %4298 = vmatprep.subr.bf16.mxu1 %v5135_v4 }
  0x79   :  { %4279 = vmatpush3.bf16.msra.mxu0 %v4679_v21 }
  0x7a   :  { %4299 = vmatpush3.bf16.msra.mxu1 %v4680_v22  ;;  %4280 = vmatprep.subr.bf16.mxu0 %v5135_v4 }
  0x7b   :  { %4300 = vmatprep.subr.bf16.mxu1 %v5135_v4 }
  0x7d   :  { %4281 = vmatpush3.bf16.msra.mxu0 %v4681_v23 }
  0x7e   :  { %4301 = vmatpush3.bf16.msra.mxu1 %v4682_v24  ;;  %4282 = vmatprep.subr.bf16.mxu0 %v5135_v4 }
  0x7f   :  { %4302 = vmatprep.subr.bf16.mxu1 %v5135_v4 }
  0x81   :  { %4283 = vmatpush3.bf16.msra.mxu0 %v4683_v25 }
  0x82   :  { %4303 = vmatpush3.bf16.msra.mxu1 %v4684_v26  ;;  %4308 = vmatprep.subr.bf16.mxu0 %v5135_v4 }
  0x83   :  { %4328 = vmatprep.subr.bf16.mxu1 %v5135_v4 }
  0xed   :  { %v144_v5 = vpop.xlane.xlu0 %143 }
  0xee   :  { %v148_v6 = vmul.f32 0.0078125, %v144_v5 }
  0xf0   :  { %v5236_v7 = vsub.f32 %v140_v0, %v148_v6 }
  0xf1   :  { %v146_v8 = vpop.xlane.xlu0 %145 }
  0xf2   :  { %v149_v9 = vmul.f32 0.0078125, %v146_v8  ;;  %v152_v10 = vmul.f32 %v5236_v7, %v5236_v7 }
  0xf4   :  { %v5240_v11 = vsub.f32 %v141_v1, %v149_v9  ;;  %154 = vadd.xlane.f32.xlu1 %v152_v10 }
  0xf6   :  { %v153_v12 = vmul.f32 %v5240_v11, %v5240_v11 }
  0xf8   :  { %156 = vadd.xlane.f32.xlu1 %v153_v12 }
 0x17d   :  { %v155_v27 = vpop.xlane.xlu1 %154 }
 0x17e   :  { %v158_v28 = vmul.f32 0.0078125, %v155_v27 }
 0x180   :  { %v160_v29 = vadd.f32 1e-05, %v158_v28 }
 0x181   :  { %v157_v30 = vpop.xlane.xlu1 %156 }
 0x182   :  { %4813 = vrsqrt.f32 %v160_v29  ;;  %v159_v31 = vmul.f32 0.0078125, %v157_v30 }
 0x184   :  { %v161_v32 = vadd.f32 1e-05, %v159_v31 }
 0x186   :  { %4815 = vrsqrt.f32 %v161_v32 }
 0x18f   :  { %v4814_v37 = vpop.eup %4813 }
 0x190   :  { %v164_v38 = vmul.f32 %v4814_v37, %v5236_v7 }
 0x192   :  { %v170_v43 = vmul.f32 %v169_v39, %v164_v38 }
 0x193   :  { %v4816_v41 = vpop.eup %4815 }
 0x194   :  { %v165_v42 = vmul.f32 %v4816_v41, %v5240_v11  ;;  %v176_v46 = vadd.f32 %v175_v44, %v170_v43 }
 0x196   :  { %v171_v45 = vmul.f32 %v169_v39, %v165_v42 }
 0x198   :  { %v177_v47 = vadd.f32 %v175_v44, %v171_v45 }
 0x19a   :  { %v178_v49 = vpack.c.bf16 %v177_v47, %v176_v46 }
 0x19c   :  { %4285 = vmatmul.mubr.bf16.vlgmr.msra.gmra.mxu0 %v178_v49  ;;  %4305 = vmatmul.mubr.bf16.vlgmr.msra.gmra.mxu1 %v178_v49 }
 0x19d   :  { %4309 = vmatpush3.bf16.msra.mxu0 %v4685_v48  ;;  %4324 = vmatprep.mubr.msk.bf16.mxu0 %vm5136_vm0, %v5135_v4 }
 0x19e   :  { %4310 = vmatprep.subr.bf16.mxu0 %v5135_v4  ;;  %4330 = vmatprep.mubr.msk.bf16.mxu1 %vm5136_vm0, %v5135_v4 }
 0x1a1   :  { %4311 = vmatpush3.bf16.msra.mxu0 %v4686_v50 }
 0x1a2   :  { %4312 = vmatprep.subr.bf16.mxu0 %v5135_v4 }
 0x1a5   :  { %4313 = vmatpush3.bf16.msra.mxu0 %v4687_v51 }
 0x1a6   :  { %4314 = vmatprep.subr.bf16.mxu0 %v5135_v4 }
 0x1a9   :  { %4315 = vmatpush3.bf16.msra.mxu0 %v4688_v52 }
 0x1aa   :  { %4316 = vmatprep.subr.bf16.mxu0 %v5135_v4 }
 0x1ad   :  { %4317 = vmatpush3.bf16.msra.mxu0 %v4689_v53 }
 0x1ae   :  { %4318 = vmatprep.subr.bf16.mxu0 %v5135_v4 }
 0x1b1   :  { %4319 = vmatpush3.bf16.msra.mxu0 %v4690_v54 }
 0x1b2   :  { %4320 = vmatprep.subr.bf16.mxu0 %v5135_v4 }
 0x1b5   :  { %4321 = vmatpush3.bf16.msra.mxu0 %v4691_v55 }
 0x1b6   :  { %4322 = vmatprep.subr.bf16.mxu0 %v5135_v4 }
 0x1b9   :  { %4323 = vmatpush3.bf16.msra.mxu0 %v4692_v56 }
 0x1ba   :  { %4376 = vmatprep.subr.bf16.mxu0 %v5135_v4 }
 0x1bc   :  { %4325 = vmatmul.mubr.bf16.vlgmr.msra.gmra.mxu0 %v178_v49 }
 0x1bd   :  { %4378 = vmatprep.mubr.msk.bf16.mxu0 %vm5136_vm0, %v5135_v4 }
 0x25c   :  { %v277_v57 = vpop.f32.mrf.mxu0  ;;  %v383_v58 = vpop.f32.mrf.mxu1 }
 0x25d   :  { %v5292_v59 = vpack.c.bf16 %v383_v58, %v383_v58  ;;  %v5299_v5 = vpack.c.bf16 %v277_v57, %v277_v57 }
 0x25e   :  { %v4286_v60 = vpop.f32.mrf.mxu0  ;;  %v4306_v61 = vpop.f32.mrf.mxu1 }
 0x25f   :  { %v507_v62 = vsel %vm502_vm1, %v5292_v59, 0 }
 0x260   :  { %v280_v63 = vpop.f32.mrf.mxu0  ;;  %v386_v0 = vpop.f32.mrf.mxu1  ;;  %4329 = vmatpush3.bf16.xpose.msra.mxu1 %v507_v62 }
 0x261   :  { %4334 = vmatprep.subr.bf16.mxu1 %v5135_v4  ;;  %v5297_v3 = vpack.c.bf16 %v386_v0, %v386_v0  ;;  %v5308_v7 = vpack.c.bf16 %v280_v63, %v280_v63 }
 0x262   :  { %v4287_v1 = vpop.f32.mrf.mxu0  ;;  %v4307_v2 = vpop.f32.mrf.mxu1 }
 0x263   :  { %v553_v6 = vsel %vm502_vm1, %v5297_v3, 0 }
 0x267   :  { %4331 = vmatmul.mubr.msk.bf16.vlgmr.msra.gmra.mxu1 %vm502_vm1, %v5299_v5 }
 0x268   :  { %4335 = vmatpush3.bf16.xpose.msra.mxu1 %v553_v6  ;;  %4336 = vmatprep.mubr.msk.bf16.mxu1 %vm5136_vm0, %v5135_v4 }
 0x269   :  { %4340 = vmatprep.subr.bf16.mxu1 %v5135_v4 }
 0x26f   :  { %4337 = vmatmul.mubr.msk.bf16.vlgmr.msra.gmra.mxu1 %vm502_vm1, %v5308_v7 }
 0x270   :  { %4342 = vmatprep.mubr.msk.bf16.mxu1 %vm5136_vm0, %v5135_v4 }
 0x27c   :  { %v489_v8 = vpop.f32.mrf.mxu0 }
 0x27d   :  { %v5314_v9 = vpack.c.bf16 %v489_v8, %v489_v8 }
 0x27e   :  { %v4326_v10 = vpop.f32.mrf.mxu0 }
 0x27f   :  { %v630_v11 = vsel %vm628_vm2, %v5314_v9, 0  ;;  %v825_v10 = vld [vmem:[#allocation8 + $0x8] sm:$0xff] }
 0x280   :  { %v492_v12 = vpop.f32.mrf.mxu0  ;;  %4341 = vmatpush3.bf16.msra.mxu1 %v630_v11 }
 0x281   :  { %4346 = vmatprep.subr.bf16.mxu1 %v5135_v4  ;;  %v5331_v46 = vpack.c.bf16 %v492_v12, %v492_v12 }
 0x282   :  { %v4327_v13 = vpop.f32.mrf.mxu0 }
 0x283   :  { %v676_v49 = vsel %vm628_vm2, %v5331_v46, 0 }
 0x327   :  { %v543_v14 = vpop.f32.mrf.mxu1 }
 0x328   :  { %v595_v16 = vmul.f32 0.17677669, %v543_v14 }
 0x329   :  { %v4332_v17 = vpop.f32.mrf.mxu1 }
 0x32a   :  { %v598_v18 = vadd.f32 %v597_v15, %v595_v16 }
 0x32b   :  { %v546_v19 = vpop.f32.mrf.mxu1 }
 0x32c   :  { %v601_v20 = vsel %vm600_vm3, %v598_v18, -inf }
 0x32d   :  { %602 = vmax.xlane.f32.xlu0 %v601_v20  ;;  %v4333_v21 = vpop.f32.mrf.mxu1 }
 0x32f   :  { %v589_v22 = vpop.f32.mrf.mxu1 }
 0x330   :  { %v596_v23 = vmul.f32 0.17677669, %v589_v22 }
 0x331   :  { %v4338_v24 = vpop.f32.mrf.mxu1 }
 0x332   :  { %v599_v25 = vadd.f32 %v597_v15, %v596_v23 }
 0x333   :  { %v592_v26 = vpop.f32.mrf.mxu1 }
 0x334   :  { %v604_v27 = vsel %vm600_vm3, %v599_v25, -inf }
 0x335   :  { %605 = vmax.xlane.f32.xlu1 %v604_v27  ;;  %v4339_v28 = vpop.f32.mrf.mxu1 }
 0x3b6   :  { %v603_v29 = vpop.xlane.xlu0 %602 }
 0x3b7   :  { %v607_v30 = vsub.f32 %v598_v18, %v603_v29 }
 0x3b9   :  { %v609_v31 = vmul.f32 1.442695, %v607_v30 }
 0x3bb   :  { %4817 = vpow2.f32 %v609_v31 }
 0x3be   :  { %v606_v32 = vpop.xlane.xlu1 %605 }
 0x3bf   :  { %v608_v33 = vsub.f32 %v599_v25, %v606_v32 }
 0x3c1   :  { %v611_v37 = vmul.f32 1.442695, %v608_v33 }
 0x3c3   :  { %4819 = vpow2.f32 %v611_v37 }
 0x3c8   :  { %v4818_v38 = vpop.eup %4817 }
 0x3c9   :  { %v613_v39 = vsel %vm600_vm3, %v4818_v38, 0.0 }
 0x3ca   :  { %614 = vadd.xlane.f32.xlu0 %v613_v39 }
 0x3d0   :  { %v4820_v41 = vpop.eup %4819 }
 0x3d1   :  { %v616_v42 = vsel %vm600_vm3, %v4820_v41, 0.0 }
 0x3d2   :  { %617 = vadd.xlane.f32.xlu1 %v616_v42 }
 0x3e0   :  { %722 = vrot.lane.b32.xlu0 %v5292_v59, %s5137_s6 }
 0x3e3   :  { %719 = vrot.lane.b32.xlu1 %v5299_v5, %s5137_s6 }
 0x3e7   :  { %774 = vrot.lane.b32.xlu1 %v5297_v3, %s5137_s6 }
 0x3eb   :  { %771 = vrot.lane.b32.xlu1 %v5308_v7, %s5137_s6 }
 0x453   :  { %v615_v43 = vpop.xlane.xlu0 %614 }
 0x454   :  { %4821 = vrcp.f32 %v615_v43 }
 0x457   :  { %v723_v52 = vpop.permute.xlu0 %722 }
 0x458   :  { %v728_v55 = vsel %vm502_vm1, %v723_v52, 0 }
 0x45b   :  { %v618_v44 = vpop.xlane.xlu1 %617 }
 0x45c   :  { %4823 = vrcp.f32 %v618_v44 }
 0x45f   :  { %v720_v54 = vpop.permute.xlu1 %719 }
 0x461   :  { %v4822_v45 = vpop.eup %4821 }
 0x462   :  { %v621_v47 = vmul.f32 %v4822_v45, %v4818_v38 }
 0x463   :  { %v775_v56 = vpop.permute.xlu1 %774 }
 0x464   :  { %v623_v48 = vpack.c.bf16 %v621_v47, %v621_v47  ;;  %v780_v57 = vsel %vm502_vm1, %v775_v56, 0 }
 0x466   :  { %4343 = vmatmul.mubr.msk.bf16.vlgmr.msra.gmra.mxu1 %vm600_vm3, %v623_v48 }
 0x467   :  { %4347 = vmatpush3.bf16.msra.mxu1 %v676_v49  ;;  %4348 = vmatprep.mubr.msk.bf16.mxu1 %vm5136_vm0, %v5135_v4  ;;  %v772_v58 = vpop.permute.xlu1 %771 }
 0x468   :  { %4352 = vmatprep.subr.bf16.mxu1 %v5135_v4 }
 0x469   :  { %v4824_v50 = vpop.eup %4823 }
 0x46a   :  { %v622_v51 = vmul.f32 %v4824_v50, %v4820_v41 }
 0x46c   :  { %v624_v53 = vpack.c.bf16 %v622_v51, %v622_v51 }
 0x46e   :  { %4349 = vmatmul.mubr.msk.bf16.vlgmr.msra.gmra.mxu1 %vm600_vm3, %v624_v53 }
 0x46f   :  { %4353 = vmatpush3.bf16.xpose.msra.mxu1 %v728_v55  ;;  %4354 = vmatprep.mubr.msk.bf16.mxu1 %vm5136_vm0, %v5135_v4 }
 0x470   :  { %4358 = vmatprep.subr.bf16.mxu1 %v5135_v4 }
 0x476   :  { %4355 = vmatmul.mubr.msk.bf16.vlgmr.msra.gmra.mxu1 %vm502_vm1, %v720_v54 }
 0x477   :  { %4359 = vmatpush3.bf16.xpose.msra.mxu1 %v780_v57  ;;  %4360 = vmatprep.mubr.msk.bf16.mxu1 %vm5136_vm0, %v5135_v4 }
 0x478   :  { %4364 = vmatprep.subr.bf16.mxu1 %v5135_v4 }
 0x47e   :  { %4361 = vmatmul.mubr.msk.bf16.vlgmr.msra.gmra.mxu1 %vm502_vm1, %v772_v58  ;;  %v1053_v58 = vld [vmem:[#allocation8 + $0x10] sm:$0xff] }
 0x47f   :  { %4366 = vmatprep.mubr.msk.bf16.mxu1 %vm5136_vm0, %v5135_v4 }
 0x526   :  { %v5352_v60 = vpop.f32.mrf.mxu1 }
 0x528   :  { %v4344_v61 = vpop.f32.mrf.mxu1 }
 0x52a   :  { %v669_v62 = vpop.f32.mrf.mxu1 }
 0x52c   :  { %v4345_v63 = vpop.f32.mrf.mxu1 }
 0x52e   :  { %v5354_v0 = vpop.f32.mrf.mxu1 }
 0x530   :  { %v4350_v1 = vpop.f32.mrf.mxu1 }
 0x532   :  { %v715_v2 = vpop.f32.mrf.mxu1 }
 0x534   :  { %v4351_v6 = vpop.f32.mrf.mxu1 }
 0x536   :  { %v764_v8 = vpop.f32.mrf.mxu1 }
 0x537   :  { %v822_v11 = vmul.f32 0.17677669, %v764_v8 }
 0x538   :  { %v4356_v12 = vpop.f32.mrf.mxu1 }
 0x539   :  { %v826_v13 = vadd.f32 %v825_v10, %v822_v11 }
 0x53a   :  { %v767_v14 = vpop.f32.mrf.mxu1 }
 0x53b   :  { %v828_v15 = vsel %vm600_vm3, %v826_v13, -inf }
 0x53c   :  { %829 = vmax.xlane.f32.xlu0 %v828_v15  ;;  %v4357_v16 = vpop.f32.mrf.mxu1 }
 0x53e   :  { %v816_v17 = vpop.f32.mrf.mxu1 }
 0x53f   :  { %v823_v18 = vmul.f32 0.17677669, %v816_v17 }
 0x540   :  { %v4362_v19 = vpop.f32.mrf.mxu1 }
 0x541   :  { %v827_v20 = vadd.f32 %v825_v10, %v823_v18 }
 0x542   :  { %v819_v21 = vpop.f32.mrf.mxu1 }
 0x543   :  { %v831_v22 = vsel %vm600_vm3, %v827_v20, -inf }
 0x544   :  { %832 = vmax.xlane.f32.xlu1 %v831_v22  ;;  %v4363_v23 = vpop.f32.mrf.mxu1 }
 0x555   :  { %902 = vrot.lane.b32.xlu1 %v5331_v46, %s5137_s6 }
 0x559   :  { %952 = vrot.lane.b32.xlu1 %v5292_v59, %s5122_s30 }
 0x55d   :  { %1002 = vrot.lane.b32.xlu1 %v5297_v3, %s5122_s30 }
 0x561   :  { %1000 = vrot.lane.b32.xlu1 %v5308_v7, %s5122_s30 }
 0x5c5   :  { %v830_v24 = vpop.xlane.xlu0 %829 }
 0x5c6   :  { %v834_v25 = vsub.f32 %v826_v13, %v830_v24 }
 0x5c8   :  { %v836_v26 = vmul.f32 1.442695, %v834_v25 }
 0x5ca   :  { %4825 = vpow2.f32 %v836_v26 }
 0x5cd   :  { %v833_v27 = vpop.xlane.xlu1 %832 }
 0x5ce   :  { %v835_v28 = vsub.f32 %v827_v20, %v833_v27 }
 0x5d0   :  { %v838_v29 = vmul.f32 1.442695, %v835_v28 }
 0x5d1   :  { %v903_v30 = vpop.permute.xlu1 %902 }
 0x5d2   :  { %4827 = vpow2.f32 %v838_v29  ;;  %v908_v50 = vsel %vm628_vm2, %v903_v30, 0 }
 0x5d5   :  { %v953_v31 = vpop.permute.xlu1 %952 }
 0x5d6   :  { %v958_v32 = vsel %vm502_vm1, %v953_v31, 0 }
 0x5d7   :  { %v4826_v33 = vpop.eup %4825  ;;  %4377 = vmatpush3.bf16.xpose.msra.mxu0 %v958_v32 }
 0x5d8   :  { %v840_v37 = vsel %vm600_vm3, %v4826_v33, 0.0  ;;  %4388 = vmatprep.subr.bf16.mxu0 %v5135_v4 }
 0x5d9   :  { %841 = vadd.xlane.f32.xlu0 %v840_v37  ;;  %v1003_v53 = vpop.permute.xlu1 %1002 }
 0x5da   :  { %v1008_v55 = vsel %vm502_vm1, %v1003_v53, 0 }
 0x5dd   :  { %v1001_v56 = vpop.permute.xlu1 %1000 }
 0x5df   :  { %v4828_v38 = vpop.eup %4827 }
 0x5e0   :  { %v843_v39 = vsel %vm600_vm3, %v4828_v38, 0.0 }
 0x5e1   :  { %844 = vadd.xlane.f32.xlu0 %v843_v39 }
 0x5f7   :  { %853 = vrot.lane.b32.xlu0 %v5314_v9, %s5137_s6 }
 0x5fb   :  { %950 = vrot.lane.b32.xlu0 %v5299_v5, %s5122_s30 }
 0x662   :  { %v842_v41 = vpop.xlane.xlu0 %841 }
 0x663   :  { %4829 = vrcp.f32 %v842_v41 }
 0x66a   :  { %v845_v42 = vpop.xlane.xlu0 %844 }
 0x66b   :  { %4831 = vrcp.f32 %v845_v42 }
 0x66e   :  { %v854_v43 = vpop.permute.xlu0 %853 }
 0x66f   :  { %v859_v44 = vsel %vm628_vm2, %v854_v43, 0 }
 0x670   :  { %v4830_v45 = vpop.eup %4829  ;;  %4365 = vmatpush3.bf16.msra.mxu1 %v859_v44 }
 0x671   :  { %4370 = vmatprep.subr.bf16.mxu1 %v5135_v4  ;;  %v848_v47 = vmul.f32 %v4830_v45, %v4826_v33 }
 0x672   :  { %v951_v48 = vpop.permute.xlu0 %950 }
 0x673   :  { %4379 = vmatmul.mubr.msk.bf16.vlgmr.msra.gmra.mxu0 %vm502_vm1, %v951_v48  ;;  %v850_v49 = vpack.c.bf16 %v848_v47, %v848_v47 }
 0x674   :  { %4390 = vmatprep.mubr.msk.bf16.mxu0 %vm5136_vm0, %v5135_v4 }
 0x675   :  { %4367 = vmatmul.mubr.msk.bf16.vlgmr.msra.gmra.mxu1 %vm600_vm3, %v850_v49 }
 0x676   :  { %4371 = vmatpush3.bf16.msra.mxu1 %v908_v50  ;;  %4372 = vmatprep.mubr.msk.bf16.mxu1 %vm5136_vm0, %v5135_v4 }
 0x677   :  { %4382 = vmatprep.subr.bf16.mxu1 %v5135_v4 }
 0x678   :  { %v4832_v51 = vpop.eup %4831 }
 0x679   :  { %v849_v52 = vmul.f32 %v4832_v51, %v4828_v38 }
 0x67b   :  { %v851_v54 = vpack.c.bf16 %v849_v52, %v849_v52 }
 0x67d   :  { %4373 = vmatmul.mubr.msk.bf16.vlgmr.msra.gmra.mxu1 %vm600_vm3, %v851_v54 }
 0x67e   :  { %4383 = vmatpush3.bf16.xpose.msra.mxu1 %v1008_v55  ;;  %4384 = vmatprep.mubr.msk.bf16.mxu1 %vm5136_vm0, %v5135_v4 }
 0x67f   :  { %4394 = vmatprep.subr.bf16.mxu1 %v5135_v4 }
 0x685   :  { %4385 = vmatmul.mubr.msk.bf16.vlgmr.msra.gmra.mxu1 %vm502_vm1, %v1001_v56 }
 0x686   :  { %4396 = vmatprep.mubr.msk.bf16.mxu1 %vm5136_vm0, %v5135_v4 }
 0x733   :  { %v994_v57 = vpop.f32.mrf.mxu0 }
 0x734   :  { %v1050_v61 = vmul.f32 0.17677669, %v994_v57 }
 0x735   :  { %v5392_v62 = vpop.f32.mrf.mxu1  ;;  %v4380_v63 = vpop.f32.mrf.mxu0 }
 0x736   :  { %v1054_v1 = vadd.f32 %v1053_v58, %v1050_v61  ;;  %v1279_v61 = vld [vmem:[#allocation8 + $0x18] sm:$0xff] }
 0x737   :  { %v4368_v2 = vpop.f32.mrf.mxu1  ;;  %v997_v6 = vpop.f32.mrf.mxu0 }
 0x738   :  { %v1056_v8 = vsel %vm600_vm3, %v1054_v1, -inf }
 0x739   :  { %v898_v10 = vpop.f32.mrf.mxu1  ;;  %1057 = vmax.xlane.f32.xlu0 %v1056_v8  ;;  %v4381_v11 = vpop.f32.mrf.mxu0 }
 0x73b   :  { %v4369_v12 = vpop.f32.mrf.mxu1 }
 0x73d   :  { %v5395_v13 = vpop.f32.mrf.mxu1 }
 0x73e   :  { %v4639_v14 = vpack.i.bf16 %v5395_v13, %v5392_v62 }
 0x73f   :  { %v4374_v15 = vpop.f32.mrf.mxu1 }
 0x741   :  { %v947_v16 = vpop.f32.mrf.mxu1 }
 0x743   :  { %v4375_v17 = vpop.f32.mrf.mxu1 }
 0x745   :  { %v1044_v18 = vpop.f32.mrf.mxu1 }
 0x746   :  { %v1051_v19 = vmul.f32 0.17677669, %v1044_v18 }
 0x747   :  { %v4386_v20 = vpop.f32.mrf.mxu1 }
 0x748   :  { %v1055_v21 = vadd.f32 %v1053_v58, %v1051_v19 }
 0x749   :  { %v1047_v22 = vpop.f32.mrf.mxu1 }
 0x74a   :  { %v1059_v23 = vsel %vm600_vm3, %v1055_v21, -inf }
 0x74b   :  { %1060 = vmax.xlane.f32.xlu1 %v1059_v23  ;;  %v4387_v24 = vpop.f32.mrf.mxu1 }
 0x75c   :  { %1128 = vrot.lane.b32.xlu1 %v5331_v46, %s5122_s30 }
 0x760   :  { %1178 = vrot.lane.b32.xlu1 %v5292_v59, %s5132_s19 }
 0x764   :  { %1228 = vrot.lane.b32.xlu1 %v5297_v3, %s5132_s19 }
 0x768   :  { %1226 = vrot.lane.b32.xlu1 %v5308_v7, %s5132_s19 }
 0x7c2   :  { %v1058_v25 = vpop.xlane.xlu0 %1057 }
 0x7c3   :  { %v1062_v26 = vsub.f32 %v1054_v1, %v1058_v25 }
 0x7c5   :  { %v1064_v27 = vmul.f32 1.442695, %v1062_v26 }
 0x7c7   :  { %4833 = vpow2.f32 %v1064_v27 }
 0x7d4   :  { %v4834_v28 = vpop.eup %4833  ;;  %v1061_v29 = vpop.xlane.xlu1 %1060 }
 0x7d5   :  { %v1063_v30 = vsub.f32 %v1055_v21, %v1061_v29  ;;  %v1068_v31 = vsel %vm600_vm3, %v4834_v28, 0.0 }
 0x7d6   :  { %1069 = vadd.xlane.f32.xlu0 %v1068_v31 }
 0x7d7   :  { %v1066_v32 = vmul.f32 1.442695, %v1063_v30 }
 0x7d8   :  { %v1129_v33 = vpop.permute.xlu1 %1128 }
 0x7d9   :  { %4835 = vpow2.f32 %v1066_v32  ;;  %v1134_v59 = vsel %vm628_vm2, %v1129_v33, 0 }
 0x7da   :  { %4395 = vmatpush3.bf16.msra.mxu1 %v1134_v59 }
 0x7db   :  { %4406 = vmatprep.subr.bf16.mxu1 %v5135_v4 }
 0x7dc   :  { %v1179_v44 = vpop.permute.xlu1 %1178 }
 0x7dd   :  { %v1184_v47 = vsel %vm502_vm1, %v1179_v44, 0  ;;  %v4694_v44 = vld [vmem:[#allocation7 + $0x30] sm:$0xff]  }
 0x7e0   :  { %v1229_v49 = vpop.permute.xlu1 %1228 }
 0x7e1   :  { %v1234_v52 = vsel %vm502_vm1, %v1229_v49, 0  ;;  %v4699_v49 = vld [vmem:[#allocation7 + $0x8] sm:$0xff]  }
 0x7e4   :  { %v1227_v53 = vpop.permute.xlu1 %1226 }
 0x7e6   :  { %v4836_v3 = vpop.eup %4835 }
 0x7e7   :  { %v1071_v7 = vsel %vm600_vm3, %v4836_v3, 0.0 }
 0x7e8   :  { %1072 = vadd.xlane.f32.xlu0 %v1071_v7 }
 0x7fe   :  { %1080 = vrot.lane.b32.xlu0 %v5314_v9, %s5122_s30 }
 0x802   :  { %1176 = vrot.lane.b32.xlu0 %v5299_v5, %s5132_s19 }
 0x85f   :  { %v1070_v37 = vpop.xlane.xlu0 %1069 }
 0x860   :  { %4837 = vrcp.f32 %v1070_v37 }
 0x86d   :  { %v4838_v38 = vpop.eup %4837 }
 0x86e   :  { %v1076_v41 = vmul.f32 %v4838_v38, %v4834_v28 }
 0x870   :  { %v1078_v45 = vpack.c.bf16 %v1076_v41, %v1076_v41 }
 0x871   :  { %v1073_v39 = vpop.xlane.xlu0 %1072 }
 0x872   :  { %4839 = vrcp.f32 %v1073_v39 }
 0x875   :  { %v1081_v42 = vpop.permute.xlu0 %1080 }
 0x876   :  { %v1086_v43 = vsel %vm628_vm2, %v1081_v42, 0 }
 0x877   :  { %4389 = vmatpush3.bf16.msra.mxu0 %v1086_v43  ;;  %v4693_v43 = vld [vmem:[#allocation7 + $0x38] sm:$0xff]  }
 0x878   :  { %4400 = vmatprep.subr.bf16.mxu0 %v5135_v4 }
 0x879   :  { %v1177_v50 = vpop.permute.xlu0 %1176 }
 0x87a   :  { %4391 = vmatmul.mubr.msk.bf16.vlgmr.msra.gmra.mxu0 %vm600_vm3, %v1078_v45  ;;  %v4695_v45 = vld [vmem:[#allocation7 + $0x28] sm:$0xff]  }
 0x87b   :  { %4401 = vmatpush3.bf16.xpose.msra.mxu0 %v1184_v47  ;;  %4402 = vmatprep.mubr.msk.bf16.mxu0 %vm5136_vm0, %v5135_v4  ;;  %v4696_v47 = vld [vmem:[#allocation7 + $0x20] sm:$0xff]  }
 0x87c   :  { %4412 = vmatprep.subr.bf16.mxu0 %v5135_v4 }
 0x87f   :  { %v4840_v5 = vpop.eup %4839 }
 0x880   :  { %v1077_v48 = vmul.f32 %v4840_v5, %v4836_v3  ;;  %v4697_v5 = vld [vmem:[#allocation7 + $0x18] sm:$0xff]  }
 0x882   :  { %4403 = vmatmul.mubr.msk.bf16.vlgmr.msra.gmra.mxu0 %vm502_vm1, %v1177_v50  ;;  %v1079_v51 = vpack.c.bf16 %v1077_v48, %v1077_v48  ;;  %v4698_v48 = vld [vmem:[#allocation7 + $0x10] sm:$0xff]  }
 0x883   :  { %4414 = vmatprep.mubr.msk.bf16.mxu0 %vm5136_vm0, %v5135_v4 }
 0x884   :  { %4397 = vmatmul.mubr.msk.bf16.vlgmr.msra.gmra.mxu1 %vm600_vm3, %v1079_v51  ;;  %v4700_v51 = vld [vmem:[#allocation7] sm:$0xff]  }
 0x885   :  { %4407 = vmatpush3.bf16.xpose.msra.mxu1 %v1234_v52  ;;  %4408 = vmatprep.mubr.msk.bf16.mxu1 %vm5136_vm0, %v5135_v4 }
 0x886   :  { %4418 = vmatprep.subr.bf16.mxu1 %v5135_v4 }
 0x88c   :  { %4409 = vmatmul.mubr.msk.bf16.vlgmr.msra.gmra.mxu1 %vm502_vm1, %v1227_v53 }
 0x88d   :  { %4420 = vmatprep.mubr.msk.bf16.mxu1 %vm5136_vm0, %v5135_v4 }
 0x93a   :  { %v1122_v54 = vpop.f32.mrf.mxu0 }
 0x93c   :  { %v4392_v55 = vpop.f32.mrf.mxu0 }
 0x93e   :  { %v1125_v56 = vpop.f32.mrf.mxu0 }
 0x940   :  { %v4393_v57 = vpop.f32.mrf.mxu0 }
 0x942   :  { %v1220_v58 = vpop.f32.mrf.mxu0 }
 0x943   :  { %v1276_v63 = vmul.f32 0.17677669, %v1220_v58 }
 0x944   :  { %v1170_v1 = vpop.f32.mrf.mxu1  ;;  %v4404_v2 = vpop.f32.mrf.mxu0 }
 0x945   :  { %v1280_v6 = vadd.f32 %v1279_v61, %v1276_v63  ;;  %v4644_v24 = vpack.i.bf16 %v1170_v1, %v1122_v54 }
 0x946   :  { %v4398_v8 = vpop.f32.mrf.mxu1  ;;  %v1223_v10 = vpop.f32.mrf.mxu0 }
 0x947   :  { %v1282_v11 = vsel %vm600_vm3, %v1280_v6, -inf }
 0x948   :  { %v1173_v12 = vpop.f32.mrf.mxu1  ;;  %1283 = vmax.xlane.f32.xlu0 %v1282_v11  ;;  %v4405_v15 = vpop.f32.mrf.mxu0 }
 0x94a   :  { %v4399_v16 = vpop.f32.mrf.mxu1 }
 0x94c   :  { %v1270_v17 = vpop.f32.mrf.mxu1 }
 0x94d   :  { %v1277_v18 = vmul.f32 0.17677669, %v1270_v17 }
 0x94e   :  { %v4410_v19 = vpop.f32.mrf.mxu1 }
 0x94f   :  { %v1281_v20 = vadd.f32 %v1279_v61, %v1277_v18 }
 0x950   :  { %v1273_v21 = vpop.f32.mrf.mxu1 }
 0x951   :  { %v1285_v22 = vsel %vm600_vm3, %v1281_v20, -inf }
 0x952   :  { %1286 = vmax.xlane.f32.xlu1 %v1285_v22  ;;  %v4411_v23 = vpop.f32.mrf.mxu1 }
 0x953   :  { %v1544_v23 = vsub.s32 2, %v5262_v34 }
 0x963   :  { %1354 = vrot.lane.b32.xlu1 %v5331_v46, %s5132_s19 }
 0x967   :  { %4640 = vrot.lane.b32.xlu1 %v4639_v14, %s5132_s19 }
 0x96b   :  { %4645 = vrot.lane.b32.xlu1 %v4644_v24, %s5122_s30 }
 0x9d1   :  { %v1284_v25 = vpop.xlane.xlu0 %1283 }
 0x9d2   :  { %v1288_v26 = vsub.f32 %v1280_v6, %v1284_v25 }
 0x9d4   :  { %v1290_v27 = vmul.f32 1.442695, %v1288_v26 }
 0x9d6   :  { %4841 = vpow2.f32 %v1290_v27 }
 0x9db   :  { %v1287_v28 = vpop.xlane.xlu1 %1286 }
 0x9dc   :  { %v1289_v29 = vsub.f32 %v1281_v20, %v1287_v28 }
 0x9de   :  { %v1292_v30 = vmul.f32 1.442695, %v1289_v29  ;;  %v4926_v29 = vld [vmem:[#allocation2 + $0x8] sm:$0xff] }
 0x9df   :  { %v1355_v31 = vpop.permute.xlu1 %1354 }
 0x9e0   :  { %4843 = vpow2.f32 %v1292_v30  ;;  %v1360_v32 = vsel %vm628_vm2, %v1355_v31, 0 }
 0x9e1   :  { %4419 = vmatpush3.bf16.msra.mxu1 %v1360_v32 }
 0x9e3   :  { %v4842_v46 = vpop.eup %4841  ;;  %v4641_v63 = vpop.permute.xlu1 %4640 }
 0x9e4   :  { %v1294_v33 = vsel %vm600_vm3, %v4842_v46, 0.0  ;;  %v4643_v2 = vunpack.i.h.bf16 %v4641_v63  ;;  %v4642_v6 = vunpack.i.l.bf16 %v4641_v63  ;;  %v1572_v63 = vsub.s32 3, %v5262_v34 }
 0x9e5   :  { %1295 = vadd.xlane.f32.xlu0 %v1294_v33  ;;  %v4703_v33 = vld [vmem:[#allocation11 + $0x74] ss:$8 sps:$4 sm:$0xff]  }
 0x9e6   :  { %v1427_v12 = vsel %vm502_vm1, %v5354_v0, %v4643_v2  ;;  %v1426_v15 = vsel %vm502_vm1, %v5352_v60, %v4642_v6  ;;  %v1545_v0 = vrot.slane %v5267_v36, %v1544_v23  ;;  %v4925_v60 = vld [vmem:[#allocation2] sm:$0xff]  ;;  %1691 = vmatprep.subr.bf16.mxu1 %v4703_v33  ;;  %v1573_v6 = vrot.slane %v5267_v36, %v1572_v63 }
 0x9e7   :  { %v4646_v1 = vpop.permute.xlu1 %4645  ;;  %v4739_v33 = vld [vmem:[#allocation14 + $0x40] sm:$0xff]  }
 0x9e8   :  { %v4648_v8 = vunpack.i.h.bf16 %v4646_v1  ;;  %v4647_v10 = vunpack.i.l.bf16 %v4646_v1 }
 0x9ea   :  { %v1430_v18 = vsel %vm1428_vm4, %v1427_v12, %v4648_v8  ;;  %v1429_v19 = vsel %vm1428_vm4, %v1426_v15, %v4647_v10  ;;  %v1578_v8 = vsub.s32 4, %v5262_v34 }
 0x9ec   :  { %v1579_v15 = vrot.slane %v5267_v36, %v1578_v8  ;;  %v4731_v36 = vld [vmem:[#allocation14 + $0x60] sm:$0xff]  }
 0x9ed   :  { %v4844_v62 = vpop.eup %4843 }
 0x9ee   :  { %v1297_v13 = vsel %vm600_vm3, %v4844_v62, 0.0 }
 0x9ef   :  { %1298 = vadd.xlane.f32.xlu0 %v1297_v13 }
 0xa05   :  { %1306 = vrot.lane.b32.xlu0 %v5314_v9, %s5132_s19 }
 0xa6e   :  { %v1296_v14 = vpop.xlane.xlu0 %1295 }
 0xa6f   :  { %4845 = vrcp.f32 %v1296_v14 }
 0xa78   :  { %v1299_v59 = vpop.xlane.xlu0 %1298 }
 0xa79   :  { %4847 = vrcp.f32 %v1299_v59 }
 0xa7c   :  { %v4846_v3 = vpop.eup %4845  ;;  %v1307_v7 = vpop.permute.xlu0 %1306 }
 0xa7d   :  { %v1312_v37 = vsel %vm628_vm2, %v1307_v7, 0  ;;  %v1302_v38 = vmul.f32 %v4846_v3, %v4842_v46  ;;  %v4701_v46 = vld [vmem:[#allocation11 + $0x70] ss:$8 sps:$4 sm:$0xff]  }
 0xa7e   :  { %4413 = vmatpush3.bf16.msra.mxu0 %v1312_v37 }
 0xa7f   :  { %v1304_v39 = vpack.c.bf16 %v1302_v38, %v1302_v38  ;;  %4424 = vmatprep.subr.bf16.mxu0 %v5135_v4 }
 0xa81   :  { %4415 = vmatmul.mubr.msk.bf16.vlgmr.msra.gmra.mxu0 %vm600_vm3, %v1304_v39  ;;  %v4706_v39 = vld [vmem:[#allocation11 + $0x64] ss:$8 sps:$4 sm:$0xff]  }
 0xa82   :  { %4440 = vmatprep.mubr.msk.bf16.mxu0 %vm5136_vm0, %v5135_v4  ;;  %4425 = vmatpush3.bf16.msra.mxu0 %v4693_v43  ;;  %v4710_v43 = vld [vmem:[#allocation11 + $0x40] ss:$8 sps:$4 sm:$0xff]  }
 0xa83   :  { %4426 = vmatprep.subr.bf16.mxu0 %v5135_v4 }
 0xa86   :  { %v4848_v41 = vpop.eup %4847  ;;  %4427 = vmatpush3.bf16.msra.mxu0 %v4694_v44  ;;  %v4712_v44 = vld [vmem:[#allocation11 + $0x44] ss:$8 sps:$4 sm:$0xff]  }
 0xa87   :  { %v1303_v9 = vmul.f32 %v4848_v41, %v4844_v62  ;;  %4428 = vmatprep.subr.bf16.mxu0 %v5135_v4  ;;  %v4704_v41 = vld [vmem:[#allocation11 + $0x60] ss:$8 sps:$4 sm:$0xff]  }
 0xa89   :  { %v1305_v42 = vpack.c.bf16 %v1303_v9, %v1303_v9  ;;  %v4709_v9 = vld [vmem:[#allocation11 + $0x54] ss:$8 sps:$4 sm:$0xff]  }
 0xa8a   :  { %4429 = vmatpush3.bf16.msra.mxu0 %v4695_v45  ;;  %v4715_v45 = vld [vmem:[#allocation11 + $0x34] ss:$8 sps:$4 sm:$0xff]  }
 0xa8b   :  { %4421 = vmatmul.mubr.msk.bf16.vlgmr.msra.gmra.mxu1 %vm600_vm3, %v1305_v42  ;;  %4430 = vmatprep.subr.bf16.mxu0 %v5135_v4  ;;  %v4707_v42 = vld [vmem:[#allocation11 + $0x50] ss:$8 sps:$4 sm:$0xff]  }
 0xa8c   :  { %1692 = vmatpush1.bf16.msra.mxu1 %v4701_v46  ;;  %v4738_v46 = vld [vmem:[#allocation14 + $0x8] sm:$0xff]  }
 0xa8d   :  { %1693 = vmatprep.subr.bf16.mxu1 %v4706_v39 }
 0xa8e   :  { %4431 = vmatpush3.bf16.msra.mxu0 %v4696_v47  ;;  %v4713_v47 = vld [vmem:[#allocation11 + $0x30] ss:$8 sps:$4 sm:$0xff]  }
 0xa8f   :  { %4432 = vmatprep.subr.bf16.mxu0 %v5135_v4 }
 0xa90   :  { %1694 = vmatpush1.bf16.msra.mxu1 %v4704_v41 }
 0xa91   :  { %1695 = vmatprep.subr.bf16.mxu1 %v4709_v9 }
 0xa92   :  { %4433 = vmatpush3.bf16.msra.mxu0 %v4697_v5  ;;  %v5138_v5 = vmov 0  }
 0xa93   :  { %4434 = vmatprep.subr.bf16.mxu0 %v5135_v4  ;;  %1723 = vmatprep.mubr.bf16.mxu1 %v5138_v5 }
 0xa94   :  { %1696 = vmatpush1.bf16.msra.mxu1 %v4707_v42 }
 0xa95   :  { %1697 = vmatprep.subr.bf16.mxu1 %v4712_v44 }
 0xa96   :  { %4435 = vmatpush3.bf16.msra.mxu0 %v4698_v48  ;;  %v4718_v48 = vld [vmem:[#allocation11 + $0x24] ss:$8 sps:$4 sm:$0xff]  }
 0xa97   :  { %4436 = vmatprep.subr.bf16.mxu0 %v5135_v4 }
 0xa98   :  { %1698 = vmatpush1.bf16.msra.mxu1 %v4710_v43 }
 0xa99   :  { %1699 = vmatprep.subr.bf16.mxu1 %v4715_v45 }
 0xa9a   :  { %4437 = vmatpush3.bf16.msra.mxu0 %v4699_v49  ;;  %v4716_v49 = vld [vmem:[#allocation11 + $0x20] ss:$8 sps:$4 sm:$0xff]  }
 0xa9b   :  { %4438 = vmatprep.subr.bf16.mxu0 %v5135_v4 }
 0xa9c   :  { %1700 = vmatpush1.bf16.msra.mxu1 %v4713_v47 }
 0xa9d   :  { %1701 = vmatprep.subr.bf16.mxu1 %v4718_v48 }
 0xa9e   :  { %4439 = vmatpush3.bf16.msra.mxu0 %v4700_v51  ;;  %v4719_v51 = vld [vmem:[#allocation11 + $0x10] ss:$8 sps:$4 sm:$0xff]  }
 0xaa0   :  { %1702 = vmatpush1.bf16.msra.mxu1 %v4716_v49 }
 0xb41   :  { %v1348_v50 = vpop.f32.mrf.mxu0 }
 0xb43   :  { %v4416_v52 = vpop.f32.mrf.mxu0 }
 0xb44   :  { %v4724_v52 = vld [vmem:[#allocation11 + $0x4] ss:$8 sps:$4 sm:$0xff]  }
 0xb45   :  { %v1351_v53 = vpop.f32.mrf.mxu0 }
 0xb46   :  { %v4722_v53 = vld [vmem:[#allocation11] ss:$8 sps:$4 sm:$0xff]  }
 0xb47   :  { %v4417_v54 = vpop.f32.mrf.mxu0 }
 0xb4b   :  { %v1396_v55 = vpop.f32.mrf.mxu1 }
 0xb4c   :  { %v4649_v56 = vpack.i.bf16 %v1396_v55, %v1348_v50  ;;  %v4721_v50 = vld [vmem:[#allocation11 + $0x14] ss:$8 sps:$4 sm:$0xff]  }
 0xb4d   :  { %v4422_v57 = vpop.f32.mrf.mxu1  ;;  %1703 = vmatprep.subr.bf16.mxu1 %v4721_v50 }
 0xb4e   :  { %4650 = vrot.lane.b32.xlu0 %v4649_v56, %s5137_s6  ;;  %1704 = vmatpush1.bf16.msra.mxu1 %v4719_v51 }
 0xb4f   :  { %v1399_v58 = vpop.f32.mrf.mxu1  ;;  %1705 = vmatprep.subr.bf16.mxu1 %v4724_v52 }
 0xb51   :  { %v4423_v61 = vpop.f32.mrf.mxu1 }
 0xb52   :  { %1706 = vmatpush1.bf16.msra.mxu1 %v4722_v53 }
 0xb53   :  { %4444 = vmatprep.subr.bf16.mxu1 %v5135_v4 }
 0xbc0   :  { %v4651_v11 = vpop.permute.xlu0 %4650 }
 0xbc1   :  { %v4653_v16 = vunpack.i.h.bf16 %v4651_v11  ;;  %v4652_v17 = vunpack.i.l.bf16 %v4651_v11 }
 0xbc3   :  { %v1433_v20 = vsel %vm1431_vm5, %v1430_v18, %v4653_v16  ;;  %v1432_v21 = vsel %vm1431_vm5, %v1429_v19, %v4652_v17 }
 0xbc4   :  { %v1434_v22 = vpack.c.bf16 %v1433_v20, %v1432_v21  ;;  %v4725_v20 = vld [vmem:[#allocation14 + $0x78] sm:$0xff]  }
 0xbc5   :  { %v4726_v21 = vld [vmem:[#allocation14 + $0x38] sm:$0xff]   ;;  %4156 = vmatprep.subr.bf16.mxu0 %v4725_v20 }
 0xbc6   :  { %4441 = vmatmul.mubr.bf16.vlgmr.msra.gmra.mxu0 %v1434_v22  ;;  %v4727_v22 = vld [vmem:[#allocation14 + $0x70] sm:$0xff]  }
 0xbc7   :  { %4157 = vmatpush3.bf16.msra.mxu0 %v4726_v21 }
 0xbc8   :  { %4158 = vmatprep.subr.bf16.mxu0 %v4727_v22 }
 0xc86   :  { %v1533_v24 = vpop.f32.mrf.mxu0 }
 0xc87   :  { %v1540_v25 = vadd.f32 %v4925_v60, %v1533_v24  ;;  %v4729_v24 = vld [vmem:[#allocation14 + $0x68] sm:$0xff]  }
 0xc88   :  { %v4442_v26 = vpop.f32.mrf.mxu0  ;;  %v4730_v60 = vld [vmem:[#allocation14 + $0x28] sm:$0xff]  }
 0xc89   :  { %v5474_v27 = vadd.f32 %v1545_v0, %v1540_v25  ;;  %v4732_v25 = vld [vmem:[#allocation14 + $0x20] sm:$0xff]   ;;  %v4733_v26 = vld [vmem:[#allocation14 + $0x58] sm:$0xff]  }
 0xc8a   :  { %v1536_v28 = vpop.f32.mrf.mxu0 }
 0xc8b   :  { %v1541_v30 = vadd.f32 %v4926_v29, %v1536_v28  ;;  %1548 = vadd.xlane.f32.xlu1 %v5474_v27  ;;  %v4734_v28 = vld [vmem:[#allocation14 + $0x18] sm:$0xff]   ;;  %v4735_v29 = vld [vmem:[#allocation14 + $0x50] sm:$0xff]  }
 0xc8c   :  { %v4443_v31 = vpop.f32.mrf.mxu0 }
 0xc8d   :  { %v5477_v32 = vadd.f32 %v1545_v0, %v1541_v30  ;;  %v4728_v0 = vld [vmem:[#allocation14 + $0x30] sm:$0xff]   ;;  %v4737_v31 = vld [vmem:[#allocation14 + $0x48] sm:$0xff]  }
 0xc8e   :  { %4159 = vmatpush3.bf16.msra.mxu0 %v4728_v0  ;;  %v4736_v30 = vld [vmem:[#allocation14 + $0x10] sm:$0xff]  }
 0xc8f   :  { %1550 = vadd.xlane.f32.xlu0 %v5477_v32  ;;  %4160 = vmatprep.subr.bf16.mxu0 %v4729_v24 }
 0xc92   :  { %4161 = vmatpush3.bf16.msra.mxu0 %v4730_v60 }
 0xc93   :  { %4162 = vmatprep.subr.bf16.mxu0 %v4731_v36 }
 0xc96   :  { %4163 = vmatpush3.bf16.msra.mxu0 %v4732_v25 }
 0xc97   :  { %4164 = vmatprep.subr.bf16.mxu0 %v4733_v26 }
 0xc9a   :  { %4165 = vmatpush3.bf16.msra.mxu0 %v4734_v28 }
 0xc9b   :  { %4166 = vmatprep.subr.bf16.mxu0 %v4735_v29 }
 0xc9e   :  { %4167 = vmatpush3.bf16.msra.mxu0 %v4736_v30 }
 0xc9f   :  { %4168 = vmatprep.subr.bf16.mxu0 %v4737_v31 }
 0xca2   :  { %4169 = vmatpush3.bf16.msra.mxu0 %v4738_v46 }
 0xca3   :  { %4170 = vmatprep.subr.bf16.mxu0 %v4739_v33 }
 0xd14   :  { %v1549_v62 = vpop.xlane.xlu1 %1548 }
 0xd15   :  { %v1552_v13 = vmul.f32 0.0078125, %v1549_v62  ;;  %v4740_v62 = vld [vmem:[#allocation14] sm:$0xff]  }
 0xd16   :  { %4171 = vmatpush3.bf16.msra.mxu0 %v4740_v62 }
 0xd17   :  { %v1554_v14 = vsub.f32 %v5474_v27, %v1552_v13  ;;  %4464 = vmatprep.subr.bf16.mxu0 %v5135_v4  ;;  %v1599_v13 = vld [vmem:[#allocation13] sm:$0x3] }
 0xd18   :  { %v1551_v59 = vpop.xlane.xlu0 %1550 }
 0xd19   :  { %v1553_v3 = vmul.f32 0.0078125, %v1551_v59  ;;  %v1556_v7 = vmul.f32 %v1554_v14, %v1554_v14  ;;  %v1608_v59 = vrot.slane %v1599_v13, %v5273_v40 }
 0xd1b   :  { %v1555_v37 = vsub.f32 %v5477_v32, %v1553_v3  ;;  %1558 = vadd.xlane.f32.xlu0 %v1556_v7 }
 0xd1d   :  { %v1557_v38 = vmul.f32 %v1555_v37, %v1555_v37 }
 0xd1f   :  { %1560 = vadd.xlane.f32.xlu0 %v1557_v38 }
 0xda4   :  { %v1559_v54 = vpop.xlane.xlu0 %1558 }
 0xda5   :  { %v1562_v55 = vmul.f32 0.0078125, %v1559_v54 }
 0xda7   :  { %v1564_v56 = vadd.f32 1e-05, %v1562_v55 }
 0xda8   :  { %v1561_v57 = vpop.xlane.xlu0 %1560 }
 0xda9   :  { %4849 = vrsqrt.f32 %v1564_v56  ;;  %v1563_v58 = vmul.f32 0.0078125, %v1561_v57 }
 0xdab   :  { %v1565_v61 = vadd.f32 1e-05, %v1563_v58 }
 0xdad   :  { %4851 = vrsqrt.f32 %v1565_v61 }
 0xdb6   :  { %v4850_v1 = vpop.eup %4849 }
 0xdb7   :  { %v1568_v2 = vmul.f32 %v4850_v1, %v1554_v14  ;;  %v1604_v14 = vrot.slane %v1599_v13, %v5265_v35 }
 0xdb9   :  { %v1574_v12 = vmul.f32 %v1573_v6, %v1568_v2 }
 0xdba   :  { %v4852_v10 = vpop.eup %4851 }
 0xdbb   :  { %v1569_v11 = vmul.f32 %v4852_v10, %v1555_v37  ;;  %v1580_v17 = vadd.f32 %v1579_v15, %v1574_v12 }
 0xdbd   :  { %v1575_v16 = vmul.f32 %v1573_v6, %v1569_v11 }
 0xdbf   :  { %v1581_v18 = vadd.f32 %v1579_v15, %v1575_v16 }
 0xdc1   :  { %v1582_v19 = vpack.c.bf16 %v1581_v18, %v1580_v17 }
 0xdc3   :  { %1724 = vmatmul.mubr.bf16.vlgmr.msra.gmra.mxu1 %v1582_v19 }
 0xdc4   :  { %4460 = vmatprep.mubr.msk.bf16.mxu1 %vm5136_vm0, %v5135_v4 }
 0xe83   :  { %v1725_v3 = vpop.f32.mrf.mxu1 }
 0xe84   :  { %v5497_v7 = vadd.f32 %v1725_v3, %v1604_v14 }
 0xe85   :  { %v1727_v37 = vpop.f32.mrf.mxu1 }
 0xe86   :  { %v5500_v38 = vmul.f32 0.70710677, %v5497_v7  ;;  %v5502_v39 = vadd.f32 %v1727_v37, %v1608_v59 }
 0xe87   :  { %v1729_v41 = vpop.f32.mrf.mxu1 }
 0xe88   :  { %vm1742_vm6 = vcmp.ge.f32.partialorder %v5500_v38, 0.0  ;;  %v1746_v9 = vsub.f32 0.0, %v5500_v38  ;;  %v5507_v42 = vmul.f32 0.70710677, %v5502_v39  ;;  %v5509_v43 = vadd.f32 %v1729_v41, %v1604_v14 }
 0xe89   :  { %v1731_v44 = vpop.f32.mrf.mxu1 }
 0xe8a   :  { %v1750_v45 = vsel %vm1742_vm6, %v5500_v38, %v1746_v9  ;;  %vm1743_vm7 = vcmp.ge.f32.partialorder %v5507_v42, 0.0  ;;  %v1747_v47 = vsub.f32 0.0, %v5507_v42  ;;  %v5516_v48 = vadd.f32 %v1731_v44, %v1608_v59 }
 0xe8b   :  { %v1754_v49 = vmul.f32 0.3275911, %v1750_v45  ;;  %v5519_v50 = vmul.f32 0.70710677, %v5509_v43  ;;  %v1806_v11 = vsub.f32 0.0, %v1750_v45  ;;  %v1734_v38 = vmul.f32 0.5, %v5497_v7 }
 0xe8c   :  { %v1751_v51 = vsel %vm1743_vm7, %v5507_v42, %v1747_v47  ;;  %v5525_v52 = vmul.f32 0.70710677, %v5516_v48  ;;  %v1735_v42 = vmul.f32 0.5, %v5502_v39  ;;  %v4927_v39 = vld [vmem:[#allocation10] sm:$0xff] }
 0xe8d   :  { %v1758_v53 = vadd.f32 1.0, %v1754_v49  ;;  %v1755_v54 = vmul.f32 0.3275911, %v1751_v51  ;;  %vm1744_vm8 = vcmp.ge.f32.partialorder %v5519_v50, 0.0  ;;  %v1748_v55 = vsub.f32 0.0, %v5519_v50 }
 0xe8e   :  { %vm1745_vm9 = vcmp.ge.f32.partialorder %v5525_v52, 0.0  ;;  %v1749_v56 = vsub.f32 0.0, %v5525_v52  ;;  %v1807_v12 = vsub.f32 0.0, %v1751_v51  ;;  %v1810_v15 = vmul.f32 %v1806_v11, %v1750_v45 }
 0xe8f   :  { %4853 = vrcp.f32 %v1758_v53  ;;  %v1759_v57 = vadd.f32 1.0, %v1755_v54  ;;  %v1752_v58 = vsel %vm1744_vm8, %v5519_v50, %v1748_v55 }
 0xe90   :  { %v1753_v61 = vsel %vm1745_vm9, %v5525_v52, %v1749_v56  ;;  %v1756_v1 = vmul.f32 0.3275911, %v1752_v58  ;;  %v1808_v16 = vsub.f32 0.0, %v1752_v58  ;;  %v1811_v18 = vmul.f32 %v1807_v12, %v1751_v51 }
 0xe91   :  { %4855 = vrcp.f32 %v1759_v57  ;;  %v1757_v2 = vmul.f32 0.3275911, %v1753_v61  ;;  %v1809_v19 = vsub.f32 0.0, %v1753_v61  ;;  %v1814_v21 = vmul.f32 1.442695, %v1810_v15 }
 0xe92   :  { %v1760_v6 = vadd.f32 1.0, %v1756_v1  ;;  %v1812_v24 = vmul.f32 %v1808_v16, %v1752_v58  ;;  %v1816_v36 = vmul.f32 1.442695, %v1811_v18 }
 0xe93   :  { %v1761_v10 = vadd.f32 1.0, %v1757_v2  ;;  %v1813_v25 = vmul.f32 %v1809_v19, %v1753_v61 }
 0xe94   :  { %4857 = vrcp.f32 %v1760_v6  ;;  %v1818_v33 = vmul.f32 1.442695, %v1812_v24 }
 0xe95   :  { %4859 = vrcp.f32 %v1761_v10  ;;  %v1820_v14 = vmul.f32 1.442695, %v1813_v25 }
 0xe96   :  { %4861 = vpow2.f32 %v1814_v21 }
 0xe97   :  { %4863 = vpow2.f32 %v1816_v36 }
 0xe98   :  { %4865 = vpow2.f32 %v1818_v33 }
 0xe99   :  { %4867 = vpow2.f32 %v1820_v14 }
 0xe9c   :  { %v4854_v17 = vpop.eup %4853 }
 0xe9d   :  { %v1770_v20 = vmul.f32 1.0614054, %v4854_v17 }
 0xe9e   :  { %v4856_v22 = vpop.eup %4855 }
 0xe9f   :  { %v1774_v0 = vadd.f32 -1.4531521, %v1770_v20  ;;  %v1771_v60 = vmul.f32 1.0614054, %v4856_v22 }
 0xea1   :  { %v1778_v26 = vmul.f32 %v4854_v17, %v1774_v0  ;;  %v4858_v28 = vpop.eup %4857  ;;  %v1775_v29 = vadd.f32 -1.4531521, %v1771_v60 }
 0xea2   :  { %v4860_v30 = vpop.eup %4859  ;;  %v1772_v46 = vmul.f32 1.0614054, %v4858_v28 }
 0xea3   :  { %v1782_v31 = vadd.f32 1.4214138, %v1778_v26  ;;  %v1779_v62 = vmul.f32 %v4856_v22, %v1775_v29  ;;  %v1773_v13 = vmul.f32 1.0614054, %v4860_v30  ;;  %v4862_v2 = vpop.eup %4861 }
 0xea4   :  { %v1776_v3 = vadd.f32 -1.4531521, %v1772_v46  ;;  %v4864_v18 = vpop.eup %4863 }
 0xea5   :  { %v1786_v59 = vmul.f32 %v4854_v17, %v1782_v31  ;;  %v1783_v37 = vadd.f32 1.4214138, %v1779_v62  ;;  %v1777_v41 = vadd.f32 -1.4531521, %v1773_v13  ;;  %v4866_v60 = vpop.eup %4865 }
 0xea6   :  { %v1780_v44 = vmul.f32 %v4858_v28, %v1776_v3  ;;  %v4868_v26 = vpop.eup %4867 }
 0xea7   :  { %v1790_v9 = vadd.f32 -0.28449672, %v1786_v59  ;;  %v1787_v45 = vmul.f32 %v4856_v22, %v1783_v37  ;;  %v1781_v47 = vmul.f32 %v4860_v30, %v1777_v41  ;;  %v1736_v37 = vmul.f32 0.5, %v5509_v43 }
 0xea8   :  { %v1784_v51 = vadd.f32 1.4214138, %v1780_v44  ;;  %v1737_v44 = vmul.f32 0.5, %v5516_v48  ;;  %v1882_v43 = vsub.s32 5, %v5262_v34 }
 0xea9   :  { %v1794_v49 = vmul.f32 %v4854_v17, %v1790_v9  ;;  %v1791_v53 = vadd.f32 -0.28449672, %v1787_v45  ;;  %v1785_v54 = vadd.f32 1.4214138, %v1781_v47 }
 0xeaa   :  { %v1788_v56 = vmul.f32 %v4858_v28, %v1784_v51  ;;  %v1883_v48 = vrot.slane %v4927_v39, %v1882_v43  ;;  %v4759_v39 = vld [vmem:[#allocation5 + $0x168] sm:$0xff]  }
 0xeab   :  { %v1798_v55 = vadd.f32 0.2548296, %v1794_v49  ;;  %v1795_v57 = vmul.f32 %v4856_v22, %v1791_v53  ;;  %v1789_v58 = vmul.f32 %v4860_v30, %v1785_v54 }
 0xeac   :  { %v1792_v1 = vadd.f32 -0.28449672, %v1788_v56 }
 0xead   :  { %v1802_v61 = vmul.f32 %v4854_v17, %v1798_v55  ;;  %v1799_v6 = vadd.f32 0.2548296, %v1795_v57  ;;  %v1793_v10 = vadd.f32 -0.28449672, %v1789_v58 }
 0xeae   :  { %v1796_v12 = vmul.f32 %v4858_v28, %v1792_v1 }
 0xeaf   :  { %v1822_v11 = vmul.f32 %v4862_v2, %v1802_v61  ;;  %v1803_v15 = vmul.f32 %v4856_v22, %v1799_v6  ;;  %v1797_v16 = vmul.f32 %v4860_v30, %v1793_v10  ;;  %v4741_v10 = vld [vmem:[#allocation5 + $0xf8] sm:$0xff]  }
 0xeb0   :  { %v1800_v20 = vadd.f32 0.2548296, %v1796_v12  ;;  %4445 = vmatpush3.bf16.msra.mxu1 %v4741_v10 }
 0xeb1   :  { %v1826_v19 = vsub.f32 1.0, %v1822_v11  ;;  %v1823_v21 = vmul.f32 %v4864_v18, %v1803_v15  ;;  %v1801_v0 = vadd.f32 0.2548296, %v1797_v16  ;;  %v4742_v11 = vld [vmem:[#allocation5 + $0x138] sm:$0xff]   ;;  %4446 = vmatprep.subr.bf16.mxu1 %v5135_v4 }
 0xeb2   :  { %v1804_v24 = vmul.f32 %v4858_v28, %v1800_v20 }
 0xeb3   :  { %v1827_v36 = vsub.f32 1.0, %v1823_v21  ;;  %v1805_v25 = vmul.f32 %v4860_v30, %v1801_v0  ;;  %v1830_v29 = vsub.f32 0.0, %v1826_v19  ;;  %v4743_v21 = vld [vmem:[#allocation5 + $0xf0] sm:$0xff]  }
 0xeb4   :  { %v1824_v17 = vmul.f32 %v4866_v60, %v1804_v24  ;;  %v4744_v0 = vld [vmem:[#allocation5 + $0x130] sm:$0xff]   ;;  %4447 = vmatpush3.bf16.msra.mxu1 %v4743_v21  ;;  %v4745_v24 = vld [vmem:[#allocation5 + $0xe8] sm:$0xff]  }
 0xeb5   :  { %v1831_v31 = vsub.f32 0.0, %v1827_v36  ;;  %v1825_v46 = vmul.f32 %v4868_v26, %v1805_v25  ;;  %v1834_v13 = vsel %vm1742_vm6, %v1826_v19, %v1830_v29  ;;  %4448 = vmatprep.subr.bf16.mxu1 %v5135_v4  ;;  %v4746_v60 = vld [vmem:[#allocation5 + $0x128] sm:$0xff]   ;;  %v4748_v25 = vld [vmem:[#allocation5 + $0x120] sm:$0xff]   ;;  %v4749_v26 = vld [vmem:[#allocation5 + $0xd8] sm:$0xff]  }
 0xeb6   :  { %v1828_v33 = vsub.f32 1.0, %v1824_v17  ;;  %v1838_v30 = vadd.f32 1.0, %v1834_v13  ;;  %v4750_v29 = vld [vmem:[#allocation5 + $0x118] sm:$0xff]   ;;  %v4751_v17 = vld [vmem:[#allocation5 + $0xd0] sm:$0xff]  }
 0xeb7   :  { %v1835_v62 = vsel %vm1743_vm7, %v1827_v36, %v1831_v31  ;;  %v1829_v22 = vsub.f32 1.0, %v1825_v46  ;;  %v4747_v36 = vld [vmem:[#allocation5 + $0xe0] sm:$0xff]   ;;  %v4752_v31 = vld [vmem:[#allocation5 + $0x110] sm:$0xff]   ;;  %v4753_v46 = vld [vmem:[#allocation5 + $0xc8] sm:$0xff]  }
 0xeb8   :  { %v1832_v14 = vsub.f32 0.0, %v1828_v33  ;;  %v1839_v3 = vadd.f32 1.0, %v1835_v62  ;;  %v1842_v53 = vmul.f32 %v1838_v30, %v1734_v38  ;;  %4449 = vmatpush3.bf16.msra.mxu1 %v4745_v24  ;;  %v4755_v62 = vld [vmem:[#allocation5 + $0xc0] sm:$0xff]  }
 0xeb9   :  { %v1833_v59 = vsub.f32 0.0, %v1829_v22  ;;  %4450 = vmatprep.subr.bf16.mxu1 %v5135_v4 }
 0xeba   :  { %v1836_v28 = vsel %vm1744_vm8, %v1828_v33, %v1832_v14  ;;  %v1843_v49 = vmul.f32 %v1839_v3, %v1735_v42  ;;  %v4754_v33 = vld [vmem:[#allocation5 + $0x108] sm:$0xff]  }
 0xebb   :  { %v1840_v41 = vadd.f32 1.0, %v1836_v28  ;;  %v1837_v9 = vsel %vm1745_vm9, %v1829_v22, %v1833_v59  ;;  %v4756_v22 = vld [vmem:[#allocation5 + $0x100] sm:$0xff]  }
 0xebc   :  { %v1841_v45 = vadd.f32 1.0, %v1837_v9  ;;  %4451 = vmatpush3.bf16.msra.mxu1 %v4747_v36 }
 0xebd   :  { %v1844_v47 = vmul.f32 %v1840_v41, %v1736_v37  ;;  %4452 = vmatprep.subr.bf16.mxu1 %v5135_v4  ;;  %v5580_v37 = vld [vmem:[#allocation10 + $0x8] sm:$0xff] }
 0xebe   :  { %v1845_v51 = vmul.f32 %v1841_v45, %v1737_v44  ;;  %v2050_v42 = vrot.slane %v5580_v37, %v5265_v35 }
 0xebf   :  { %v1846_v54 = vpack.c.bf16 %v1844_v47, %v1842_v53  ;;  %v2056_v47 = vrot.slane %v5580_v37, %v5273_v40 }
 0xec0   :  { %v1847_v50 = vpack.c.bf16 %v1845_v51, %v1843_v49  ;;  %4453 = vmatpush3.bf16.msra.mxu1 %v4749_v26 }
 0xec1   :  { %4454 = vmatprep.subr.bf16.mxu1 %v5135_v4 }
 0xec2   :  { %2012 = vmatprep.mubr.bf16.mxu0 %v1847_v50  ;;  %v4757_v50 = vld [vmem:[#allocation5 + $0x178] sm:$0xff]  }
 0xec3   :  { %2013 = vmatmul.mubr.bf16.vlgmr.msra.gmra.mxu0 %v1846_v54 }
 0xec4   :  { %4480 = vmatprep.mubr.msk.bf16.mxu0 %vm5136_vm0, %v5135_v4  ;;  %4465 = vmatpush3.bf16.msra.mxu0 %v4742_v11 }
 0xec5   :  { %4466 = vmatprep.subr.bf16.mxu0 %v5135_v4  ;;  %4455 = vmatpush3.bf16.msra.mxu1 %v4751_v17 }
 0xec6   :  { %4456 = vmatprep.subr.bf16.mxu1 %v5135_v4 }
 0xec8   :  { %4467 = vmatpush3.bf16.msra.mxu0 %v4744_v0 }
 0xec9   :  { %4468 = vmatprep.subr.bf16.mxu0 %v5135_v4  ;;  %4457 = vmatpush3.bf16.msra.mxu1 %v4753_v46  ;;  %v2479_v46 = vld [vmem:[#allocation8 + $0x20] sm:$0xff] }
 0xeca   :  { %4458 = vmatprep.subr.bf16.mxu1 %v5135_v4 }
 0xecc   :  { %4469 = vmatpush3.bf16.msra.mxu0 %v4746_v60 }
 0xecd   :  { %4470 = vmatprep.subr.bf16.mxu0 %v5135_v4  ;;  %4459 = vmatpush3.bf16.msra.mxu1 %v4755_v62 }
 0xece   :  { %4484 = vmatprep.subr.bf16.mxu1 %v5135_v4 }
 0xed0   :  { %4471 = vmatpush3.bf16.msra.mxu0 %v4748_v25 }
 0xed1   :  { %4472 = vmatprep.subr.bf16.mxu0 %v5135_v4 }
 0xed4   :  { %4473 = vmatpush3.bf16.msra.mxu0 %v4750_v29 }
 0xed5   :  { %4474 = vmatprep.subr.bf16.mxu0 %v5135_v4 }
 0xed8   :  { %4475 = vmatpush3.bf16.msra.mxu0 %v4752_v31 }
 0xed9   :  { %4476 = vmatprep.subr.bf16.mxu0 %v5135_v4 }
 0xedc   :  { %4477 = vmatpush3.bf16.msra.mxu0 %v4754_v33 }
 0xedd   :  { %4478 = vmatprep.subr.bf16.mxu0 %v5135_v4 }
 0xee0   :  { %4479 = vmatpush3.bf16.msra.mxu0 %v4756_v22 }
 0xee1   :  { %4504 = vmatprep.subr.bf16.mxu0 %v5135_v4 }
 0xf83   :  { %v4172_v52 = vpop.f32.mrf.mxu0 }
 0xf85   :  { %v4173_v55 = vpop.f32.mrf.mxu0 }
 0xf86   :  { %v4174_v7 = vadd.f32 %v4173_v55, %v4172_v52  ;;  %v4758_v52 = vld [vmem:[#allocation5 + $0x170] sm:$0xff]   ;;  %v4761_v55 = vld [vmem:[#allocation5 + $0x158] sm:$0xff]  }
 0xf87   :  { %v4175_v56 = vpop.f32.mrf.mxu0 }
 0xf88   :  { %v2015_v57 = vadd.f32 %v4174_v7, %v1883_v48  ;;  %v4762_v7 = vld [vmem:[#allocation5 + $0x150] sm:$0xff]  }
 0xf89   :  { %v4176_v58 = vpop.f32.mrf.mxu0 }
 0xf8a   :  { %v4177_v61 = vadd.f32 %v4176_v58, %v4175_v56  ;;  %v5555_v1 = vadd.f32 %v2015_v57, %v5474_v27  ;;  %v4763_v56 = vld [vmem:[#allocation5 + $0x148] sm:$0xff]   ;;  %v4764_v57 = vld [vmem:[#allocation5 + $0x140] sm:$0xff]  }
 0xf8c   :  { %v2018_v2 = vadd.f32 %v4177_v61, %v1883_v48  ;;  %2025 = vadd.xlane.f32.xlu1 %v5555_v1  ;;  %v4760_v48 = vld [vmem:[#allocation5 + $0x160] sm:$0xff]  }
 0xf8e   :  { %v5559_v6 = vadd.f32 %v2018_v2, %v5477_v32 }
 0xf90   :  { %2027 = vadd.xlane.f32.xlu0 %v5559_v6 }
0x1015   :  { %v2026_v12 = vpop.xlane.xlu1 %2025 }
0x1016   :  { %v2029_v15 = vmul.f32 0.0078125, %v2026_v12 }
0x1018   :  { %v2031_v27 = vsub.f32 %v5555_v1, %v2029_v15 }
0x1019   :  { %v2028_v16 = vpop.xlane.xlu0 %2027 }
0x101a   :  { %v2030_v18 = vmul.f32 0.0078125, %v2028_v16  ;;  %v2033_v19 = vmul.f32 %v2031_v27, %v2031_v27 }
0x101c   :  { %v2032_v32 = vsub.f32 %v5559_v6, %v2030_v18  ;;  %2035 = vadd.xlane.f32.xlu1 %v2033_v19 }
0x101e   :  { %v2034_v20 = vmul.f32 %v2032_v32, %v2032_v32 }
0x1020   :  { %2037 = vadd.xlane.f32.xlu0 %v2034_v20 }
0x10a5   :  { %v2036_v13 = vpop.xlane.xlu1 %2035 }
0x10a6   :  { %v2039_v14 = vmul.f32 0.0078125, %v2036_v13 }
0x10a8   :  { %v2041_v59 = vadd.f32 1e-05, %v2039_v14 }
0x10a9   :  { %v2038_v3 = vpop.xlane.xlu0 %2037 }
0x10aa   :  { %4869 = vrsqrt.f32 %v2041_v59  ;;  %v2040_v28 = vmul.f32 0.0078125, %v2038_v3 }
0x10ac   :  { %v2042_v30 = vadd.f32 1e-05, %v2040_v28 }
0x10ae   :  { %4871 = vrsqrt.f32 %v2042_v30 }
0x10b7   :  { %v4870_v41 = vpop.eup %4869 }
0x10b8   :  { %v2045_v9 = vmul.f32 %v4870_v41, %v2031_v27 }
0x10ba   :  { %v2051_v38 = vmul.f32 %v2050_v42, %v2045_v9 }
0x10bb   :  { %v4872_v44 = vpop.eup %4871 }
0x10bc   :  { %v2046_v45 = vmul.f32 %v4872_v44, %v2032_v32  ;;  %v2057_v51 = vadd.f32 %v2056_v47, %v2051_v38 }
0x10be   :  { %v2052_v49 = vmul.f32 %v2050_v42, %v2046_v45 }
0x10c0   :  { %v2058_v53 = vadd.f32 %v2056_v47, %v2052_v49 }
0x10c2   :  { %v2059_v54 = vpack.c.bf16 %v2058_v53, %v2057_v51 }
0x10c4   :  { %4461 = vmatmul.mubr.bf16.vlgmr.msra.gmra.mxu1 %v2059_v54  ;;  %4481 = vmatmul.mubr.bf16.vlgmr.msra.gmra.mxu0 %v2059_v54 }
0x10c5   :  { %4485 = vmatpush3.bf16.msra.mxu1 %v4757_v50  ;;  %4500 = vmatprep.mubr.msk.bf16.mxu1 %vm5136_vm0, %v5135_v4 }
0x10c6   :  { %4486 = vmatprep.subr.bf16.mxu1 %v5135_v4  ;;  %4506 = vmatprep.mubr.msk.bf16.mxu0 %vm5136_vm0, %v5135_v4 }
0x10c9   :  { %4487 = vmatpush3.bf16.msra.mxu1 %v4758_v52 }
0x10ca   :  { %4488 = vmatprep.subr.bf16.mxu1 %v5135_v4 }
0x10cd   :  { %4489 = vmatpush3.bf16.msra.mxu1 %v4759_v39 }
0x10ce   :  { %4490 = vmatprep.subr.bf16.mxu1 %v5135_v4 }
0x10d1   :  { %4491 = vmatpush3.bf16.msra.mxu1 %v4760_v48 }
0x10d2   :  { %4492 = vmatprep.subr.bf16.mxu1 %v5135_v4 }
0x10d5   :  { %4493 = vmatpush3.bf16.msra.mxu1 %v4761_v55 }
0x10d6   :  { %4494 = vmatprep.subr.bf16.mxu1 %v5135_v4 }
0x10d9   :  { %4495 = vmatpush3.bf16.msra.mxu1 %v4762_v7 }
0x10da   :  { %4496 = vmatprep.subr.bf16.mxu1 %v5135_v4 }
0x10dd   :  { %4497 = vmatpush3.bf16.msra.mxu1 %v4763_v56 }
0x10de   :  { %4498 = vmatprep.subr.bf16.mxu1 %v5135_v4 }
0x10e1   :  { %4499 = vmatpush3.bf16.msra.mxu1 %v4764_v57 }
0x10e2   :  { %4510 = vmatprep.subr.bf16.mxu1 %v5135_v4 }
0x10e4   :  { %4501 = vmatmul.mubr.bf16.vlgmr.msra.gmra.mxu1 %v2059_v54 }
0x10e5   :  { %4512 = vmatprep.mubr.msk.bf16.mxu1 %vm5136_vm0, %v5135_v4 }
0x1184   :  { %v2159_v58 = vpop.f32.mrf.mxu1  ;;  %v2265_v61 = vpop.f32.mrf.mxu0 }
0x1185   :  { %v5600_v2 = vpack.c.bf16 %v2265_v61, %v2265_v61  ;;  %v5609_v20 = vpack.c.bf16 %v2159_v58, %v2159_v58 }
0x1186   :  { %v4462_v10 = vpop.f32.mrf.mxu1  ;;  %v4482_v11 = vpop.f32.mrf.mxu0 }
0x1187   :  { %v2388_v12 = vsel %vm502_vm1, %v5600_v2, 0 }
0x1188   :  { %v2162_v15 = vpop.f32.mrf.mxu1  ;;  %v2268_v27 = vpop.f32.mrf.mxu0  ;;  %4505 = vmatpush3.bf16.xpose.msra.mxu0 %v2388_v12 }
0x1189   :  { %v5604_v16 = vpack.c.bf16 %v2268_v27, %v2268_v27  ;;  %4516 = vmatprep.subr.bf16.mxu0 %v5135_v4  ;;  %v5616_v21 = vpack.c.bf16 %v2162_v15, %v2162_v15 }
0x118a   :  { %v4463_v18 = vpop.f32.mrf.mxu1  ;;  %v4483_v19 = vpop.f32.mrf.mxu0 }
0x118b   :  { %v2434_v32 = vsel %vm502_vm1, %v5604_v16, 0 }
0x118c   :  { %4511 = vmatpush3.bf16.xpose.msra.mxu1 %v2434_v32 }
0x118d   :  { %4522 = vmatprep.subr.bf16.mxu1 %v5135_v4 }
0x118f   :  { %4507 = vmatmul.mubr.msk.bf16.vlgmr.msra.gmra.mxu0 %vm502_vm1, %v5609_v20 }
0x1190   :  { %4518 = vmatprep.mubr.msk.bf16.mxu0 %vm5136_vm0, %v5135_v4 }
0x1193   :  { %4513 = vmatmul.mubr.msk.bf16.vlgmr.msra.gmra.mxu1 %vm502_vm1, %v5616_v21 }
0x1194   :  { %4524 = vmatprep.mubr.msk.bf16.mxu1 %vm5136_vm0, %v5135_v4 }
0x11a4   :  { %v2371_v0 = vpop.f32.mrf.mxu1 }
0x11a5   :  { %v5622_v24 = vpack.c.bf16 %v2371_v0, %v2371_v0 }
0x11a6   :  { %v4502_v60 = vpop.f32.mrf.mxu1 }
0x11a7   :  { %v2510_v36 = vsel %vm628_vm2, %v5622_v24, 0 }
0x11a8   :  { %v2374_v25 = vpop.f32.mrf.mxu1  ;;  %4517 = vmatpush3.bf16.msra.mxu0 %v2510_v36 }
0x11a9   :  { %v5626_v26 = vpack.c.bf16 %v2374_v25, %v2374_v25  ;;  %4528 = vmatprep.subr.bf16.mxu0 %v5135_v4 }
0x11aa   :  { %v4503_v29 = vpop.f32.mrf.mxu1 }
0x11ab   :  { %v2556_v17 = vsel %vm628_vm2, %v5626_v26, 0 }
0x11ac   :  { %4523 = vmatpush3.bf16.msra.mxu1 %v2556_v17 }
0x11ad   :  { %4534 = vmatprep.subr.bf16.mxu1 %v5135_v4 }
0x124f   :  { %v2424_v31 = vpop.f32.mrf.mxu0 }
0x1250   :  { %v2476_v33 = vmul.f32 0.17677669, %v2424_v31 }
0x1251   :  { %v4508_v62 = vpop.f32.mrf.mxu0 }
0x1252   :  { %v2480_v22 = vadd.f32 %v2479_v46, %v2476_v33 }
0x1253   :  { %v2427_v13 = vpop.f32.mrf.mxu0  ;;  %v2470_v14 = vpop.f32.mrf.mxu1 }
0x1254   :  { %v2477_v59 = vmul.f32 0.17677669, %v2470_v14  ;;  %v2482_v3 = vsel %vm600_vm3, %v2480_v22, -inf }
0x1255   :  { %2483 = vmax.xlane.f32.xlu1 %v2482_v3  ;;  %v4509_v28 = vpop.f32.mrf.mxu0  ;;  %v4514_v30 = vpop.f32.mrf.mxu1 }
0x1256   :  { %v2481_v41 = vadd.f32 %v2479_v46, %v2477_v59  ;;  %v2705_v46 = vld [vmem:[#allocation8 + $0x28] sm:$0xff] }
0x1257   :  { %v2473_v9 = vpop.f32.mrf.mxu1 }
0x1258   :  { %v2485_v42 = vsel %vm600_vm3, %v2481_v41, -inf }
0x1259   :  { %2486 = vmax.xlane.f32.xlu0 %v2485_v42  ;;  %v4515_v44 = vpop.f32.mrf.mxu1 }
0x1266   :  { %2602 = vrot.lane.b32.xlu1 %v5600_v2, %s5137_s6 }
0x12de   :  { %v2484_v45 = vpop.xlane.xlu1 %2483 }
0x12df   :  { %v2488_v38 = vsub.f32 %v2480_v22, %v2484_v45 }
0x12e1   :  { %v2490_v47 = vmul.f32 1.442695, %v2488_v38 }
0x12e2   :  { %v2487_v49 = vpop.xlane.xlu0 %2486  ;;  %v2603_v48 = vpop.permute.xlu1 %2602 }
0x12e3   :  { %4873 = vpow2.f32 %v2490_v47  ;;  %v2489_v51 = vsub.f32 %v2481_v41, %v2487_v49  ;;  %v2608_v10 = vsel %vm502_vm1, %v2603_v48, 0 }
0x12e5   :  { %v2492_v53 = vmul.f32 1.442695, %v2489_v51 }
0x12e7   :  { %4875 = vpow2.f32 %v2492_v53 }
0x12f0   :  { %v4874_v50 = vpop.eup %4873 }
0x12f1   :  { %v2494_v54 = vsel %vm600_vm3, %v4874_v50, 0.0 }
0x12f2   :  { %2495 = vadd.xlane.f32.xlu1 %v2494_v54 }
0x12f4   :  { %v4876_v52 = vpop.eup %4875 }
0x12f5   :  { %v2497_v39 = vsel %vm600_vm3, %v4876_v52, 0.0 }
0x12f6   :  { %2498 = vadd.xlane.f32.xlu0 %v2497_v39 }
0x1303   :  { %2599 = vrot.lane.b32.xlu1 %v5609_v20, %s5137_s6 }
0x1307   :  { %2651 = vrot.lane.b32.xlu1 %v5616_v21, %s5137_s6 }
0x130c   :  { %2654 = vrot.lane.b32.xlu0 %v5604_v16, %s5137_s6 }
0x137b   :  { %v2496_v55 = vpop.xlane.xlu1 %2495 }
0x137c   :  { %4877 = vrcp.f32 %v2496_v55 }
0x137f   :  { %v2499_v7 = vpop.xlane.xlu0 %2498  ;;  %v2600_v18 = vpop.permute.xlu1 %2599 }
0x1380   :  { %4879 = vrcp.f32 %v2499_v7 }
0x1383   :  { %v2655_v12 = vpop.permute.xlu0 %2654  ;;  %v2652_v19 = vpop.permute.xlu1 %2651 }
0x1384   :  { %v2660_v27 = vsel %vm502_vm1, %v2655_v12, 0 }
0x1389   :  { %v4878_v56 = vpop.eup %4877 }
0x138a   :  { %v2502_v57 = vmul.f32 %v4878_v56, %v4874_v50 }
0x138c   :  { %v2504_v58 = vpack.c.bf16 %v2502_v57, %v2502_v57 }
0x138d   :  { %v4880_v61 = vpop.eup %4879 }
0x138e   :  { %4519 = vmatmul.mubr.msk.bf16.vlgmr.msra.gmra.mxu0 %vm600_vm3, %v2504_v58  ;;  %v2503_v11 = vmul.f32 %v4880_v61, %v4876_v52 }
0x138f   :  { %4529 = vmatpush3.bf16.xpose.msra.mxu0 %v2608_v10  ;;  %4530 = vmatprep.mubr.msk.bf16.mxu0 %vm5136_vm0, %v5135_v4 }
0x1390   :  { %v2505_v15 = vpack.c.bf16 %v2503_v11, %v2503_v11  ;;  %4540 = vmatprep.subr.bf16.mxu0 %v5135_v4 }
0x1392   :  { %4525 = vmatmul.mubr.msk.bf16.vlgmr.msra.gmra.mxu1 %vm600_vm3, %v2505_v15 }
0x1393   :  { %4535 = vmatpush3.bf16.xpose.msra.mxu1 %v2660_v27  ;;  %4536 = vmatprep.mubr.msk.bf16.mxu1 %vm5136_vm0, %v5135_v4 }
0x1394   :  { %4546 = vmatprep.subr.bf16.mxu1 %v5135_v4 }
0x1396   :  { %4531 = vmatmul.mubr.msk.bf16.vlgmr.msra.gmra.mxu0 %vm502_vm1, %v2600_v18 }
0x1397   :  { %4542 = vmatprep.mubr.msk.bf16.mxu0 %vm5136_vm0, %v5135_v4 }
0x139a   :  { %4537 = vmatmul.mubr.msk.bf16.vlgmr.msra.gmra.mxu1 %vm502_vm1, %v2652_v19 }
0x139b   :  { %4548 = vmatprep.mubr.msk.bf16.mxu1 %vm5136_vm0, %v5135_v4 }
0x144e   :  { %v5660_v32 = vpop.f32.mrf.mxu0 }
0x1450   :  { %v4520_v0 = vpop.f32.mrf.mxu0 }
0x1452   :  { %v2549_v60 = vpop.f32.mrf.mxu0  ;;  %v5662_v36 = vpop.f32.mrf.mxu1 }
0x1454   :  { %v4521_v25 = vpop.f32.mrf.mxu0  ;;  %v4526_v29 = vpop.f32.mrf.mxu1 }
0x1456   :  { %v2595_v17 = vpop.f32.mrf.mxu1  ;;  %v2644_v31 = vpop.f32.mrf.mxu0 }
0x1457   :  { %v2702_v33 = vmul.f32 0.17677669, %v2644_v31 }
0x1458   :  { %v4527_v62 = vpop.f32.mrf.mxu1  ;;  %v4532_v22 = vpop.f32.mrf.mxu0 }
0x1459   :  { %v2706_v13 = vadd.f32 %v2705_v46, %v2702_v33 }
0x145a   :  { %v2647_v14 = vpop.f32.mrf.mxu0  ;;  %v2696_v59 = vpop.f32.mrf.mxu1 }
0x145b   :  { %v2703_v3 = vmul.f32 0.17677669, %v2696_v59  ;;  %v2708_v28 = vsel %vm600_vm3, %v2706_v13, -inf }
0x145c   :  { %2709 = vmax.xlane.f32.xlu1 %v2708_v28  ;;  %v4533_v30 = vpop.f32.mrf.mxu0  ;;  %v4538_v41 = vpop.f32.mrf.mxu1  ;;  %v2933_v28 = vld [vmem:[#allocation8 + $0x30] sm:$0xff] }
0x145d   :  { %v2707_v9 = vadd.f32 %v2705_v46, %v2703_v3 }
0x145e   :  { %v2699_v42 = vpop.f32.mrf.mxu1 }
0x145f   :  { %v2711_v44 = vsel %vm600_vm3, %v2707_v9, -inf }
0x1460   :  { %2712 = vmax.xlane.f32.xlu0 %v2711_v44  ;;  %v4539_v45 = vpop.f32.mrf.mxu1 }
0x146d   :  { %2733 = vrot.lane.b32.xlu1 %v5622_v24, %s5137_s6 }
0x1471   :  { %2832 = vrot.lane.b32.xlu1 %v5600_v2, %s5122_s30 }
0x1475   :  { %2882 = vrot.lane.b32.xlu1 %v5604_v16, %s5122_s30 }
0x1479   :  { %2830 = vrot.lane.b32.xlu1 %v5609_v20, %s5122_s30 }
0x14e5   :  { %v2710_v38 = vpop.xlane.xlu1 %2709 }
0x14e6   :  { %v2714_v47 = vsub.f32 %v2706_v13, %v2710_v38 }
0x14e8   :  { %v2716_v49 = vmul.f32 1.442695, %v2714_v47 }
0x14e9   :  { %v2734_v51 = vpop.permute.xlu1 %2733  ;;  %v2713_v53 = vpop.xlane.xlu0 %2712 }
0x14ea   :  { %4881 = vpow2.f32 %v2716_v49  ;;  %v2739_v50 = vsel %vm628_vm2, %v2734_v51, 0  ;;  %v2715_v54 = vsub.f32 %v2707_v9, %v2713_v53 }
0x14eb   :  { %4541 = vmatpush3.bf16.msra.mxu0 %v2739_v50 }
0x14ec   :  { %v2718_v52 = vmul.f32 1.442695, %v2715_v54  ;;  %4552 = vmatprep.subr.bf16.mxu0 %v5135_v4 }
0x14ed   :  { %v2833_v11 = vpop.permute.xlu1 %2832 }
0x14ee   :  { %4883 = vpow2.f32 %v2718_v52  ;;  %v2838_v18 = vsel %vm502_vm1, %v2833_v11, 0 }
0x14f1   :  { %v2883_v0 = vpop.permute.xlu1 %2882 }
0x14f2   :  { %v2888_v25 = vsel %vm502_vm1, %v2883_v0, 0 }
0x14f5   :  { %v2831_v29 = vpop.permute.xlu1 %2830 }
0x14f7   :  { %v4882_v39 = vpop.eup %4881 }
0x14f8   :  { %v2720_v48 = vsel %vm600_vm3, %v4882_v39, 0.0 }
0x14f9   :  { %2721 = vadd.xlane.f32.xlu0 %v2720_v48 }
0x14fb   :  { %v4884_v55 = vpop.eup %4883 }
0x14fc   :  { %v2723_v7 = vsel %vm600_vm3, %v4884_v55, 0.0 }
0x14fd   :  { %2724 = vadd.xlane.f32.xlu0 %v2723_v7 }
0x1513   :  { %2782 = vrot.lane.b32.xlu0 %v5626_v26, %s5137_s6 }
0x1517   :  { %2880 = vrot.lane.b32.xlu0 %v5616_v21, %s5122_s30 }
0x1582   :  { %v2722_v56 = vpop.xlane.xlu0 %2721 }
0x1583   :  { %4885 = vrcp.f32 %v2722_v56 }
0x1586   :  { %v2725_v57 = vpop.xlane.xlu0 %2724 }
0x1587   :  { %4887 = vrcp.f32 %v2725_v57 }
0x158a   :  { %v2783_v58 = vpop.permute.xlu0 %2782 }
0x158b   :  { %v2788_v61 = vsel %vm628_vm2, %v2783_v58, 0 }
0x158c   :  { %4547 = vmatpush3.bf16.msra.mxu1 %v2788_v61 }
0x158d   :  { %4558 = vmatprep.subr.bf16.mxu1 %v5135_v4 }
0x158e   :  { %v2881_v17 = vpop.permute.xlu0 %2880 }
0x1590   :  { %v4886_v10 = vpop.eup %4885 }
0x1591   :  { %v2728_v12 = vmul.f32 %v4886_v10, %v4882_v39 }
0x1593   :  { %v2730_v15 = vpack.c.bf16 %v2728_v12, %v2728_v12 }
0x1594   :  { %v4888_v27 = vpop.eup %4887 }
0x1595   :  { %4543 = vmatmul.mubr.msk.bf16.vlgmr.msra.gmra.mxu0 %vm600_vm3, %v2730_v15  ;;  %v2729_v19 = vmul.f32 %v4888_v27, %v4884_v55 }
0x1596   :  { %4553 = vmatpush3.bf16.xpose.msra.mxu0 %v2838_v18  ;;  %4554 = vmatprep.mubr.msk.bf16.mxu0 %vm5136_vm0, %v5135_v4 }
0x1597   :  { %v2731_v60 = vpack.c.bf16 %v2729_v19, %v2729_v19  ;;  %4564 = vmatprep.subr.bf16.mxu0 %v5135_v4 }
0x1599   :  { %4549 = vmatmul.mubr.msk.bf16.vlgmr.msra.gmra.mxu1 %vm600_vm3, %v2731_v60 }
0x159a   :  { %4559 = vmatpush3.bf16.xpose.msra.mxu1 %v2888_v25  ;;  %4560 = vmatprep.mubr.msk.bf16.mxu1 %vm5136_vm0, %v5135_v4 }
0x159b   :  { %4570 = vmatprep.subr.bf16.mxu1 %v5135_v4 }
0x159d   :  { %4555 = vmatmul.mubr.msk.bf16.vlgmr.msra.gmra.mxu0 %vm502_vm1, %v2831_v29 }
0x159e   :  { %4566 = vmatprep.mubr.msk.bf16.mxu0 %vm5136_vm0, %v5135_v4 }
0x15a1   :  { %4561 = vmatmul.mubr.msk.bf16.vlgmr.msra.gmra.mxu1 %vm502_vm1, %v2881_v17 }
0x15a2   :  { %4572 = vmatprep.mubr.msk.bf16.mxu1 %vm5136_vm0, %v5135_v4 }
0x1655   :  { %v5700_v31 = vpop.f32.mrf.mxu0 }
0x1657   :  { %v4544_v46 = vpop.f32.mrf.mxu0 }
0x1659   :  { %v2778_v33 = vpop.f32.mrf.mxu0  ;;  %v5702_v62 = vpop.f32.mrf.mxu1 }
0x165a   :  { %v4654_v22 = vpack.i.bf16 %v5702_v62, %v5700_v31 }
0x165b   :  { %v4545_v13 = vpop.f32.mrf.mxu0  ;;  %v4550_v14 = vpop.f32.mrf.mxu1 }
0x165d   :  { %v2827_v59 = vpop.f32.mrf.mxu1  ;;  %v2874_v3 = vpop.f32.mrf.mxu0 }
0x165e   :  { %v2930_v30 = vmul.f32 0.17677669, %v2874_v3 }
0x165f   :  { %v4551_v41 = vpop.f32.mrf.mxu1  ;;  %v4556_v9 = vpop.f32.mrf.mxu0 }
0x1660   :  { %v2934_v42 = vadd.f32 %v2933_v28, %v2930_v30 }
0x1661   :  { %v2877_v44 = vpop.f32.mrf.mxu0  ;;  %v2924_v45 = vpop.f32.mrf.mxu1 }
0x1662   :  { %v2931_v38 = vmul.f32 0.17677669, %v2924_v45  ;;  %v2936_v47 = vsel %vm600_vm3, %v2934_v42, -inf  ;;  %v3159_v45 = vld [vmem:[#allocation8 + $0x38] sm:$0xff] }
0x1663   :  { %2937 = vmax.xlane.f32.xlu1 %v2936_v47  ;;  %v4557_v49 = vpop.f32.mrf.mxu0  ;;  %v4562_v51 = vpop.f32.mrf.mxu1 }
0x1664   :  { %v2935_v53 = vadd.f32 %v2933_v28, %v2931_v38 }
0x1665   :  { %v2927_v50 = vpop.f32.mrf.mxu1 }
0x1666   :  { %v2939_v54 = vsel %vm600_vm3, %v2935_v53, -inf }
0x1667   :  { %2940 = vmax.xlane.f32.xlu0 %v2939_v54  ;;  %v4563_v52 = vpop.f32.mrf.mxu1 }
0x1674   :  { %2960 = vrot.lane.b32.xlu1 %v5622_v24, %s5122_s30 }
0x1678   :  { %3058 = vrot.lane.b32.xlu1 %v5600_v2, %s5132_s19 }
0x167c   :  { %3108 = vrot.lane.b32.xlu1 %v5604_v16, %s5132_s19 }
0x1680   :  { %3056 = vrot.lane.b32.xlu1 %v5609_v20, %s5132_s19 }
0x16ec   :  { %v2938_v39 = vpop.xlane.xlu1 %2937 }
0x16ed   :  { %v2942_v48 = vsub.f32 %v2934_v42, %v2938_v39 }
0x16ef   :  { %v2944_v55 = vmul.f32 1.442695, %v2942_v48 }
0x16f0   :  { %v2961_v7 = vpop.permute.xlu1 %2960  ;;  %v2941_v56 = vpop.xlane.xlu0 %2940 }
0x16f1   :  { %4889 = vpow2.f32 %v2944_v55  ;;  %v2966_v57 = vsel %vm628_vm2, %v2961_v7, 0  ;;  %v2943_v58 = vsub.f32 %v2935_v53, %v2941_v56 }
0x16f2   :  { %4565 = vmatpush3.bf16.msra.mxu0 %v2966_v57 }
0x16f3   :  { %v2946_v61 = vmul.f32 1.442695, %v2943_v58  ;;  %4576 = vmatprep.subr.bf16.mxu0 %v5135_v4 }
0x16f4   :  { %v3059_v19 = vpop.permute.xlu1 %3058 }
0x16f5   :  { %4891 = vpow2.f32 %v2946_v61  ;;  %v3064_v29 = vsel %vm502_vm1, %v3059_v19, 0 }
0x16f8   :  { %v3109_v17 = vpop.permute.xlu1 %3108 }
0x16f9   :  { %v3114_v33 = vsel %vm502_vm1, %v3109_v17, 0 }
0x16fc   :  { %v3057_v13 = vpop.permute.xlu1 %3056 }
0x16fe   :  { %v4890_v2 = vpop.eup %4889 }
0x16ff   :  { %v2948_v16 = vsel %vm600_vm3, %v4890_v2, 0.0 }
0x1700   :  { %2949 = vadd.xlane.f32.xlu0 %v2948_v16 }
0x1702   :  { %v4892_v10 = vpop.eup %4891 }
0x1703   :  { %v2951_v20 = vsel %vm600_vm3, %v4892_v10, 0.0 }
0x1704   :  { %2952 = vadd.xlane.f32.xlu0 %v2951_v20 }
0x171a   :  { %3008 = vrot.lane.b32.xlu0 %v5626_v26, %s5122_s30 }
0x171e   :  { %3106 = vrot.lane.b32.xlu0 %v5616_v21, %s5132_s19 }
0x1789   :  { %v2950_v11 = vpop.xlane.xlu0 %2949 }
0x178a   :  { %4893 = vrcp.f32 %v2950_v11 }
0x178d   :  { %v2953_v12 = vpop.xlane.xlu0 %2952 }
0x178e   :  { %4895 = vrcp.f32 %v2953_v12 }
0x1791   :  { %v3009_v15 = vpop.permute.xlu0 %3008 }
0x1792   :  { %v3014_v27 = vsel %vm628_vm2, %v3009_v15, 0 }
0x1793   :  { %4571 = vmatpush3.bf16.msra.mxu1 %v3014_v27 }
0x1794   :  { %4582 = vmatprep.subr.bf16.mxu1 %v5135_v4 }
0x1795   :  { %v3107_v14 = vpop.permute.xlu0 %3106 }
0x1797   :  { %v4894_v18 = vpop.eup %4893 }
0x1798   :  { %v2956_v0 = vmul.f32 %v4894_v18, %v4890_v2 }
0x179a   :  { %v2958_v60 = vpack.c.bf16 %v2956_v0, %v2956_v0 }
0x179b   :  { %v4896_v25 = vpop.eup %4895 }
0x179c   :  { %4567 = vmatmul.mubr.msk.bf16.vlgmr.msra.gmra.mxu0 %vm600_vm3, %v2958_v60  ;;  %v2957_v21 = vmul.f32 %v4896_v25, %v4892_v10 }
0x179d   :  { %4577 = vmatpush3.bf16.xpose.msra.mxu0 %v3064_v29  ;;  %4578 = vmatprep.mubr.msk.bf16.mxu0 %vm5136_vm0, %v5135_v4 }
0x179e   :  { %v2959_v46 = vpack.c.bf16 %v2957_v21, %v2957_v21  ;;  %4588 = vmatprep.subr.bf16.mxu0 %v5135_v4 }
0x17a0   :  { %4573 = vmatmul.mubr.msk.bf16.vlgmr.msra.gmra.mxu1 %vm600_vm3, %v2959_v46 }
0x17a1   :  { %4583 = vmatpush3.bf16.xpose.msra.mxu1 %v3114_v33  ;;  %4584 = vmatprep.mubr.msk.bf16.mxu1 %vm5136_vm0, %v5135_v4  ;;  %v4766_v33 = vld [vmem:[#allocation7 + $0x70] sm:$0xff]  }
0x17a2   :  { %4594 = vmatprep.subr.bf16.mxu1 %v5135_v4 }
0x17a4   :  { %4579 = vmatmul.mubr.msk.bf16.vlgmr.msra.gmra.mxu0 %vm502_vm1, %v3057_v13  ;;  %v4767_v13 = vld [vmem:[#allocation7 + $0x68] sm:$0xff]  }
0x17a5   :  { %4590 = vmatprep.mubr.msk.bf16.mxu0 %vm5136_vm0, %v5135_v4 }
0x17a8   :  { %4585 = vmatmul.mubr.msk.bf16.vlgmr.msra.gmra.mxu1 %vm502_vm1, %v3107_v14  ;;  %v4768_v14 = vld [vmem:[#allocation7 + $0x60] sm:$0xff]  }
0x17a9   :  { %4596 = vmatprep.mubr.msk.bf16.mxu1 %vm5136_vm0, %v5135_v4 }
0x185c   :  { %v3002_v59 = vpop.f32.mrf.mxu0 }
0x185e   :  { %v4568_v3 = vpop.f32.mrf.mxu0 }
0x185f   :  { %v4770_v3 = vld [vmem:[#allocation7 + $0x50] sm:$0xff]  }
0x1860   :  { %v3005_v28 = vpop.f32.mrf.mxu0  ;;  %v3050_v30 = vpop.f32.mrf.mxu1 }
0x1861   :  { %v4659_v58 = vpack.i.bf16 %v3050_v30, %v3002_v59  ;;  %v4769_v59 = vld [vmem:[#allocation7 + $0x58] sm:$0xff]   ;;  %v4772_v28 = vld [vmem:[#allocation7 + $0x40] sm:$0xff]  }
0x1862   :  { %v4569_v41 = vpop.f32.mrf.mxu0  ;;  %v4574_v9 = vpop.f32.mrf.mxu1 }
0x1864   :  { %v3053_v42 = vpop.f32.mrf.mxu1  ;;  %v3100_v44 = vpop.f32.mrf.mxu0 }
0x1865   :  { %v3156_v38 = vmul.f32 0.17677669, %v3100_v44 }
0x1866   :  { %v4575_v47 = vpop.f32.mrf.mxu1  ;;  %v4580_v49 = vpop.f32.mrf.mxu0 }
0x1867   :  { %v3160_v51 = vadd.f32 %v3159_v45, %v3156_v38 }
0x1868   :  { %v3103_v53 = vpop.f32.mrf.mxu0  ;;  %v3150_v50 = vpop.f32.mrf.mxu1 }
0x1869   :  { %v3157_v54 = vmul.f32 0.17677669, %v3150_v50  ;;  %v3162_v52 = vsel %vm600_vm3, %v3160_v51, -inf }
0x186a   :  { %3163 = vmax.xlane.f32.xlu1 %v3162_v52  ;;  %v4581_v39 = vpop.f32.mrf.mxu0  ;;  %v4586_v48 = vpop.f32.mrf.mxu1 }
0x186b   :  { %v3161_v55 = vadd.f32 %v3159_v45, %v3157_v54 }
0x186c   :  { %v3153_v7 = vpop.f32.mrf.mxu1 }
0x186d   :  { %v3165_v56 = vsel %vm600_vm3, %v3161_v55, -inf }
0x186e   :  { %3166 = vmax.xlane.f32.xlu0 %v3165_v56  ;;  %v4587_v57 = vpop.f32.mrf.mxu1 }
0x187b   :  { %3186 = vrot.lane.b32.xlu1 %v5622_v24, %s5132_s19 }
0x187f   :  { %4655 = vrot.lane.b32.xlu1 %v4654_v22, %s5132_s19 }
0x1883   :  { %4660 = vrot.lane.b32.xlu1 %v4659_v58, %s5122_s30  ;;  %s3912_s30 = sshll.u32 %s5139_s7, 4  ;;  %s3913_s30 = int_to_ptr.vmem [resolvable:$true] %s3912_s30 }
0x1884   :  { %s5089_s9 = scalar_lea.vmem %s3913_s30, 256  ;;  %p5094_p13 = scmp.lt.s32.totalorder %s3913_s30, %s3913_s30 }
0x1885   :  { %p5090_p12 = scmp.ne.s32.totalorder %s3913_s30, %s5089_s9  ;;  %p5095_p0 = scmp.lt.s32.totalorder %s5089_s9, %s5089_s9 }
0x1887   :  { %p5096_p1 = por %p5095_p0, %p5094_p13 }
0x1889   :  { %p5097_p2 = pnand %p5096_p1, %p5090_p12 }
0x18f3   :  { %v3164_v61 = vpop.xlane.xlu1 %3163 }
0x18f4   :  { %v3168_v2 = vsub.f32 %v3160_v51, %v3164_v61 }
0x18f6   :  { %v3170_v16 = vmul.f32 1.442695, %v3168_v2 }
0x18f7   :  { %v3187_v10 = vpop.permute.xlu1 %3186  ;;  %v3167_v20 = vpop.xlane.xlu0 %3166 }
0x18f8   :  { %4897 = vpow2.f32 %v3170_v16  ;;  %v3192_v11 = vsel %vm628_vm2, %v3187_v10, 0  ;;  %v3169_v12 = vsub.f32 %v3161_v55, %v3167_v20  ;;  %v3424_v10 = vrot.slane %v5580_v37, %v1544_v23 }
0x18f9   :  { %4589 = vmatpush3.bf16.msra.mxu0 %v3192_v11 }
0x18fa   :  { %v3172_v15 = vmul.f32 1.442695, %v3169_v12  ;;  %4600 = vmatprep.subr.bf16.mxu0 %v5135_v4 }
0x18fb   :  { %v4656_v51 = vpop.permute.xlu1 %4655 }
0x18fc   :  { %4899 = vpow2.f32 %v3172_v15  ;;  %v4658_v50 = vunpack.i.h.bf16 %v4656_v51  ;;  %v4657_v54 = vunpack.i.l.bf16 %v4656_v51  ;;  %v3452_v51 = vrot.slane %v5580_v37, %v1572_v63  ;;  %v4801_v63 = vld [vmem:[#allocation14 + $0xe8] sm:$0xff]  }
0x18fe   :  { %v3307_v48 = vsel %vm502_vm1, %v5662_v36, %v4658_v50  ;;  %v3306_v55 = vsel %vm502_vm1, %v5660_v32, %v4657_v54 }
0x18ff   :  { %v4661_v53 = vpop.permute.xlu1 %4660 }
0x1900   :  { %v4663_v52 = vunpack.i.h.bf16 %v4661_v53  ;;  %v4662_v39 = vunpack.i.l.bf16 %v4661_v53 }
0x1902   :  { %v3309_v57 = vsel %vm1428_vm4, %v3307_v48, %v4663_v52  ;;  %v3308_v58 = vsel %vm1428_vm4, %v3306_v55, %v4662_v39  ;;  %v3458_v52 = vrot.slane %v5580_v37, %v1578_v8  ;;  %v4805_v8 = vld [vmem:[#allocation14 + $0xd8] sm:$0xff]  }
0x1903   :  { %v4806_v37 = vld [vmem:[#allocation14 + $0x98] sm:$0xff]  }
0x1905   :  { %v4898_v24 = vpop.eup %4897 }
0x1906   :  { %v3174_v31 = vsel %vm600_vm3, %v4898_v24, 0.0 }
0x1907   :  { %3175 = vadd.xlane.f32.xlu0 %v3174_v31 }
0x1909   :  { %v4900_v62 = vpop.eup %4899 }
0x190a   :  { %v3177_v22 = vsel %vm600_vm3, %v4900_v62, 0.0 }
0x190b   :  { %3178 = vadd.xlane.f32.xlu0 %v3177_v22  ;;  %v4775_v22 = vld [vmem:[#allocation11 + $0xf4] ss:$8 sps:$4 sm:$0xff]  }
0x1921   :  { %3234 = vrot.lane.b32.xlu0 %v5626_v26, %s5132_s19  ;;  %v4765_v26 = vld [vmem:[#allocation7 + $0x78] sm:$0xff]  }
0x1990   :  { %v3176_v27 = vpop.xlane.xlu0 %3175 }
0x1991   :  { %4901 = vrcp.f32 %v3176_v27 }
0x1994   :  { %v3179_v18 = vpop.xlane.xlu0 %3178 }
0x1995   :  { %4903 = vrcp.f32 %v3179_v18 }
0x1998   :  { %v3235_v19 = vpop.permute.xlu0 %3234 }
0x1999   :  { %v3240_v0 = vsel %vm628_vm2, %v3235_v19, 0 }
0x199a   :  { %4595 = vmatpush3.bf16.msra.mxu1 %v3240_v0 }
0x199b   :  { %3572 = vmatprep.subr.bf16.mxu1 %v4775_v22 }
0x199e   :  { %v4902_v60 = vpop.eup %4901 }
0x199f   :  { %v3182_v25 = vmul.f32 %v4902_v60, %v4898_v24 }
0x19a1   :  { %v3184_v29 = vpack.c.bf16 %v3182_v25, %v3182_v25  ;;  %v4778_v25 = vld [vmem:[#allocation11 + $0xe4] ss:$8 sps:$4 sm:$0xff]  }
0x19a2   :  { %v4904_v21 = vpop.eup %4903 }
0x19a3   :  { %4591 = vmatmul.mubr.msk.bf16.vlgmr.msra.gmra.mxu0 %vm600_vm3, %v3184_v29  ;;  %v3183_v17 = vmul.f32 %v4904_v21, %v4900_v62  ;;  %v4773_v62 = vld [vmem:[#allocation11 + $0xf0] ss:$8 sps:$4 sm:$0xff]   ;;  %v4776_v29 = vld [vmem:[#allocation11 + $0xe0] ss:$8 sps:$4 sm:$0xff]   ;;  %v4781_v21 = vld [vmem:[#allocation11 + $0xd4] ss:$8 sps:$4 sm:$0xff]  }
0x19a4   :  { %4616 = vmatprep.mubr.msk.bf16.mxu0 %vm5136_vm0, %v5135_v4  ;;  %4601 = vmatpush3.bf16.msra.mxu0 %v4765_v26  ;;  %v4784_v26 = vld [vmem:[#allocation11 + $0xc4] ss:$8 sps:$4 sm:$0xff]  }
0x19a5   :  { %v3185_v46 = vpack.c.bf16 %v3183_v17, %v3183_v17  ;;  %4602 = vmatprep.subr.bf16.mxu0 %v5135_v4  ;;  %v4779_v17 = vld [vmem:[#allocation11 + $0xd0] ss:$8 sps:$4 sm:$0xff]  }
0x19a7   :  { %4597 = vmatmul.mubr.msk.bf16.vlgmr.msra.gmra.mxu1 %vm600_vm3, %v3185_v46  ;;  %v4782_v46 = vld [vmem:[#allocation11 + $0xc0] ss:$8 sps:$4 sm:$0xff]  }
0x19a8   :  { %3604 = vmatprep.mubr.bf16.mxu1 %v5138_v5  ;;  %4603 = vmatpush3.bf16.msra.mxu0 %v4766_v33  ;;  %v4771_v5 = vld [vmem:[#allocation7 + $0x48] sm:$0xff]  }
0x19a9   :  { %4604 = vmatprep.subr.bf16.mxu0 %v5135_v4  ;;  %3573 = vmatpush1.bf16.msra.mxu1 %v4773_v62  ;;  %v4787_v33 = vld [vmem:[#allocation11 + $0xb4] ss:$8 sps:$4 sm:$0xff]  }
0x19aa   :  { %3574 = vmatprep.subr.bf16.mxu1 %v4778_v25 }
0x19ac   :  { %4605 = vmatpush3.bf16.msra.mxu0 %v4767_v13  ;;  %v4785_v13 = vld [vmem:[#allocation11 + $0xb0] ss:$8 sps:$4 sm:$0xff]  }
0x19ad   :  { %4606 = vmatprep.subr.bf16.mxu0 %v5135_v4  ;;  %3575 = vmatpush1.bf16.msra.mxu1 %v4776_v29 }
0x19ae   :  { %3576 = vmatprep.subr.bf16.mxu1 %v4781_v21 }
0x19b0   :  { %4607 = vmatpush3.bf16.msra.mxu0 %v4768_v14  ;;  %v4790_v14 = vld [vmem:[#allocation11 + $0xa4] ss:$8 sps:$4 sm:$0xff]  }
0x19b1   :  { %4608 = vmatprep.subr.bf16.mxu0 %v5135_v4  ;;  %3577 = vmatpush1.bf16.msra.mxu1 %v4779_v17 }
0x19b2   :  { %3578 = vmatprep.subr.bf16.mxu1 %v4784_v26 }
0x19b4   :  { %4609 = vmatpush3.bf16.msra.mxu0 %v4769_v59  ;;  %v4788_v59 = vld [vmem:[#allocation11 + $0xa0] ss:$8 sps:$4 sm:$0xff]  }
0x19b5   :  { %4610 = vmatprep.subr.bf16.mxu0 %v5135_v4  ;;  %3579 = vmatpush1.bf16.msra.mxu1 %v4782_v46 }
0x19b6   :  { %3580 = vmatprep.subr.bf16.mxu1 %v4787_v33 }
0x19b8   :  { %4611 = vmatpush3.bf16.msra.mxu0 %v4770_v3  ;;  %v4793_v3 = vld [vmem:[#allocation11 + $0x94] ss:$8 sps:$4 sm:$0xff]  }
0x19b9   :  { %4612 = vmatprep.subr.bf16.mxu0 %v5135_v4  ;;  %3581 = vmatpush1.bf16.msra.mxu1 %v4785_v13 }
0x19ba   :  { %3582 = vmatprep.subr.bf16.mxu1 %v4790_v14 }
0x19bc   :  { %4613 = vmatpush3.bf16.msra.mxu0 %v4771_v5  ;;  %v4791_v5 = vld [vmem:[#allocation11 + $0x90] ss:$8 sps:$4 sm:$0xff]  }
0x19bd   :  { %4614 = vmatprep.subr.bf16.mxu0 %v5135_v4  ;;  %3583 = vmatpush1.bf16.msra.mxu1 %v4788_v59 }
0x19be   :  { %3584 = vmatprep.subr.bf16.mxu1 %v4793_v3 }
0x19c0   :  { %4615 = vmatpush3.bf16.msra.mxu0 %v4772_v28  ;;  %v4796_v28 = vld [vmem:[#allocation11 + $0x84] ss:$8 sps:$4 sm:$0xff]  }
0x19c1   :  { %3585 = vmatpush1.bf16.msra.mxu1 %v4791_v5 }
0x19c2   :  { %3586 = vmatprep.subr.bf16.mxu1 %v4796_v28 }
0x1a63   :  { %v3228_v30 = vpop.f32.mrf.mxu0 }
0x1a65   :  { %v4592_v41 = vpop.f32.mrf.mxu0 }
0x1a67   :  { %v3231_v9 = vpop.f32.mrf.mxu0  ;;  %v3276_v42 = vpop.f32.mrf.mxu1 }
0x1a68   :  { %v4664_v44 = vpack.i.bf16 %v3276_v42, %v3228_v30  ;;  %v4794_v30 = vld [vmem:[#allocation11 + $0x80] ss:$8 sps:$4 sm:$0xff]  }
0x1a69   :  { %v4593_v45 = vpop.f32.mrf.mxu0  ;;  %v4598_v38 = vpop.f32.mrf.mxu1  ;;  %3587 = vmatpush1.bf16.msra.mxu1 %v4794_v30 }
0x1a6a   :  { %4665 = vrot.lane.b32.xlu1 %v4664_v44, %s5137_s6 }
0x1a6b   :  { %v3279_v47 = vpop.f32.mrf.mxu1 }
0x1a6d   :  { %v4599_v49 = vpop.f32.mrf.mxu1 }
0x1adc   :  { %v4666_v4 = vpop.permute.xlu1 %4665 }
0x1add   :  { %v4668_v7 = vunpack.i.h.bf16 %v4666_v4  ;;  %v4667_v56 = vunpack.i.l.bf16 %v4666_v4 }
0x1adf   :  { %v3311_v61 = vsel %vm1431_vm5, %v3309_v57, %v4668_v7  ;;  %v3310_v2 = vsel %vm1431_vm5, %v3308_v58, %v4667_v56  ;;  %v4797_v7 = vld [vmem:[#allocation14 + $0xf8] sm:$0xff]   ;;  %v4799_v57 = vld [vmem:[#allocation14 + $0xf0] sm:$0xff]  }
0x1ae0   :  { %v3312_v16 = vpack.c.bf16 %v3311_v61, %v3310_v2  ;;  %v4798_v56 = vld [vmem:[#allocation14 + $0xb8] sm:$0xff]   ;;  %4246 = vmatprep.subr.bf16.mxu0 %v4797_v7  ;;  %v4800_v58 = vld [vmem:[#allocation14 + $0xb0] sm:$0xff]   ;;  %v4802_v61 = vld [vmem:[#allocation14 + $0xa8] sm:$0xff]  }
0x1ae1   :  { %v4803_v2 = vld [vmem:[#allocation14 + $0xe0] sm:$0xff]  }
0x1ae2   :  { %4617 = vmatmul.mubr.bf16.vlgmr.msra.gmra.mxu0 %v3312_v16  ;;  %v4804_v16 = vld [vmem:[#allocation14 + $0xa0] sm:$0xff]  }
0x1ae3   :  { %4247 = vmatpush3.bf16.msra.mxu0 %v4798_v56 }
0x1ae4   :  { %4248 = vmatprep.subr.bf16.mxu0 %v4799_v57 }
0x1ae7   :  { %4249 = vmatpush3.bf16.msra.mxu0 %v4800_v58 }
0x1ae8   :  { %4250 = vmatprep.subr.bf16.mxu0 %v4801_v63 }
0x1aeb   :  { %4251 = vmatpush3.bf16.msra.mxu0 %v4802_v61 }
0x1aec   :  { %4252 = vmatprep.subr.bf16.mxu0 %v4803_v2 }
0x1aef   :  { %4253 = vmatpush3.bf16.msra.mxu0 %v4804_v16 }
0x1af0   :  { %4254 = vmatprep.subr.bf16.mxu0 %v4805_v8 }
0x1af3   :  { %4255 = vmatpush3.bf16.msra.mxu0 %v4806_v37 }
0x1ba2   :  { %v3412_v36 = vpop.f32.mrf.mxu0 }
0x1ba3   :  { %v3419_v20 = vadd.f32 %v3412_v36, %v5555_v1  ;;  %v4808_v36 = vld [vmem:[#allocation14 + $0x90] sm:$0xff]  }
0x1ba4   :  { %v4618_v32 = vpop.f32.mrf.mxu0 }
0x1ba5   :  { %v5783_v11 = vadd.f32 %v3424_v10, %v3419_v20  ;;  %v4809_v20 = vld [vmem:[#allocation14 + $0xc8] sm:$0xff]  }
0x1ba6   :  { %v3415_v12 = vpop.f32.mrf.mxu0  ;;  %v4810_v32 = vld [vmem:[#allocation14 + $0x88] sm:$0xff]  }
0x1ba7   :  { %v3420_v15 = vadd.f32 %v3415_v12, %v5559_v6  ;;  %3427 = vadd.xlane.f32.xlu0 %v5783_v11  ;;  %v4811_v12 = vld [vmem:[#allocation14 + $0xc0] sm:$0xff]  }
0x1ba8   :  { %v4619_v24 = vpop.f32.mrf.mxu0 }
0x1ba9   :  { %v5787_v31 = vadd.f32 %v3424_v10, %v3420_v15  ;;  %v4807_v10 = vld [vmem:[#allocation14 + $0xd0] sm:$0xff]   ;;  %v4812_v15 = vld [vmem:[#allocation14 + $0x80] sm:$0xff]   ;;  %v3480_v24 = vld [vmem:[#allocation13 + $0x2] sm:$0x3] }
0x1baa   :  { %4256 = vmatprep.subr.bf16.mxu0 %v4807_v10  ;;  %v3485_v62 = vrot.slane %v3480_v24, %v5265_v35  ;;  %v3489_v22 = vrot.slane %v3480_v24, %v5273_v40 }
0x1bab   :  { %3429 = vadd.xlane.f32.xlu1 %v5787_v31  ;;  %4257 = vmatpush3.bf16.msra.mxu0 %v4808_v36 }
0x1bac   :  { %4258 = vmatprep.subr.bf16.mxu0 %v4809_v20 }
0x1baf   :  { %4259 = vmatpush3.bf16.msra.mxu0 %v4810_v32 }
0x1bb0   :  { %4260 = vmatprep.subr.bf16.mxu0 %v4811_v12 }
0x1bb3   :  { %4261 = vmatpush3.bf16.msra.mxu0 %v4812_v15 }
0x1c30   :  { %v3428_v23 = vpop.xlane.xlu0 %3427 }
0x1c31   :  { %v3431_v27 = vmul.f32 0.0078125, %v3428_v23 }
0x1c33   :  { %v3433_v1 = vsub.f32 %v5783_v11, %v3431_v27 }
0x1c34   :  { %v3430_v18 = vpop.xlane.xlu1 %3429 }
0x1c35   :  { %v3432_v19 = vmul.f32 0.0078125, %v3430_v18  ;;  %v3435_v0 = vmul.f32 %v3433_v1, %v3433_v1 }
0x1c37   :  { %v3434_v6 = vsub.f32 %v5787_v31, %v3432_v19  ;;  %3437 = vadd.xlane.f32.xlu0 %v3435_v0 }
0x1c39   :  { %v3436_v60 = vmul.f32 %v3434_v6, %v3434_v6 }
0x1c3b   :  { %3439 = vadd.xlane.f32.xlu0 %v3436_v60 }
0x1cc0   :  { %v3438_v41 = vpop.xlane.xlu0 %3437 }
0x1cc1   :  { %v3441_v9 = vmul.f32 0.0078125, %v3438_v41 }
0x1cc3   :  { %v3443_v42 = vadd.f32 1e-05, %v3441_v9 }
0x1cc4   :  { %v3440_v44 = vpop.xlane.xlu0 %3439 }
0x1cc5   :  { %4905 = vrsqrt.f32 %v3443_v42  ;;  %v3442_v45 = vmul.f32 0.0078125, %v3440_v44 }
0x1cc7   :  { %v3444_v38 = vadd.f32 1e-05, %v3442_v45 }
0x1cc9   :  { %4907 = vrsqrt.f32 %v3444_v38 }
0x1cd2   :  { %v4906_v47 = vpop.eup %4905 }
0x1cd3   :  { %v3447_v49 = vmul.f32 %v4906_v47, %v3433_v1 }
0x1cd5   :  { %v3453_v54 = vmul.f32 %v3452_v51, %v3447_v49 }
0x1cd6   :  { %v4908_v53 = vpop.eup %4907 }
0x1cd7   :  { %v3448_v50 = vmul.f32 %v4908_v53, %v3434_v6  ;;  %v3459_v4 = vadd.f32 %v3458_v52, %v3453_v54 }
0x1cd9   :  { %v3454_v39 = vmul.f32 %v3452_v51, %v3448_v50 }
0x1cdb   :  { %v3460_v48 = vadd.f32 %v3458_v52, %v3454_v39 }
0x1cdd   :  { %v3461_v55 = vpack.c.bf16 %v3460_v48, %v3459_v4 }
0x1cdf   :  { %3605 = vmatmul.mubr.bf16.vlgmr.msra.gmra.mxu1 %v3461_v55 }
0x1d9f   :  { %v3606_v23 = vpop.f32.mrf.mxu1 }
0x1da0   :  { %v5800_v27 = vadd.f32 %v3606_v23, %v3485_v62 }
0x1da1   :  { %v3608_v1 = vpop.f32.mrf.mxu1 }
0x1da2   :  { %v5803_v18 = vmul.f32 0.70710677, %v5800_v27  ;;  %v5805_v19 = vadd.f32 %v3608_v1, %v3489_v22 }
0x1da3   :  { %v3610_v0 = vpop.f32.mrf.mxu1 }
0x1da4   :  { %vm3623_vm10 = vcmp.ge.f32.partialorder %v5803_v18, 0.0  ;;  %v3627_v6 = vsub.f32 0.0, %v5803_v18  ;;  %v5810_v60 = vmul.f32 0.70710677, %v5805_v19  ;;  %v5812_v35 = vadd.f32 %v3610_v0, %v3485_v62 }
0x1da5   :  { %v3612_v40 = vpop.f32.mrf.mxu1 }
0x1da6   :  { %v3631_v25 = vsel %vm3623_vm10, %v5803_v18, %v3627_v6  ;;  %vm3624_vm11 = vcmp.ge.f32.partialorder %v5810_v60, 0.0  ;;  %v3628_v29 = vsub.f32 0.0, %v5810_v60  ;;  %v5819_v21 = vadd.f32 %v3612_v40, %v3489_v22 }
0x1da7   :  { %v3635_v17 = vmul.f32 0.3275911, %v3631_v25  ;;  %v5822_v46 = vmul.f32 0.70710677, %v5812_v35  ;;  %v3687_v45 = vsub.f32 0.0, %v3631_v25  ;;  %v3615_v18 = vmul.f32 0.5, %v5800_v27 }
0x1da8   :  { %v3632_v26 = vsel %vm3624_vm11, %v5810_v60, %v3628_v29  ;;  %v5828_v33 = vmul.f32 0.70710677, %v5819_v21  ;;  %v3616_v60 = vmul.f32 0.5, %v5805_v19 }
0x1da9   :  { %v3639_v13 = vadd.f32 1.0, %v3635_v17  ;;  %v3636_v14 = vmul.f32 0.3275911, %v3632_v26  ;;  %vm3625_vm12 = vcmp.ge.f32.partialorder %v5822_v46, 0.0  ;;  %v3629_v59 = vsub.f32 0.0, %v5822_v46 }
0x1daa   :  { %vm3626_vm13 = vcmp.ge.f32.partialorder %v5828_v33, 0.0  ;;  %v3630_v3 = vsub.f32 0.0, %v5828_v33  ;;  %v3688_v38 = vsub.f32 0.0, %v3632_v26  ;;  %v3691_v47 = vmul.f32 %v3687_v45, %v3631_v25 }
0x1dab   :  { %4909 = vrcp.f32 %v3639_v13  ;;  %v3640_v5 = vadd.f32 1.0, %v3636_v14  ;;  %v3633_v28 = vsel %vm3625_vm12, %v5822_v46, %v3629_v59 }
0x1dac   :  { %v3634_v30 = vsel %vm3626_vm13, %v5828_v33, %v3630_v3  ;;  %v3637_v41 = vmul.f32 0.3275911, %v3633_v28  ;;  %v3689_v49 = vsub.f32 0.0, %v3633_v28  ;;  %v3692_v53 = vmul.f32 %v3688_v38, %v3632_v26 }
0x1dad   :  { %4911 = vrcp.f32 %v3640_v5  ;;  %v3638_v9 = vmul.f32 0.3275911, %v3634_v30  ;;  %v3690_v50 = vsub.f32 0.0, %v3634_v30  ;;  %v3695_v52 = vmul.f32 1.442695, %v3691_v47 }
0x1dae   :  { %v3641_v42 = vadd.f32 1.0, %v3637_v41  ;;  %v3693_v48 = vmul.f32 %v3689_v49, %v3633_v28  ;;  %v3697_v7 = vmul.f32 1.442695, %v3692_v53 }
0x1daf   :  { %v3642_v44 = vadd.f32 1.0, %v3638_v9  ;;  %v3694_v56 = vmul.f32 %v3690_v50, %v3634_v30 }
0x1db0   :  { %4913 = vrcp.f32 %v3641_v42  ;;  %v3699_v8 = vmul.f32 1.442695, %v3693_v48 }
0x1db1   :  { %4915 = vrcp.f32 %v3642_v44  ;;  %v3701_v36 = vmul.f32 1.442695, %v3694_v56 }
0x1db2   :  { %4917 = vpow2.f32 %v3695_v52 }
0x1db3   :  { %4919 = vpow2.f32 %v3697_v7 }
0x1db4   :  { %4921 = vpow2.f32 %v3699_v8  ;;  %v3617_v8 = vmul.f32 0.5, %v5812_v35 }
0x1db5   :  { %4923 = vpow2.f32 %v3701_v36  ;;  %v3618_v36 = vmul.f32 0.5, %v5819_v21 }
0x1db8   :  { %v4910_v51 = vpop.eup %4909 }
0x1db9   :  { %v3651_v54 = vmul.f32 1.0614054, %v4910_v51 }
0x1dba   :  { %v4912_v39 = vpop.eup %4911 }
0x1dbb   :  { %v3655_v4 = vadd.f32 -1.4531521, %v3651_v54  ;;  %v3652_v55 = vmul.f32 1.0614054, %v4912_v39 }
0x1dbd   :  { %v3659_v57 = vmul.f32 %v4910_v51, %v3655_v4  ;;  %v4914_v58 = vpop.eup %4913  ;;  %v3656_v63 = vadd.f32 -1.4531521, %v3652_v55 }
0x1dbe   :  { %v4916_v61 = vpop.eup %4915  ;;  %v3653_v16 = vmul.f32 1.0614054, %v4914_v58 }
0x1dbf   :  { %v3663_v2 = vadd.f32 1.4214138, %v3659_v57  ;;  %v3660_v37 = vmul.f32 %v4912_v39, %v3656_v63  ;;  %v3654_v10 = vmul.f32 1.0614054, %v4916_v61  ;;  %v4918_v59 = vpop.eup %4917 }
0x1dc0   :  { %v3657_v32 = vadd.f32 -1.4531521, %v3653_v16  ;;  %v4920_v42 = vpop.eup %4919 }
0x1dc1   :  { %v3667_v20 = vmul.f32 %v4910_v51, %v3663_v2  ;;  %v3664_v12 = vadd.f32 1.4214138, %v3660_v37  ;;  %v3658_v15 = vadd.f32 -1.4531521, %v3654_v10  ;;  %v4922_v53 = vpop.eup %4921 }
0x1dc2   :  { %v3661_v62 = vmul.f32 %v4914_v58, %v3657_v32  ;;  %v4924_v52 = vpop.eup %4923 }
0x1dc3   :  { %v3671_v24 = vadd.f32 -0.28449672, %v3667_v20  ;;  %v3668_v22 = vmul.f32 %v4912_v39, %v3664_v12  ;;  %v3662_v23 = vmul.f32 %v4916_v61, %v3658_v15 }
0x1dc4   :  { %v3665_v0 = vadd.f32 1.4214138, %v3661_v62 }
0x1dc5   :  { %v3675_v1 = vmul.f32 %v4910_v51, %v3671_v24  ;;  %v3672_v6 = vadd.f32 -0.28449672, %v3668_v22  ;;  %v3666_v40 = vadd.f32 1.4214138, %v3662_v23  ;;  %v4928_v22 = vld [vmem:[#allocation10 + $0x8] sm:$0xff] }
0x1dc6   :  { %v3669_v29 = vmul.f32 %v4914_v58, %v3665_v0  ;;  %v3765_v33 = vrot.slane %v4928_v22, %v1882_v43 }
0x1dc7   :  { %v3679_v25 = vadd.f32 0.2548296, %v3675_v1  ;;  %v3676_v17 = vmul.f32 %v4912_v39, %v3672_v6  ;;  %v3670_v26 = vmul.f32 %v4916_v61, %v3666_v40 }
0x1dc8   :  { %v3673_v14 = vadd.f32 -0.28449672, %v3669_v29 }
0x1dc9   :  { %v3683_v13 = vmul.f32 %v4910_v51, %v3679_v25  ;;  %v3680_v3 = vadd.f32 0.2548296, %v3676_v17  ;;  %v3674_v5 = vadd.f32 -0.28449672, %v3670_v26 }
0x1dca   :  { %v3677_v30 = vmul.f32 %v4914_v58, %v3673_v14 }
0x1dcb   :  { %v3703_v28 = vmul.f32 %v4918_v59, %v3683_v13  ;;  %v3684_v41 = vmul.f32 %v4912_v39, %v3680_v3  ;;  %v3678_v9 = vmul.f32 %v4916_v61, %v3674_v5 }
0x1dcc   :  { %v3681_v45 = vadd.f32 0.2548296, %v3677_v30 }
0x1dcd   :  { %v3707_v44 = vsub.f32 1.0, %v3703_v28  ;;  %v3704_v38 = vmul.f32 %v4920_v42, %v3684_v41  ;;  %v3682_v47 = vadd.f32 0.2548296, %v3678_v9 }
0x1dce   :  { %v3685_v49 = vmul.f32 %v4914_v58, %v3681_v45 }
0x1dcf   :  { %v3708_v50 = vsub.f32 1.0, %v3704_v38  ;;  %v3686_v54 = vmul.f32 %v4916_v61, %v3682_v47  ;;  %v3711_v4 = vsub.f32 0.0, %v3707_v44 }
0x1dd0   :  { %v3705_v51 = vmul.f32 %v4922_v53, %v3685_v49 }
0x1dd1   :  { %v3712_v48 = vsub.f32 0.0, %v3708_v50  ;;  %v3706_v55 = vmul.f32 %v4924_v52, %v3686_v54  ;;  %v3715_v57 = vsel %vm3623_vm10, %v3707_v44, %v3711_v4 }
0x1dd2   :  { %v3709_v7 = vsub.f32 1.0, %v3705_v51  ;;  %v3719_v61 = vadd.f32 1.0, %v3715_v57 }
0x1dd3   :  { %v3716_v56 = vsel %vm3624_vm11, %v3708_v50, %v3712_v48  ;;  %v3710_v39 = vsub.f32 1.0, %v3706_v55 }
0x1dd4   :  { %v3713_v63 = vsub.f32 0.0, %v3709_v7  ;;  %v3720_v16 = vadd.f32 1.0, %v3716_v56  ;;  %v3723_v24 = vmul.f32 %v3719_v61, %v3615_v18 }
0x1dd5   :  { %v3714_v2 = vsub.f32 0.0, %v3710_v39 }
0x1dd6   :  { %v3717_v58 = vsel %vm3625_vm12, %v3709_v7, %v3713_v63  ;;  %v3724_v12 = vmul.f32 %v3720_v16, %v3616_v60 }
0x1dd7   :  { %v3721_v37 = vadd.f32 1.0, %v3717_v58  ;;  %v3718_v10 = vsel %vm3626_vm13, %v3710_v39, %v3714_v2 }
0x1dd8   :  { %v3722_v20 = vadd.f32 1.0, %v3718_v10 }
0x1dd9   :  { %v3725_v32 = vmul.f32 %v3721_v37, %v3617_v8 }
0x1dda   :  { %v3726_v15 = vmul.f32 %v3722_v20, %v3618_v36 }
0x1ddb   :  { %v3727_v62 = vpack.c.bf16 %v3725_v32, %v3723_v24 }
0x1ddc   :  { %v3728_v46 = vpack.c.bf16 %v3726_v15, %v3724_v12 }
0x1dde   :  { %3894 = vmatprep.mubr.bf16.mxu0 %v3728_v46 }
0x1ddf   :  { %3895 = vmatmul.mubr.bf16.vlgmr.msra.gmra.mxu0 %v3727_v62 }
0x1e9f   :  { %v4262_v35 = vpop.f32.mrf.mxu0 }
0x1ea1   :  { %v4263_v23 = vpop.f32.mrf.mxu0 }
0x1ea2   :  { %v4264_v19 = vadd.f32 %v4263_v23, %v4262_v35 }
0x1ea3   :  { %v4265_v1 = vpop.f32.mrf.mxu0 }
0x1ea4   :  { %v3897_v21 = vadd.f32 %v4264_v19, %v3765_v33 }
0x1ea5   :  { %v4266_v0 = vpop.f32.mrf.mxu0 }
0x1ea6   :  { %v3903_v27 = vadd.f32 %v3897_v21, %v5783_v11  ;;  %v4267_v6 = vadd.f32 %v4266_v0, %v4265_v1 }
0x1ea8   :  { %3905 = vst [vmem:[#allocation16] sm:$0xff] %v3903_v27  ;;  %v3900_v40 = vadd.f32 %v4267_v6, %v3765_v33 }
0x1eaa   :  { %v3904_v25 = vadd.f32 %v3900_v40, %v5787_v31 }
0x1eac   :  { %3906 = vst [vmem:[#allocation16 + $0x8] sm:$0xff] %v3904_v25 }
0x1ead   :  { %5100 = shalt.err (!%p5097_p2)
}
0x1eae   :  { %3918 = dma.vmem_to_hbm [thread:$0]  %s3913_s30, 256, %s5870_s8, [#allocation4], %s5126_s17, %s5126_s17, %s5127_s18  }
0x1eaf   :  { %5119 = dma.done.wait [#allocation4], 256  }
0x1eb0   :  { %5120 = vsyncadd [#allocation4], 4294967040 }
0x1eb1   :  { %3922 = vsyncpa [#allocation3], 1 }
0x1eb2   :  { %3923 = vsyncpa [#allocation6], 1 }
0x1eb3   :  { %3924 = vsyncpa [#allocation9], 1 }
0x1eb4   :  { %3925 = vsyncpa [#allocation12], 1 }
0x1eb5   :  { %3926 = vsyncpa [#allocation15], 1 }
0x1eb6   :  { %3927 = vsyncpa [#allocation4], 1 }

</bundles_post_ra>
